<compile_context>
chip_gen: v5e
topology: v5e:2x2
jax: 0.10.0
libtpu: 0.0.40
codegen_flags: <defaults>
</compile_context>

<pallas_src>
import functools

import jax
import jax.numpy as jnp
from jax.experimental import pallas as pl
from jax.experimental.pallas import tpu as pltpu

# CORE_PARALLEL only changes codegen on multi-TensorCore chips (v7x); resolve it
# defensively so the script also runs on jax versions without the constant.
_CORE_PARALLEL = getattr(pltpu, "CORE_PARALLEL", "parallel")


def _round_up(n, m):
    return ((n + m - 1) // m) * m


def _resnet4_kernel(x_ref, w0_ref, b0_ref, w1_ref, b1_ref, w2_ref, b2_ref,
                    out_ref, *, H, W):
    # x_ref:   (B, H*W)     one flattened single-channel image per sublane row (VMEM)
    # w*_ref:  flattened conv weights (SMEM); b*_ref: biases (SMEM)
    # out_ref: (3, B, H*W)  channel-major, lane-dense output block (VMEM)
    B, HW = x_ref.shape
    C = 3
    n_chunks = B // 8
    log2_w = W.bit_length() - 1  # W is a power of two (checked in the wrapper)

    # ---------- chunk-invariant setup, hoisted above the batch-chunk loop ----------
    # Decompose the flattened lane index into (row, col) of the image (no int div).
    flat = jax.lax.broadcasted_iota(jnp.int32, (8, HW), 1)
    rowi = flat >> log2_w
    coli = flat & (W - 1)

    # 4 edge masks (instead of 8 composite ones): applied dy/dx-decomposed below.
    m_row = {
        -1: jnp.where(rowi >= 1, 1.0, 0.0),        # tap reads row r-1 -> need r >= 1
        0: None,
        1: jnp.where(rowi < H - 1, 1.0, 0.0),      # tap reads row r+1 -> need r < H-1
    }
    m_col = {
        -1: jnp.where(coli >= 1, 1.0, 0.0),        # tap reads col c-1 -> need c >= 1
        0: None,
        1: jnp.where(coli < W - 1, 1.0, 0.0),      # tap reads col c+1 -> need c < W-1
    }

    # Hoisted SMEM scalar reads (loop-invariant): w[co][ci][ky*3+kx], b[co].
    def read_w(w_ref, cin):
        return [[[w_ref[(co * cin + ci) * 9 + k] for k in range(9)]
                 for ci in range(cin)] for co in range(C)]

    w0 = read_w(w0_ref, 1)
    w1 = read_w(w1_ref, 3)
    w2 = read_w(w2_ref, 3)
    b0 = [b0_ref[c] for c in range(C)]
    b1 = [b1_ref[c] for c in range(C)]
    b2 = [b2_ref[c] for c in range(C)]

    def conv3x3(chans, wts, bias):
        """3x3 'same' conv over a list of (8, HW) channels -> list of C channels."""
        accs = [None] * C
        for ci, arr in enumerate(chans):
            for iy, dy in enumerate((-1, 0, 1)):
                # Row shift: t[f] = arr[(f + dy*W) mod HW]; wrapped rows are zeroed
                # by the row mask.
                t = arr if dy == 0 else pltpu.roll(arr, (-dy * W) % HW, axis=1)
                if m_row[dy] is not None:
                    t = t * m_row[dy]
                for ix, dx in enumerate((-1, 0, 1)):
                    # Column shift on the row-masked intermediate; any lane that
                    # crossed a row boundary is zeroed by the column mask.
                    s = t if dx == 0 else pltpu.roll(t, (-dx) % HW, axis=1)
                    if m_col[dx] is not None:
                        s = s * m_col[dx]
                    k = iy * 3 + ix
                    for co in range(C):
                        term = wts[co][ci][k] * s
                        accs[co] = term if accs[co] is None else accs[co] + term
        return [accs[co] + bias[co] for co in range(C)]

    # ---------- batch-chunk loop: 8 sublane rows (images) per iteration ----------
    def chunk_body(c, carry):
        r0 = pl.multiple_of(c * 8, 8)
        x = x_ref[pl.ds(r0, 8), :]              # (8, HW), single input channel
        y0 = conv3x3([x], w0, b0)               # conv0: 1 -> 3
        y1 = conv3x3(y0, w1, b1)                # conv1: 3 -> 3 (no relu before conv2)
        y2 = conv3x3(y1, w2, b2)                # conv2: 3 -> 3
        for co in range(C):                     # relu2 + residual add, dense stores
            out_ref[co, pl.ds(r0, 8), :] = y0[co] + jnp.maximum(y2[co], 0.0)
        return carry

    jax.lax.fori_loop(0, n_chunks, chunk_body, 0)


@functools.partial(jax.jit, static_argnames=("batch_block", "core_parallel"))
def residual_net4_forward(x, params, *, batch_block=256, core_parallel=False):
    """x: (N, 1, H, W) float32 NCHW. Returns (N, 3, H, W) float32."""
    w0, b0, w1, b1, w2, b2 = params
    N, Cin, H, W = x.shape
    assert Cin == 1, "ResidualNet4 takes a single input channel"
    assert W > 0 and (W & (W - 1)) == 0, "lane-index masks assume W is a power of two"
    # TODO(synk): the whole flattened image lives in vregs per channel; very large
    # H*W would need spatial strip tiling (not required at these sizes).
    HW = H * W

    # Large batch block to amortize per-grid-step overhead; clamp to the (padded)
    # batch so tiny inputs don't do wasted work.
    B = min(_round_up(batch_block, 8), _round_up(N, 8))
    n_blocks = pl.cdiv(N, B)
    Npad = n_blocks * B

    x_flat = x.reshape(N, HW)                   # pure collapse of contiguous dims
    if Npad != N:
        x_flat = jnp.pad(x_flat, ((0, Npad - N), (0, 0)))

    kernel = functools.partial(_resnet4_kernel, H=H, W=W)
    smem = pl.BlockSpec(memory_space=pltpu.MemorySpace.SMEM)
    dim_sem = (_CORE_PARALLEL if core_parallel else "parallel",)

    # Per-block VMEM: (B*HW + 3*B*HW)*4 bytes, double-buffered (~2 MiB at B=256,
    # HW=256) -- far below the scoped VMEM default on every generation, so no
    # vmem_limit_bytes override is needed.
    out = pl.pallas_call(
        kernel,
        out_shape=jax.ShapeDtypeStruct((3, Npad, HW), jnp.float32),
        grid=(n_blocks,),
        in_specs=[
            pl.BlockSpec((B, HW), lambda n: (n, 0)),      # flattened images
            smem, smem, smem, smem, smem, smem,           # weights / biases
        ],
        out_specs=pl.BlockSpec((3, B, HW), lambda n: (0, n, 0)),
        compiler_params=pltpu.CompilerParams(dimension_semantics=dim_sem),
    )(x_flat, w0.reshape(-1), b0, w1.reshape(-1), b1, w2.reshape(-1), b2)

    # Layout plumbing back to NCHW to match the PyTorch module.  (If a consumer
    # accepts channel-major (3, N, H, W), dropping this transpose saves an extra
    # HBM round-trip of the output at large N.)
    return out[:, :N, :].transpose(1, 0, 2).reshape(N, 3, H, W)


def _ref_forward(x, params):
    """Pure-JAX reference matching the PyTorch forward (returned tensor only)."""
    w0, b0, w1, b1, w2, b2 = params

    def conv(x, w, b):
        y = jax.lax.conv_general_dilated(
            x, w, window_strides=(1, 1), padding=((1, 1), (1, 1)),
            dimension_numbers=("NCHW", "OIHW", "NCHW"))
        return y + b.reshape(1, -1, 1, 1)

    y0 = conv(x, w0, b0)
    y1 = conv(y0, w1, b1)            # note: no relu between conv1 and conv2
    y2 = jnp.maximum(conv(y1, w2, b2), 0.0)
    return y0 + y2


def _init_params(key):
    k = jax.random.split(key, 6)

    def u(key, shape, fan_in):
        bound = 1.0 / jnp.sqrt(fan_in)
        return jax.random.uniform(key, shape, jnp.float32, -bound, bound)

    w0 = u(k[0], (3, 1, 3, 3), 1 * 9)
    b0 = u(k[1], (3,), 1 * 9)
    w1 = u(k[2], (3, 3, 3, 3), 3 * 9)
    b1 = u(k[3], (3,), 3 * 9)
    w2 = u(k[4], (3, 3, 3, 3), 3 * 9)
    b2 = u(k[5], (3,), 3 * 9)
    return (w0, b0, w1, b1, w2, b2)


if __name__ == "__main__":
    key = jax.random.PRNGKey(0)
    kx1, kx2, kp = jax.random.split(key, 3)
    params = _init_params(kp)

    # 1) Small single-block check (exercises the inner 8-row chunk loop).
    x_small = jax.random.normal(kx1, (16, 1, 16, 16), jnp.float32)
    out_small = jax.block_until_ready(residual_net4_forward(x_small, params))
    ref_small = _ref_forward(x_small, params)
    assert out_small.shape == (16, 3, 16, 16)
    assert jnp.allclose(out_small, ref_small, atol=1e-4, rtol=1e-4), "small mismatch"

    # 2) Multi-block check (batch padding + grid loop). Try CORE_PARALLEL first so
    #    both v7x TensorCores are used; fall back to "parallel" if unsupported.
    x_big = jax.random.normal(kx2, (100, 1, 16, 16), jnp.float32)
    ref_big = _ref_forward(x_big, params)

    def run_big(core_parallel):
        return jax.block_until_ready(
            residual_net4_forward(x_big, params, batch_block=32,
                                  core_parallel=core_parallel))

    try:
        out_big = run_big(True)
        ok = bool(jnp.allclose(out_big, ref_big, atol=1e-4, rtol=1e-4))
    except Exception:
        ok = False
    if not ok:
        out_big = run_big(False)
    assert out_big.shape == (100, 3, 16, 16)
    assert jnp.allclose(out_big, ref_big, atol=1e-4, rtol=1e-4), "big mismatch"

    print("KERNEL_OK")
</pallas_src>

<mosaic_0001>
module attributes {stable_mosaic.version = 11 : i64} {
  func.func @_resnet4_kernel(%arg0: i32, %arg1: memref<16x256xf32, #tpu.memory_space<vmem>>, %arg2: memref<27xf32, #tpu.memory_space<smem>>, %arg3: memref<3xf32, #tpu.memory_space<smem>>, %arg4: memref<81xf32, #tpu.memory_space<smem>>, %arg5: memref<3xf32, #tpu.memory_space<smem>>, %arg6: memref<81xf32, #tpu.memory_space<smem>>, %arg7: memref<3xf32, #tpu.memory_space<smem>>, %arg8: memref<3x16x256xf32, #tpu.memory_space<vmem>>) attributes {dimension_semantics = [#tpu.dimension_semantics<parallel>], iteration_bounds = array<i64: 1>, scalar_prefetch = 0 : i64, scratch_operands = 0 : i64, tpu.core_type = #tpu.core_type<tc>, window_params = [{transform_indices = @transform_0, window_bounds = array<i64: 16, 256>}, {transform_indices = @transform_1, window_bounds = array<i64: 27>}, {transform_indices = @transform_2, window_bounds = array<i64: 3>}, {transform_indices = @transform_3, window_bounds = array<i64: 81>}, {transform_indices = @transform_4, window_bounds = array<i64: 3>}, {transform_indices = @transform_5, window_bounds = array<i64: 81>}, {transform_indices = @transform_6, window_bounds = array<i64: 3>}, {transform_indices = @transform_7, window_bounds = array<i64: 3, 16, 256>}]} {
    %0 = tpu.iota {dimensions = array<i32: 1>} : vector<8x256xi32>
    %c4_i32 = arith.constant 4 : i32
    %1 = vector.broadcast %c4_i32 : i32 to vector<8x256xi32>
    %2 = arith.shrsi %0, %1 : vector<8x256xi32>
    %c15_i32 = arith.constant 15 : i32
    %3 = vector.broadcast %c15_i32 : i32 to vector<8x256xi32>
    %4 = arith.andi %0, %3 : vector<8x256xi32>
    %c1_i32 = arith.constant 1 : i32
    %5 = vector.broadcast %c1_i32 : i32 to vector<8x256xi32>
    %6 = arith.cmpi sge, %2, %5 : vector<8x256xi32>
    %cst = arith.constant 1.000000e+00 : f32
    %cst_0 = arith.constant 0.000000e+00 : f32
    %7 = vector.broadcast %cst : f32 to vector<8x256xf32>
    %8 = vector.broadcast %cst_0 : f32 to vector<8x256xf32>
    %9 = arith.select %6, %7, %8 : vector<8x256xi1>, vector<8x256xf32>
    %c15_i32_1 = arith.constant 15 : i32
    %10 = vector.broadcast %c15_i32_1 : i32 to vector<8x256xi32>
    %11 = arith.cmpi slt, %2, %10 : vector<8x256xi32>
    %cst_2 = arith.constant 1.000000e+00 : f32
    %cst_3 = arith.constant 0.000000e+00 : f32
    %12 = vector.broadcast %cst_2 : f32 to vector<8x256xf32>
    %13 = vector.broadcast %cst_3 : f32 to vector<8x256xf32>
    %14 = arith.select %11, %12, %13 : vector<8x256xi1>, vector<8x256xf32>
    %c1_i32_4 = arith.constant 1 : i32
    %15 = vector.broadcast %c1_i32_4 : i32 to vector<8x256xi32>
    %16 = arith.cmpi sge, %4, %15 : vector<8x256xi32>
    %cst_5 = arith.constant 1.000000e+00 : f32
    %cst_6 = arith.constant 0.000000e+00 : f32
    %17 = vector.broadcast %cst_5 : f32 to vector<8x256xf32>
    %18 = vector.broadcast %cst_6 : f32 to vector<8x256xf32>
    %19 = arith.select %16, %17, %18 : vector<8x256xi1>, vector<8x256xf32>
    %c15_i32_7 = arith.constant 15 : i32
    %20 = vector.broadcast %c15_i32_7 : i32 to vector<8x256xi32>
    %21 = arith.cmpi slt, %4, %20 : vector<8x256xi32>
    %cst_8 = arith.constant 1.000000e+00 : f32
    %cst_9 = arith.constant 0.000000e+00 : f32
    %22 = vector.broadcast %cst_8 : f32 to vector<8x256xf32>
    %23 = vector.broadcast %cst_9 : f32 to vector<8x256xf32>
    %24 = arith.select %21, %22, %23 : vector<8x256xi1>, vector<8x256xf32>
    %c0 = arith.constant 0 : index
    %25 = memref.load %arg2[%c0] : memref<27xf32, #tpu.memory_space<smem>>
    %c1 = arith.constant 1 : index
    %26 = memref.load %arg2[%c1] : memref<27xf32, #tpu.memory_space<smem>>
    %c2 = arith.constant 2 : index
    %27 = memref.load %arg2[%c2] : memref<27xf32, #tpu.memory_space<smem>>
    %c3 = arith.constant 3 : index
    %28 = memref.load %arg2[%c3] : memref<27xf32, #tpu.memory_space<smem>>
    %c4 = arith.constant 4 : index
    %29 = memref.load %arg2[%c4] : memref<27xf32, #tpu.memory_space<smem>>
    %c5 = arith.constant 5 : index
    %30 = memref.load %arg2[%c5] : memref<27xf32, #tpu.memory_space<smem>>
    %c6 = arith.constant 6 : index
    %31 = memref.load %arg2[%c6] : memref<27xf32, #tpu.memory_space<smem>>
    %c7 = arith.constant 7 : index
    %32 = memref.load %arg2[%c7] : memref<27xf32, #tpu.memory_space<smem>>
    %c8 = arith.constant 8 : index
    %33 = memref.load %arg2[%c8] : memref<27xf32, #tpu.memory_space<smem>>
    %c9 = arith.constant 9 : index
    %34 = memref.load %arg2[%c9] : memref<27xf32, #tpu.memory_space<smem>>
    %c10 = arith.constant 10 : index
    %35 = memref.load %arg2[%c10] : memref<27xf32, #tpu.memory_space<smem>>
    %c11 = arith.constant 11 : index
    %36 = memref.load %arg2[%c11] : memref<27xf32, #tpu.memory_space<smem>>
    %c12 = arith.constant 12 : index
    %37 = memref.load %arg2[%c12] : memref<27xf32, #tpu.memory_space<smem>>
    %c13 = arith.constant 13 : index
    %38 = memref.load %arg2[%c13] : memref<27xf32, #tpu.memory_space<smem>>
    %c14 = arith.constant 14 : index
    %39 = memref.load %arg2[%c14] : memref<27xf32, #tpu.memory_space<smem>>
    %c15 = arith.constant 15 : index
    %40 = memref.load %arg2[%c15] : memref<27xf32, #tpu.memory_space<smem>>
    %c16 = arith.constant 16 : index
    %41 = memref.load %arg2[%c16] : memref<27xf32, #tpu.memory_space<smem>>
    %c17 = arith.constant 17 : index
    %42 = memref.load %arg2[%c17] : memref<27xf32, #tpu.memory_space<smem>>
    %c18 = arith.constant 18 : index
    %43 = memref.load %arg2[%c18] : memref<27xf32, #tpu.memory_space<smem>>
    %c19 = arith.constant 19 : index
    %44 = memref.load %arg2[%c19] : memref<27xf32, #tpu.memory_space<smem>>
    %c20 = arith.constant 20 : index
    %45 = memref.load %arg2[%c20] : memref<27xf32, #tpu.memory_space<smem>>
    %c21 = arith.constant 21 : index
    %46 = memref.load %arg2[%c21] : memref<27xf32, #tpu.memory_space<smem>>
    %c22 = arith.constant 22 : index
    %47 = memref.load %arg2[%c22] : memref<27xf32, #tpu.memory_space<smem>>
    %c23 = arith.constant 23 : index
    %48 = memref.load %arg2[%c23] : memref<27xf32, #tpu.memory_space<smem>>
    %c24 = arith.constant 24 : index
    %49 = memref.load %arg2[%c24] : memref<27xf32, #tpu.memory_space<smem>>
    %c25 = arith.constant 25 : index
    %50 = memref.load %arg2[%c25] : memref<27xf32, #tpu.memory_space<smem>>
    %c26 = arith.constant 26 : index
    %51 = memref.load %arg2[%c26] : memref<27xf32, #tpu.memory_space<smem>>
    %c0_10 = arith.constant 0 : index
    %52 = memref.load %arg4[%c0_10] : memref<81xf32, #tpu.memory_space<smem>>
    %c1_11 = arith.constant 1 : index
    %53 = memref.load %arg4[%c1_11] : memref<81xf32, #tpu.memory_space<smem>>
    %c2_12 = arith.constant 2 : index
    %54 = memref.load %arg4[%c2_12] : memref<81xf32, #tpu.memory_space<smem>>
    %c3_13 = arith.constant 3 : index
    %55 = memref.load %arg4[%c3_13] : memref<81xf32, #tpu.memory_space<smem>>
    %c4_14 = arith.constant 4 : index
    %56 = memref.load %arg4[%c4_14] : memref<81xf32, #tpu.memory_space<smem>>
    %c5_15 = arith.constant 5 : index
    %57 = memref.load %arg4[%c5_15] : memref<81xf32, #tpu.memory_space<smem>>
    %c6_16 = arith.constant 6 : index
    %58 = memref.load %arg4[%c6_16] : memref<81xf32, #tpu.memory_space<smem>>
    %c7_17 = arith.constant 7 : index
    %59 = memref.load %arg4[%c7_17] : memref<81xf32, #tpu.memory_space<smem>>
    %c8_18 = arith.constant 8 : index
    %60 = memref.load %arg4[%c8_18] : memref<81xf32, #tpu.memory_space<smem>>
    %c9_19 = arith.constant 9 : index
    %61 = memref.load %arg4[%c9_19] : memref<81xf32, #tpu.memory_space<smem>>
    %c10_20 = arith.constant 10 : index
    %62 = memref.load %arg4[%c10_20] : memref<81xf32, #tpu.memory_space<smem>>
    %c11_21 = arith.constant 11 : index
    %63 = memref.load %arg4[%c11_21] : memref<81xf32, #tpu.memory_space<smem>>
    %c12_22 = arith.constant 12 : index
    %64 = memref.load %arg4[%c12_22] : memref<81xf32, #tpu.memory_space<smem>>
    %c13_23 = arith.constant 13 : index
    %65 = memref.load %arg4[%c13_23] : memref<81xf32, #tpu.memory_space<smem>>
    %c14_24 = arith.constant 14 : index
    %66 = memref.load %arg4[%c14_24] : memref<81xf32, #tpu.memory_space<smem>>
    %c15_25 = arith.constant 15 : index
    %67 = memref.load %arg4[%c15_25] : memref<81xf32, #tpu.memory_space<smem>>
    %c16_26 = arith.constant 16 : index
    %68 = memref.load %arg4[%c16_26] : memref<81xf32, #tpu.memory_space<smem>>
    %c17_27 = arith.constant 17 : index
    %69 = memref.load %arg4[%c17_27] : memref<81xf32, #tpu.memory_space<smem>>
    %c18_28 = arith.constant 18 : index
    %70 = memref.load %arg4[%c18_28] : memref<81xf32, #tpu.memory_space<smem>>
    %c19_29 = arith.constant 19 : index
    %71 = memref.load %arg4[%c19_29] : memref<81xf32, #tpu.memory_space<smem>>
    %c20_30 = arith.constant 20 : index
    %72 = memref.load %arg4[%c20_30] : memref<81xf32, #tpu.memory_space<smem>>
    %c21_31 = arith.constant 21 : index
    %73 = memref.load %arg4[%c21_31] : memref<81xf32, #tpu.memory_space<smem>>
    %c22_32 = arith.constant 22 : index
    %74 = memref.load %arg4[%c22_32] : memref<81xf32, #tpu.memory_space<smem>>
    %c23_33 = arith.constant 23 : index
    %75 = memref.load %arg4[%c23_33] : memref<81xf32, #tpu.memory_space<smem>>
    %c24_34 = arith.constant 24 : index
    %76 = memref.load %arg4[%c24_34] : memref<81xf32, #tpu.memory_space<smem>>
    %c25_35 = arith.constant 25 : index
    %77 = memref.load %arg4[%c25_35] : memref<81xf32, #tpu.memory_space<smem>>
    %c26_36 = arith.constant 26 : index
    %78 = memref.load %arg4[%c26_36] : memref<81xf32, #tpu.memory_space<smem>>
    %c27 = arith.constant 27 : index
    %79 = memref.load %arg4[%c27] : memref<81xf32, #tpu.memory_space<smem>>
    %c28 = arith.constant 28 : index
    %80 = memref.load %arg4[%c28] : memref<81xf32, #tpu.memory_space<smem>>
    %c29 = arith.constant 29 : index
    %81 = memref.load %arg4[%c29] : memref<81xf32, #tpu.memory_space<smem>>
    %c30 = arith.constant 30 : index
    %82 = memref.load %arg4[%c30] : memref<81xf32, #tpu.memory_space<smem>>
    %c31 = arith.constant 31 : index
    %83 = memref.load %arg4[%c31] : memref<81xf32, #tpu.memory_space<smem>>
    %c32 = arith.constant 32 : index
    %84 = memref.load %arg4[%c32] : memref<81xf32, #tpu.memory_space<smem>>
    %c33 = arith.constant 33 : index
    %85 = memref.load %arg4[%c33] : memref<81xf32, #tpu.memory_space<smem>>
    %c34 = arith.constant 34 : index
    %86 = memref.load %arg4[%c34] : memref<81xf32, #tpu.memory_space<smem>>
    %c35 = arith.constant 35 : index
    %87 = memref.load %arg4[%c35] : memref<81xf32, #tpu.memory_space<smem>>
    %c36 = arith.constant 36 : index
    %88 = memref.load %arg4[%c36] : memref<81xf32, #tpu.memory_space<smem>>
    %c37 = arith.constant 37 : index
    %89 = memref.load %arg4[%c37] : memref<81xf32, #tpu.memory_space<smem>>
    %c38 = arith.constant 38 : index
    %90 = memref.load %arg4[%c38] : memref<81xf32, #tpu.memory_space<smem>>
    %c39 = arith.constant 39 : index
    %91 = memref.load %arg4[%c39] : memref<81xf32, #tpu.memory_space<smem>>
    %c40 = arith.constant 40 : index
    %92 = memref.load %arg4[%c40] : memref<81xf32, #tpu.memory_space<smem>>
    %c41 = arith.constant 41 : index
    %93 = memref.load %arg4[%c41] : memref<81xf32, #tpu.memory_space<smem>>
    %c42 = arith.constant 42 : index
    %94 = memref.load %arg4[%c42] : memref<81xf32, #tpu.memory_space<smem>>
    %c43 = arith.constant 43 : index
    %95 = memref.load %arg4[%c43] : memref<81xf32, #tpu.memory_space<smem>>
    %c44 = arith.constant 44 : index
    %96 = memref.load %arg4[%c44] : memref<81xf32, #tpu.memory_space<smem>>
    %c45 = arith.constant 45 : index
    %97 = memref.load %arg4[%c45] : memref<81xf32, #tpu.memory_space<smem>>
    %c46 = arith.constant 46 : index
    %98 = memref.load %arg4[%c46] : memref<81xf32, #tpu.memory_space<smem>>
    %c47 = arith.constant 47 : index
    %99 = memref.load %arg4[%c47] : memref<81xf32, #tpu.memory_space<smem>>
    %c48 = arith.constant 48 : index
    %100 = memref.load %arg4[%c48] : memref<81xf32, #tpu.memory_space<smem>>
    %c49 = arith.constant 49 : index
    %101 = memref.load %arg4[%c49] : memref<81xf32, #tpu.memory_space<smem>>
    %c50 = arith.constant 50 : index
    %102 = memref.load %arg4[%c50] : memref<81xf32, #tpu.memory_space<smem>>
    %c51 = arith.constant 51 : index
    %103 = memref.load %arg4[%c51] : memref<81xf32, #tpu.memory_space<smem>>
    %c52 = arith.constant 52 : index
    %104 = memref.load %arg4[%c52] : memref<81xf32, #tpu.memory_space<smem>>
    %c53 = arith.constant 53 : index
    %105 = memref.load %arg4[%c53] : memref<81xf32, #tpu.memory_space<smem>>
    %c54 = arith.constant 54 : index
    %106 = memref.load %arg4[%c54] : memref<81xf32, #tpu.memory_space<smem>>
    %c55 = arith.constant 55 : index
    %107 = memref.load %arg4[%c55] : memref<81xf32, #tpu.memory_space<smem>>
    %c56 = arith.constant 56 : index
    %108 = memref.load %arg4[%c56] : memref<81xf32, #tpu.memory_space<smem>>
    %c57 = arith.constant 57 : index
    %109 = memref.load %arg4[%c57] : memref<81xf32, #tpu.memory_space<smem>>
    %c58 = arith.constant 58 : index
    %110 = memref.load %arg4[%c58] : memref<81xf32, #tpu.memory_space<smem>>
    %c59 = arith.constant 59 : index
    %111 = memref.load %arg4[%c59] : memref<81xf32, #tpu.memory_space<smem>>
    %c60 = arith.constant 60 : index
    %112 = memref.load %arg4[%c60] : memref<81xf32, #tpu.memory_space<smem>>
    %c61 = arith.constant 61 : index
    %113 = memref.load %arg4[%c61] : memref<81xf32, #tpu.memory_space<smem>>
    %c62 = arith.constant 62 : index
    %114 = memref.load %arg4[%c62] : memref<81xf32, #tpu.memory_space<smem>>
    %c63 = arith.constant 63 : index
    %115 = memref.load %arg4[%c63] : memref<81xf32, #tpu.memory_space<smem>>
    %c64 = arith.constant 64 : index
    %116 = memref.load %arg4[%c64] : memref<81xf32, #tpu.memory_space<smem>>
    %c65 = arith.constant 65 : index
    %117 = memref.load %arg4[%c65] : memref<81xf32, #tpu.memory_space<smem>>
    %c66 = arith.constant 66 : index
    %118 = memref.load %arg4[%c66] : memref<81xf32, #tpu.memory_space<smem>>
    %c67 = arith.constant 67 : index
    %119 = memref.load %arg4[%c67] : memref<81xf32, #tpu.memory_space<smem>>
    %c68 = arith.constant 68 : index
    %120 = memref.load %arg4[%c68] : memref<81xf32, #tpu.memory_space<smem>>
    %c69 = arith.constant 69 : index
    %121 = memref.load %arg4[%c69] : memref<81xf32, #tpu.memory_space<smem>>
    %c70 = arith.constant 70 : index
    %122 = memref.load %arg4[%c70] : memref<81xf32, #tpu.memory_space<smem>>
    %c71 = arith.constant 71 : index
    %123 = memref.load %arg4[%c71] : memref<81xf32, #tpu.memory_space<smem>>
    %c72 = arith.constant 72 : index
    %124 = memref.load %arg4[%c72] : memref<81xf32, #tpu.memory_space<smem>>
    %c73 = arith.constant 73 : index
    %125 = memref.load %arg4[%c73] : memref<81xf32, #tpu.memory_space<smem>>
    %c74 = arith.constant 74 : index
    %126 = memref.load %arg4[%c74] : memref<81xf32, #tpu.memory_space<smem>>
    %c75 = arith.constant 75 : index
    %127 = memref.load %arg4[%c75] : memref<81xf32, #tpu.memory_space<smem>>
    %c76 = arith.constant 76 : index
    %128 = memref.load %arg4[%c76] : memref<81xf32, #tpu.memory_space<smem>>
    %c77 = arith.constant 77 : index
    %129 = memref.load %arg4[%c77] : memref<81xf32, #tpu.memory_space<smem>>
    %c78 = arith.constant 78 : index
    %130 = memref.load %arg4[%c78] : memref<81xf32, #tpu.memory_space<smem>>
    %c79 = arith.constant 79 : index
    %131 = memref.load %arg4[%c79] : memref<81xf32, #tpu.memory_space<smem>>
    %c80 = arith.constant 80 : index
    %132 = memref.load %arg4[%c80] : memref<81xf32, #tpu.memory_space<smem>>
    %c0_37 = arith.constant 0 : index
    %133 = memref.load %arg6[%c0_37] : memref<81xf32, #tpu.memory_space<smem>>
    %c1_38 = arith.constant 1 : index
    %134 = memref.load %arg6[%c1_38] : memref<81xf32, #tpu.memory_space<smem>>
    %c2_39 = arith.constant 2 : index
    %135 = memref.load %arg6[%c2_39] : memref<81xf32, #tpu.memory_space<smem>>
    %c3_40 = arith.constant 3 : index
    %136 = memref.load %arg6[%c3_40] : memref<81xf32, #tpu.memory_space<smem>>
    %c4_41 = arith.constant 4 : index
    %137 = memref.load %arg6[%c4_41] : memref<81xf32, #tpu.memory_space<smem>>
    %c5_42 = arith.constant 5 : index
    %138 = memref.load %arg6[%c5_42] : memref<81xf32, #tpu.memory_space<smem>>
    %c6_43 = arith.constant 6 : index
    %139 = memref.load %arg6[%c6_43] : memref<81xf32, #tpu.memory_space<smem>>
    %c7_44 = arith.constant 7 : index
    %140 = memref.load %arg6[%c7_44] : memref<81xf32, #tpu.memory_space<smem>>
    %c8_45 = arith.constant 8 : index
    %141 = memref.load %arg6[%c8_45] : memref<81xf32, #tpu.memory_space<smem>>
    %c9_46 = arith.constant 9 : index
    %142 = memref.load %arg6[%c9_46] : memref<81xf32, #tpu.memory_space<smem>>
    %c10_47 = arith.constant 10 : index
    %143 = memref.load %arg6[%c10_47] : memref<81xf32, #tpu.memory_space<smem>>
    %c11_48 = arith.constant 11 : index
    %144 = memref.load %arg6[%c11_48] : memref<81xf32, #tpu.memory_space<smem>>
    %c12_49 = arith.constant 12 : index
    %145 = memref.load %arg6[%c12_49] : memref<81xf32, #tpu.memory_space<smem>>
    %c13_50 = arith.constant 13 : index
    %146 = memref.load %arg6[%c13_50] : memref<81xf32, #tpu.memory_space<smem>>
    %c14_51 = arith.constant 14 : index
    %147 = memref.load %arg6[%c14_51] : memref<81xf32, #tpu.memory_space<smem>>
    %c15_52 = arith.constant 15 : index
    %148 = memref.load %arg6[%c15_52] : memref<81xf32, #tpu.memory_space<smem>>
    %c16_53 = arith.constant 16 : index
    %149 = memref.load %arg6[%c16_53] : memref<81xf32, #tpu.memory_space<smem>>
    %c17_54 = arith.constant 17 : index
    %150 = memref.load %arg6[%c17_54] : memref<81xf32, #tpu.memory_space<smem>>
    %c18_55 = arith.constant 18 : index
    %151 = memref.load %arg6[%c18_55] : memref<81xf32, #tpu.memory_space<smem>>
    %c19_56 = arith.constant 19 : index
    %152 = memref.load %arg6[%c19_56] : memref<81xf32, #tpu.memory_space<smem>>
    %c20_57 = arith.constant 20 : index
    %153 = memref.load %arg6[%c20_57] : memref<81xf32, #tpu.memory_space<smem>>
    %c21_58 = arith.constant 21 : index
    %154 = memref.load %arg6[%c21_58] : memref<81xf32, #tpu.memory_space<smem>>
    %c22_59 = arith.constant 22 : index
    %155 = memref.load %arg6[%c22_59] : memref<81xf32, #tpu.memory_space<smem>>
    %c23_60 = arith.constant 23 : index
    %156 = memref.load %arg6[%c23_60] : memref<81xf32, #tpu.memory_space<smem>>
    %c24_61 = arith.constant 24 : index
    %157 = memref.load %arg6[%c24_61] : memref<81xf32, #tpu.memory_space<smem>>
    %c25_62 = arith.constant 25 : index
    %158 = memref.load %arg6[%c25_62] : memref<81xf32, #tpu.memory_space<smem>>
    %c26_63 = arith.constant 26 : index
    %159 = memref.load %arg6[%c26_63] : memref<81xf32, #tpu.memory_space<smem>>
    %c27_64 = arith.constant 27 : index
    %160 = memref.load %arg6[%c27_64] : memref<81xf32, #tpu.memory_space<smem>>
    %c28_65 = arith.constant 28 : index
    %161 = memref.load %arg6[%c28_65] : memref<81xf32, #tpu.memory_space<smem>>
    %c29_66 = arith.constant 29 : index
    %162 = memref.load %arg6[%c29_66] : memref<81xf32, #tpu.memory_space<smem>>
    %c30_67 = arith.constant 30 : index
    %163 = memref.load %arg6[%c30_67] : memref<81xf32, #tpu.memory_space<smem>>
    %c31_68 = arith.constant 31 : index
    %164 = memref.load %arg6[%c31_68] : memref<81xf32, #tpu.memory_space<smem>>
    %c32_69 = arith.constant 32 : index
    %165 = memref.load %arg6[%c32_69] : memref<81xf32, #tpu.memory_space<smem>>
    %c33_70 = arith.constant 33 : index
    %166 = memref.load %arg6[%c33_70] : memref<81xf32, #tpu.memory_space<smem>>
    %c34_71 = arith.constant 34 : index
    %167 = memref.load %arg6[%c34_71] : memref<81xf32, #tpu.memory_space<smem>>
    %c35_72 = arith.constant 35 : index
    %168 = memref.load %arg6[%c35_72] : memref<81xf32, #tpu.memory_space<smem>>
    %c36_73 = arith.constant 36 : index
    %169 = memref.load %arg6[%c36_73] : memref<81xf32, #tpu.memory_space<smem>>
    %c37_74 = arith.constant 37 : index
    %170 = memref.load %arg6[%c37_74] : memref<81xf32, #tpu.memory_space<smem>>
    %c38_75 = arith.constant 38 : index
    %171 = memref.load %arg6[%c38_75] : memref<81xf32, #tpu.memory_space<smem>>
    %c39_76 = arith.constant 39 : index
    %172 = memref.load %arg6[%c39_76] : memref<81xf32, #tpu.memory_space<smem>>
    %c40_77 = arith.constant 40 : index
    %173 = memref.load %arg6[%c40_77] : memref<81xf32, #tpu.memory_space<smem>>
    %c41_78 = arith.constant 41 : index
    %174 = memref.load %arg6[%c41_78] : memref<81xf32, #tpu.memory_space<smem>>
    %c42_79 = arith.constant 42 : index
    %175 = memref.load %arg6[%c42_79] : memref<81xf32, #tpu.memory_space<smem>>
    %c43_80 = arith.constant 43 : index
    %176 = memref.load %arg6[%c43_80] : memref<81xf32, #tpu.memory_space<smem>>
    %c44_81 = arith.constant 44 : index
    %177 = memref.load %arg6[%c44_81] : memref<81xf32, #tpu.memory_space<smem>>
    %c45_82 = arith.constant 45 : index
    %178 = memref.load %arg6[%c45_82] : memref<81xf32, #tpu.memory_space<smem>>
    %c46_83 = arith.constant 46 : index
    %179 = memref.load %arg6[%c46_83] : memref<81xf32, #tpu.memory_space<smem>>
    %c47_84 = arith.constant 47 : index
    %180 = memref.load %arg6[%c47_84] : memref<81xf32, #tpu.memory_space<smem>>
    %c48_85 = arith.constant 48 : index
    %181 = memref.load %arg6[%c48_85] : memref<81xf32, #tpu.memory_space<smem>>
    %c49_86 = arith.constant 49 : index
    %182 = memref.load %arg6[%c49_86] : memref<81xf32, #tpu.memory_space<smem>>
    %c50_87 = arith.constant 50 : index
    %183 = memref.load %arg6[%c50_87] : memref<81xf32, #tpu.memory_space<smem>>
    %c51_88 = arith.constant 51 : index
    %184 = memref.load %arg6[%c51_88] : memref<81xf32, #tpu.memory_space<smem>>
    %c52_89 = arith.constant 52 : index
    %185 = memref.load %arg6[%c52_89] : memref<81xf32, #tpu.memory_space<smem>>
    %c53_90 = arith.constant 53 : index
    %186 = memref.load %arg6[%c53_90] : memref<81xf32, #tpu.memory_space<smem>>
    %c54_91 = arith.constant 54 : index
    %187 = memref.load %arg6[%c54_91] : memref<81xf32, #tpu.memory_space<smem>>
    %c55_92 = arith.constant 55 : index
    %188 = memref.load %arg6[%c55_92] : memref<81xf32, #tpu.memory_space<smem>>
    %c56_93 = arith.constant 56 : index
    %189 = memref.load %arg6[%c56_93] : memref<81xf32, #tpu.memory_space<smem>>
    %c57_94 = arith.constant 57 : index
    %190 = memref.load %arg6[%c57_94] : memref<81xf32, #tpu.memory_space<smem>>
    %c58_95 = arith.constant 58 : index
    %191 = memref.load %arg6[%c58_95] : memref<81xf32, #tpu.memory_space<smem>>
    %c59_96 = arith.constant 59 : index
    %192 = memref.load %arg6[%c59_96] : memref<81xf32, #tpu.memory_space<smem>>
    %c60_97 = arith.constant 60 : index
    %193 = memref.load %arg6[%c60_97] : memref<81xf32, #tpu.memory_space<smem>>
    %c61_98 = arith.constant 61 : index
    %194 = memref.load %arg6[%c61_98] : memref<81xf32, #tpu.memory_space<smem>>
    %c62_99 = arith.constant 62 : index
    %195 = memref.load %arg6[%c62_99] : memref<81xf32, #tpu.memory_space<smem>>
    %c63_100 = arith.constant 63 : index
    %196 = memref.load %arg6[%c63_100] : memref<81xf32, #tpu.memory_space<smem>>
    %c64_101 = arith.constant 64 : index
    %197 = memref.load %arg6[%c64_101] : memref<81xf32, #tpu.memory_space<smem>>
    %c65_102 = arith.constant 65 : index
    %198 = memref.load %arg6[%c65_102] : memref<81xf32, #tpu.memory_space<smem>>
    %c66_103 = arith.constant 66 : index
    %199 = memref.load %arg6[%c66_103] : memref<81xf32, #tpu.memory_space<smem>>
    %c67_104 = arith.constant 67 : index
    %200 = memref.load %arg6[%c67_104] : memref<81xf32, #tpu.memory_space<smem>>
    %c68_105 = arith.constant 68 : index
    %201 = memref.load %arg6[%c68_105] : memref<81xf32, #tpu.memory_space<smem>>
    %c69_106 = arith.constant 69 : index
    %202 = memref.load %arg6[%c69_106] : memref<81xf32, #tpu.memory_space<smem>>
    %c70_107 = arith.constant 70 : index
    %203 = memref.load %arg6[%c70_107] : memref<81xf32, #tpu.memory_space<smem>>
    %c71_108 = arith.constant 71 : index
    %204 = memref.load %arg6[%c71_108] : memref<81xf32, #tpu.memory_space<smem>>
    %c72_109 = arith.constant 72 : index
    %205 = memref.load %arg6[%c72_109] : memref<81xf32, #tpu.memory_space<smem>>
    %c73_110 = arith.constant 73 : index
    %206 = memref.load %arg6[%c73_110] : memref<81xf32, #tpu.memory_space<smem>>
    %c74_111 = arith.constant 74 : index
    %207 = memref.load %arg6[%c74_111] : memref<81xf32, #tpu.memory_space<smem>>
    %c75_112 = arith.constant 75 : index
    %208 = memref.load %arg6[%c75_112] : memref<81xf32, #tpu.memory_space<smem>>
    %c76_113 = arith.constant 76 : index
    %209 = memref.load %arg6[%c76_113] : memref<81xf32, #tpu.memory_space<smem>>
    %c77_114 = arith.constant 77 : index
    %210 = memref.load %arg6[%c77_114] : memref<81xf32, #tpu.memory_space<smem>>
    %c78_115 = arith.constant 78 : index
    %211 = memref.load %arg6[%c78_115] : memref<81xf32, #tpu.memory_space<smem>>
    %c79_116 = arith.constant 79 : index
    %212 = memref.load %arg6[%c79_116] : memref<81xf32, #tpu.memory_space<smem>>
    %c80_117 = arith.constant 80 : index
    %213 = memref.load %arg6[%c80_117] : memref<81xf32, #tpu.memory_space<smem>>
    %c0_118 = arith.constant 0 : index
    %214 = memref.load %arg3[%c0_118] : memref<3xf32, #tpu.memory_space<smem>>
    %c1_119 = arith.constant 1 : index
    %215 = memref.load %arg3[%c1_119] : memref<3xf32, #tpu.memory_space<smem>>
    %c2_120 = arith.constant 2 : index
    %216 = memref.load %arg3[%c2_120] : memref<3xf32, #tpu.memory_space<smem>>
    %c0_121 = arith.constant 0 : index
    %217 = memref.load %arg5[%c0_121] : memref<3xf32, #tpu.memory_space<smem>>
    %c1_122 = arith.constant 1 : index
    %218 = memref.load %arg5[%c1_122] : memref<3xf32, #tpu.memory_space<smem>>
    %c2_123 = arith.constant 2 : index
    %219 = memref.load %arg5[%c2_123] : memref<3xf32, #tpu.memory_space<smem>>
    %c0_124 = arith.constant 0 : index
    %220 = memref.load %arg7[%c0_124] : memref<3xf32, #tpu.memory_space<smem>>
    %c1_125 = arith.constant 1 : index
    %221 = memref.load %arg7[%c1_125] : memref<3xf32, #tpu.memory_space<smem>>
    %c2_126 = arith.constant 2 : index
    %222 = memref.load %arg7[%c2_126] : memref<3xf32, #tpu.memory_space<smem>>
    %c0_i32 = arith.constant 0 : i32
    %c2_i32 = arith.constant 2 : i32
    %223 = arith.addi %c0_i32, %c2_i32 : i32
    %c1_i32_127 = arith.constant 1 : i32
    scf.for %arg9 = %c0_i32 to %223 step %c1_i32_127  : i32 {
      %c8_i32 = arith.constant 8 : i32
      %224 = arith.muli %arg9, %c8_i32 : i32
      %225 = tpu.assume_multiple %224, 8 : i32
      %226 = arith.index_cast %225 : i32 to index
      %c0_129 = arith.constant 0 : index
      %227 = vector.load %arg1[%226, %c0_129] : memref<16x256xf32, #tpu.memory_space<vmem>>, vector<8x256xf32>
      %c16_i32 = arith.constant 16 : i32
      %228 = tpu.dynamic_rotate %227 by %c16_i32 dim 1 : vector<8x256xf32>, i32 -> vector<8x256xf32>
      %229 = arith.mulf %228, %9 : vector<8x256xf32>
      %c1_i32_130 = arith.constant 1 : i32
      %230 = tpu.dynamic_rotate %229 by %c1_i32_130 dim 1 : vector<8x256xf32>, i32 -> vector<8x256xf32>
      %231 = arith.mulf %230, %19 : vector<8x256xf32>
      %232 = vector.broadcast %25 : f32 to vector<8x256xf32>
      %233 = arith.mulf %232, %231 : vector<8x256xf32>
      %234 = vector.broadcast %34 : f32 to vector<8x256xf32>
      %235 = arith.mulf %234, %231 : vector<8x256xf32>
      %236 = vector.broadcast %43 : f32 to vector<8x256xf32>
      %237 = arith.mulf %236, %231 : vector<8x256xf32>
      %238 = vector.broadcast %26 : f32 to vector<8x256xf32>
      %239 = arith.mulf %238, %229 : vector<8x256xf32>
      %240 = arith.addf %233, %239 : vector<8x256xf32>
      %241 = vector.broadcast %35 : f32 to vector<8x256xf32>
      %242 = arith.mulf %241, %229 : vector<8x256xf32>
      %243 = arith.addf %235, %242 : vector<8x256xf32>
      %244 = vector.broadcast %44 : f32 to vector<8x256xf32>
      %245 = arith.mulf %244, %229 : vector<8x256xf32>
      %246 = arith.addf %237, %245 : vector<8x256xf32>
      %c255_i32 = arith.constant 255 : i32
      %247 = tpu.dynamic_rotate %229 by %c255_i32 dim 1 : vector<8x256xf32>, i32 -> vector<8x256xf32>
      %248 = arith.mulf %247, %24 : vector<8x256xf32>
      %249 = vector.broadcast %27 : f32 to vector<8x256xf32>
      %250 = arith.mulf %249, %248 : vector<8x256xf32>
      %251 = arith.addf %240, %250 : vector<8x256xf32>
      %252 = vector.broadcast %36 : f32 to vector<8x256xf32>
      %253 = arith.mulf %252, %248 : vector<8x256xf32>
      %254 = arith.addf %243, %253 : vector<8x256xf32>
      %255 = vector.broadcast %45 : f32 to vector<8x256xf32>
      %256 = arith.mulf %255, %248 : vector<8x256xf32>
      %257 = arith.addf %246, %256 : vector<8x256xf32>
      %c1_i32_131 = arith.constant 1 : i32
      %258 = tpu.dynamic_rotate %227 by %c1_i32_131 dim 1 : vector<8x256xf32>, i32 -> vector<8x256xf32>
      %259 = arith.mulf %258, %19 : vector<8x256xf32>
      %260 = vector.broadcast %28 : f32 to vector<8x256xf32>
      %261 = arith.mulf %260, %259 : vector<8x256xf32>
      %262 = arith.addf %251, %261 : vector<8x256xf32>
      %263 = vector.broadcast %37 : f32 to vector<8x256xf32>
      %264 = arith.mulf %263, %259 : vector<8x256xf32>
      %265 = arith.addf %254, %264 : vector<8x256xf32>
      %266 = vector.broadcast %46 : f32 to vector<8x256xf32>
      %267 = arith.mulf %266, %259 : vector<8x256xf32>
      %268 = arith.addf %257, %267 : vector<8x256xf32>
      %269 = vector.broadcast %29 : f32 to vector<8x256xf32>
      %270 = arith.mulf %269, %227 : vector<8x256xf32>
      %271 = arith.addf %262, %270 : vector<8x256xf32>
      %272 = vector.broadcast %38 : f32 to vector<8x256xf32>
      %273 = arith.mulf %272, %227 : vector<8x256xf32>
      %274 = arith.addf %265, %273 : vector<8x256xf32>
      %275 = vector.broadcast %47 : f32 to vector<8x256xf32>
      %276 = arith.mulf %275, %227 : vector<8x256xf32>
      %277 = arith.addf %268, %276 : vector<8x256xf32>
      %c255_i32_132 = arith.constant 255 : i32
      %278 = tpu.dynamic_rotate %227 by %c255_i32_132 dim 1 : vector<8x256xf32>, i32 -> vector<8x256xf32>
      %279 = arith.mulf %278, %24 : vector<8x256xf32>
      %280 = vector.broadcast %30 : f32 to vector<8x256xf32>
      %281 = arith.mulf %280, %279 : vector<8x256xf32>
      %282 = arith.addf %271, %281 : vector<8x256xf32>
      %283 = vector.broadcast %39 : f32 to vector<8x256xf32>
      %284 = arith.mulf %283, %279 : vector<8x256xf32>
      %285 = arith.addf %274, %284 : vector<8x256xf32>
      %286 = vector.broadcast %48 : f32 to vector<8x256xf32>
      %287 = arith.mulf %286, %279 : vector<8x256xf32>
      %288 = arith.addf %277, %287 : vector<8x256xf32>
      %c240_i32 = arith.constant 240 : i32
      %289 = tpu.dynamic_rotate %227 by %c240_i32 dim 1 : vector<8x256xf32>, i32 -> vector<8x256xf32>
      %290 = arith.mulf %289, %14 : vector<8x256xf32>
      %c1_i32_133 = arith.constant 1 : i32
      %291 = tpu.dynamic_rotate %290 by %c1_i32_133 dim 1 : vector<8x256xf32>, i32 -> vector<8x256xf32>
      %292 = arith.mulf %291, %19 : vector<8x256xf32>
      %293 = vector.broadcast %31 : f32 to vector<8x256xf32>
      %294 = arith.mulf %293, %292 : vector<8x256xf32>
      %295 = arith.addf %282, %294 : vector<8x256xf32>
      %296 = vector.broadcast %40 : f32 to vector<8x256xf32>
      %297 = arith.mulf %296, %292 : vector<8x256xf32>
      %298 = arith.addf %285, %297 : vector<8x256xf32>
      %299 = vector.broadcast %49 : f32 to vector<8x256xf32>
      %300 = arith.mulf %299, %292 : vector<8x256xf32>
      %301 = arith.addf %288, %300 : vector<8x256xf32>
      %302 = vector.broadcast %32 : f32 to vector<8x256xf32>
      %303 = arith.mulf %302, %290 : vector<8x256xf32>
      %304 = arith.addf %295, %303 : vector<8x256xf32>
      %305 = vector.broadcast %41 : f32 to vector<8x256xf32>
      %306 = arith.mulf %305, %290 : vector<8x256xf32>
      %307 = arith.addf %298, %306 : vector<8x256xf32>
      %308 = vector.broadcast %50 : f32 to vector<8x256xf32>
      %309 = arith.mulf %308, %290 : vector<8x256xf32>
      %310 = arith.addf %301, %309 : vector<8x256xf32>
      %c255_i32_134 = arith.constant 255 : i32
      %311 = tpu.dynamic_rotate %290 by %c255_i32_134 dim 1 : vector<8x256xf32>, i32 -> vector<8x256xf32>
      %312 = arith.mulf %311, %24 : vector<8x256xf32>
      %313 = vector.broadcast %33 : f32 to vector<8x256xf32>
      %314 = arith.mulf %313, %312 : vector<8x256xf32>
      %315 = arith.addf %304, %314 : vector<8x256xf32>
      %316 = vector.broadcast %42 : f32 to vector<8x256xf32>
      %317 = arith.mulf %316, %312 : vector<8x256xf32>
      %318 = arith.addf %307, %317 : vector<8x256xf32>
      %319 = vector.broadcast %51 : f32 to vector<8x256xf32>
      %320 = arith.mulf %319, %312 : vector<8x256xf32>
      %321 = arith.addf %310, %320 : vector<8x256xf32>
      %322 = vector.broadcast %214 : f32 to vector<8x256xf32>
      %323 = arith.addf %315, %322 : vector<8x256xf32>
      %324 = vector.broadcast %215 : f32 to vector<8x256xf32>
      %325 = arith.addf %318, %324 : vector<8x256xf32>
      %326 = vector.broadcast %216 : f32 to vector<8x256xf32>
      %327 = arith.addf %321, %326 : vector<8x256xf32>
      %c16_i32_135 = arith.constant 16 : i32
      %328 = tpu.dynamic_rotate %323 by %c16_i32_135 dim 1 : vector<8x256xf32>, i32 -> vector<8x256xf32>
      %329 = arith.mulf %328, %9 : vector<8x256xf32>
      %c1_i32_136 = arith.constant 1 : i32
      %330 = tpu.dynamic_rotate %329 by %c1_i32_136 dim 1 : vector<8x256xf32>, i32 -> vector<8x256xf32>
      %331 = arith.mulf %330, %19 : vector<8x256xf32>
      %332 = vector.broadcast %52 : f32 to vector<8x256xf32>
      %333 = arith.mulf %332, %331 : vector<8x256xf32>
      %334 = vector.broadcast %79 : f32 to vector<8x256xf32>
      %335 = arith.mulf %334, %331 : vector<8x256xf32>
      %336 = vector.broadcast %106 : f32 to vector<8x256xf32>
      %337 = arith.mulf %336, %331 : vector<8x256xf32>
      %338 = vector.broadcast %53 : f32 to vector<8x256xf32>
      %339 = arith.mulf %338, %329 : vector<8x256xf32>
      %340 = arith.addf %333, %339 : vector<8x256xf32>
      %341 = vector.broadcast %80 : f32 to vector<8x256xf32>
      %342 = arith.mulf %341, %329 : vector<8x256xf32>
      %343 = arith.addf %335, %342 : vector<8x256xf32>
      %344 = vector.broadcast %107 : f32 to vector<8x256xf32>
      %345 = arith.mulf %344, %329 : vector<8x256xf32>
      %346 = arith.addf %337, %345 : vector<8x256xf32>
      %c255_i32_137 = arith.constant 255 : i32
      %347 = tpu.dynamic_rotate %329 by %c255_i32_137 dim 1 : vector<8x256xf32>, i32 -> vector<8x256xf32>
      %348 = arith.mulf %347, %24 : vector<8x256xf32>
      %349 = vector.broadcast %54 : f32 to vector<8x256xf32>
      %350 = arith.mulf %349, %348 : vector<8x256xf32>
      %351 = arith.addf %340, %350 : vector<8x256xf32>
      %352 = vector.broadcast %81 : f32 to vector<8x256xf32>
      %353 = arith.mulf %352, %348 : vector<8x256xf32>
      %354 = arith.addf %343, %353 : vector<8x256xf32>
      %355 = vector.broadcast %108 : f32 to vector<8x256xf32>
      %356 = arith.mulf %355, %348 : vector<8x256xf32>
      %357 = arith.addf %346, %356 : vector<8x256xf32>
      %c1_i32_138 = arith.constant 1 : i32
      %358 = tpu.dynamic_rotate %323 by %c1_i32_138 dim 1 : vector<8x256xf32>, i32 -> vector<8x256xf32>
      %359 = arith.mulf %358, %19 : vector<8x256xf32>
      %360 = vector.broadcast %55 : f32 to vector<8x256xf32>
      %361 = arith.mulf %360, %359 : vector<8x256xf32>
      %362 = arith.addf %351, %361 : vector<8x256xf32>
      %363 = vector.broadcast %82 : f32 to vector<8x256xf32>
      %364 = arith.mulf %363, %359 : vector<8x256xf32>
      %365 = arith.addf %354, %364 : vector<8x256xf32>
      %366 = vector.broadcast %109 : f32 to vector<8x256xf32>
      %367 = arith.mulf %366, %359 : vector<8x256xf32>
      %368 = arith.addf %357, %367 : vector<8x256xf32>
      %369 = vector.broadcast %56 : f32 to vector<8x256xf32>
      %370 = arith.mulf %369, %323 : vector<8x256xf32>
      %371 = arith.addf %362, %370 : vector<8x256xf32>
      %372 = vector.broadcast %83 : f32 to vector<8x256xf32>
      %373 = arith.mulf %372, %323 : vector<8x256xf32>
      %374 = arith.addf %365, %373 : vector<8x256xf32>
      %375 = vector.broadcast %110 : f32 to vector<8x256xf32>
      %376 = arith.mulf %375, %323 : vector<8x256xf32>
      %377 = arith.addf %368, %376 : vector<8x256xf32>
      %c255_i32_139 = arith.constant 255 : i32
      %378 = tpu.dynamic_rotate %323 by %c255_i32_139 dim 1 : vector<8x256xf32>, i32 -> vector<8x256xf32>
      %379 = arith.mulf %378, %24 : vector<8x256xf32>
      %380 = vector.broadcast %57 : f32 to vector<8x256xf32>
      %381 = arith.mulf %380, %379 : vector<8x256xf32>
      %382 = arith.addf %371, %381 : vector<8x256xf32>
      %383 = vector.broadcast %84 : f32 to vector<8x256xf32>
      %384 = arith.mulf %383, %379 : vector<8x256xf32>
      %385 = arith.addf %374, %384 : vector<8x256xf32>
      %386 = vector.broadcast %111 : f32 to vector<8x256xf32>
      %387 = arith.mulf %386, %379 : vector<8x256xf32>
      %388 = arith.addf %377, %387 : vector<8x256xf32>
      %c240_i32_140 = arith.constant 240 : i32
      %389 = tpu.dynamic_rotate %323 by %c240_i32_140 dim 1 : vector<8x256xf32>, i32 -> vector<8x256xf32>
      %390 = arith.mulf %389, %14 : vector<8x256xf32>
      %c1_i32_141 = arith.constant 1 : i32
      %391 = tpu.dynamic_rotate %390 by %c1_i32_141 dim 1 : vector<8x256xf32>, i32 -> vector<8x256xf32>
      %392 = arith.mulf %391, %19 : vector<8x256xf32>
      %393 = vector.broadcast %58 : f32 to vector<8x256xf32>
      %394 = arith.mulf %393, %392 : vector<8x256xf32>
      %395 = arith.addf %382, %394 : vector<8x256xf32>
      %396 = vector.broadcast %85 : f32 to vector<8x256xf32>
      %397 = arith.mulf %396, %392 : vector<8x256xf32>
      %398 = arith.addf %385, %397 : vector<8x256xf32>
      %399 = vector.broadcast %112 : f32 to vector<8x256xf32>
      %400 = arith.mulf %399, %392 : vector<8x256xf32>
      %401 = arith.addf %388, %400 : vector<8x256xf32>
      %402 = vector.broadcast %59 : f32 to vector<8x256xf32>
      %403 = arith.mulf %402, %390 : vector<8x256xf32>
      %404 = arith.addf %395, %403 : vector<8x256xf32>
      %405 = vector.broadcast %86 : f32 to vector<8x256xf32>
      %406 = arith.mulf %405, %390 : vector<8x256xf32>
      %407 = arith.addf %398, %406 : vector<8x256xf32>
      %408 = vector.broadcast %113 : f32 to vector<8x256xf32>
      %409 = arith.mulf %408, %390 : vector<8x256xf32>
      %410 = arith.addf %401, %409 : vector<8x256xf32>
      %c255_i32_142 = arith.constant 255 : i32
      %411 = tpu.dynamic_rotate %390 by %c255_i32_142 dim 1 : vector<8x256xf32>, i32 -> vector<8x256xf32>
      %412 = arith.mulf %411, %24 : vector<8x256xf32>
      %413 = vector.broadcast %60 : f32 to vector<8x256xf32>
      %414 = arith.mulf %413, %412 : vector<8x256xf32>
      %415 = arith.addf %404, %414 : vector<8x256xf32>
      %416 = vector.broadcast %87 : f32 to vector<8x256xf32>
      %417 = arith.mulf %416, %412 : vector<8x256xf32>
      %418 = arith.addf %407, %417 : vector<8x256xf32>
      %419 = vector.broadcast %114 : f32 to vector<8x256xf32>
      %420 = arith.mulf %419, %412 : vector<8x256xf32>
      %421 = arith.addf %410, %420 : vector<8x256xf32>
      %c16_i32_143 = arith.constant 16 : i32
      %422 = tpu.dynamic_rotate %325 by %c16_i32_143 dim 1 : vector<8x256xf32>, i32 -> vector<8x256xf32>
      %423 = arith.mulf %422, %9 : vector<8x256xf32>
      %c1_i32_144 = arith.constant 1 : i32
      %424 = tpu.dynamic_rotate %423 by %c1_i32_144 dim 1 : vector<8x256xf32>, i32 -> vector<8x256xf32>
      %425 = arith.mulf %424, %19 : vector<8x256xf32>
      %426 = vector.broadcast %61 : f32 to vector<8x256xf32>
      %427 = arith.mulf %426, %425 : vector<8x256xf32>
      %428 = arith.addf %415, %427 : vector<8x256xf32>
      %429 = vector.broadcast %88 : f32 to vector<8x256xf32>
      %430 = arith.mulf %429, %425 : vector<8x256xf32>
      %431 = arith.addf %418, %430 : vector<8x256xf32>
      %432 = vector.broadcast %115 : f32 to vector<8x256xf32>
      %433 = arith.mulf %432, %425 : vector<8x256xf32>
      %434 = arith.addf %421, %433 : vector<8x256xf32>
      %435 = vector.broadcast %62 : f32 to vector<8x256xf32>
      %436 = arith.mulf %435, %423 : vector<8x256xf32>
      %437 = arith.addf %428, %436 : vector<8x256xf32>
      %438 = vector.broadcast %89 : f32 to vector<8x256xf32>
      %439 = arith.mulf %438, %423 : vector<8x256xf32>
      %440 = arith.addf %431, %439 : vector<8x256xf32>
      %441 = vector.broadcast %116 : f32 to vector<8x256xf32>
      %442 = arith.mulf %441, %423 : vector<8x256xf32>
      %443 = arith.addf %434, %442 : vector<8x256xf32>
      %c255_i32_145 = arith.constant 255 : i32
      %444 = tpu.dynamic_rotate %423 by %c255_i32_145 dim 1 : vector<8x256xf32>, i32 -> vector<8x256xf32>
      %445 = arith.mulf %444, %24 : vector<8x256xf32>
      %446 = vector.broadcast %63 : f32 to vector<8x256xf32>
      %447 = arith.mulf %446, %445 : vector<8x256xf32>
      %448 = arith.addf %437, %447 : vector<8x256xf32>
      %449 = vector.broadcast %90 : f32 to vector<8x256xf32>
      %450 = arith.mulf %449, %445 : vector<8x256xf32>
      %451 = arith.addf %440, %450 : vector<8x256xf32>
      %452 = vector.broadcast %117 : f32 to vector<8x256xf32>
      %453 = arith.mulf %452, %445 : vector<8x256xf32>
      %454 = arith.addf %443, %453 : vector<8x256xf32>
      %c1_i32_146 = arith.constant 1 : i32
      %455 = tpu.dynamic_rotate %325 by %c1_i32_146 dim 1 : vector<8x256xf32>, i32 -> vector<8x256xf32>
      %456 = arith.mulf %455, %19 : vector<8x256xf32>
      %457 = vector.broadcast %64 : f32 to vector<8x256xf32>
      %458 = arith.mulf %457, %456 : vector<8x256xf32>
      %459 = arith.addf %448, %458 : vector<8x256xf32>
      %460 = vector.broadcast %91 : f32 to vector<8x256xf32>
      %461 = arith.mulf %460, %456 : vector<8x256xf32>
      %462 = arith.addf %451, %461 : vector<8x256xf32>
      %463 = vector.broadcast %118 : f32 to vector<8x256xf32>
      %464 = arith.mulf %463, %456 : vector<8x256xf32>
      %465 = arith.addf %454, %464 : vector<8x256xf32>
      %466 = vector.broadcast %65 : f32 to vector<8x256xf32>
      %467 = arith.mulf %466, %325 : vector<8x256xf32>
      %468 = arith.addf %459, %467 : vector<8x256xf32>
      %469 = vector.broadcast %92 : f32 to vector<8x256xf32>
      %470 = arith.mulf %469, %325 : vector<8x256xf32>
      %471 = arith.addf %462, %470 : vector<8x256xf32>
      %472 = vector.broadcast %119 : f32 to vector<8x256xf32>
      %473 = arith.mulf %472, %325 : vector<8x256xf32>
      %474 = arith.addf %465, %473 : vector<8x256xf32>
      %c255_i32_147 = arith.constant 255 : i32
      %475 = tpu.dynamic_rotate %325 by %c255_i32_147 dim 1 : vector<8x256xf32>, i32 -> vector<8x256xf32>
      %476 = arith.mulf %475, %24 : vector<8x256xf32>
      %477 = vector.broadcast %66 : f32 to vector<8x256xf32>
      %478 = arith.mulf %477, %476 : vector<8x256xf32>
      %479 = arith.addf %468, %478 : vector<8x256xf32>
      %480 = vector.broadcast %93 : f32 to vector<8x256xf32>
      %481 = arith.mulf %480, %476 : vector<8x256xf32>
      %482 = arith.addf %471, %481 : vector<8x256xf32>
      %483 = vector.broadcast %120 : f32 to vector<8x256xf32>
      %484 = arith.mulf %483, %476 : vector<8x256xf32>
      %485 = arith.addf %474, %484 : vector<8x256xf32>
      %c240_i32_148 = arith.constant 240 : i32
      %486 = tpu.dynamic_rotate %325 by %c240_i32_148 dim 1 : vector<8x256xf32>, i32 -> vector<8x256xf32>
      %487 = arith.mulf %486, %14 : vector<8x256xf32>
      %c1_i32_149 = arith.constant 1 : i32
      %488 = tpu.dynamic_rotate %487 by %c1_i32_149 dim 1 : vector<8x256xf32>, i32 -> vector<8x256xf32>
      %489 = arith.mulf %488, %19 : vector<8x256xf32>
      %490 = vector.broadcast %67 : f32 to vector<8x256xf32>
      %491 = arith.mulf %490, %489 : vector<8x256xf32>
      %492 = arith.addf %479, %491 : vector<8x256xf32>
      %493 = vector.broadcast %94 : f32 to vector<8x256xf32>
      %494 = arith.mulf %493, %489 : vector<8x256xf32>
      %495 = arith.addf %482, %494 : vector<8x256xf32>
      %496 = vector.broadcast %121 : f32 to vector<8x256xf32>
      %497 = arith.mulf %496, %489 : vector<8x256xf32>
      %498 = arith.addf %485, %497 : vector<8x256xf32>
      %499 = vector.broadcast %68 : f32 to vector<8x256xf32>
      %500 = arith.mulf %499, %487 : vector<8x256xf32>
      %501 = arith.addf %492, %500 : vector<8x256xf32>
      %502 = vector.broadcast %95 : f32 to vector<8x256xf32>
      %503 = arith.mulf %502, %487 : vector<8x256xf32>
      %504 = arith.addf %495, %503 : vector<8x256xf32>
      %505 = vector.broadcast %122 : f32 to vector<8x256xf32>
      %506 = arith.mulf %505, %487 : vector<8x256xf32>
      %507 = arith.addf %498, %506 : vector<8x256xf32>
      %c255_i32_150 = arith.constant 255 : i32
      %508 = tpu.dynamic_rotate %487 by %c255_i32_150 dim 1 : vector<8x256xf32>, i32 -> vector<8x256xf32>
      %509 = arith.mulf %508, %24 : vector<8x256xf32>
      %510 = vector.broadcast %69 : f32 to vector<8x256xf32>
      %511 = arith.mulf %510, %509 : vector<8x256xf32>
      %512 = arith.addf %501, %511 : vector<8x256xf32>
      %513 = vector.broadcast %96 : f32 to vector<8x256xf32>
      %514 = arith.mulf %513, %509 : vector<8x256xf32>
      %515 = arith.addf %504, %514 : vector<8x256xf32>
      %516 = vector.broadcast %123 : f32 to vector<8x256xf32>
      %517 = arith.mulf %516, %509 : vector<8x256xf32>
      %518 = arith.addf %507, %517 : vector<8x256xf32>
      %c16_i32_151 = arith.constant 16 : i32
      %519 = tpu.dynamic_rotate %327 by %c16_i32_151 dim 1 : vector<8x256xf32>, i32 -> vector<8x256xf32>
      %520 = arith.mulf %519, %9 : vector<8x256xf32>
      %c1_i32_152 = arith.constant 1 : i32
      %521 = tpu.dynamic_rotate %520 by %c1_i32_152 dim 1 : vector<8x256xf32>, i32 -> vector<8x256xf32>
      %522 = arith.mulf %521, %19 : vector<8x256xf32>
      %523 = vector.broadcast %70 : f32 to vector<8x256xf32>
      %524 = arith.mulf %523, %522 : vector<8x256xf32>
      %525 = arith.addf %512, %524 : vector<8x256xf32>
      %526 = vector.broadcast %97 : f32 to vector<8x256xf32>
      %527 = arith.mulf %526, %522 : vector<8x256xf32>
      %528 = arith.addf %515, %527 : vector<8x256xf32>
      %529 = vector.broadcast %124 : f32 to vector<8x256xf32>
      %530 = arith.mulf %529, %522 : vector<8x256xf32>
      %531 = arith.addf %518, %530 : vector<8x256xf32>
      %532 = vector.broadcast %71 : f32 to vector<8x256xf32>
      %533 = arith.mulf %532, %520 : vector<8x256xf32>
      %534 = arith.addf %525, %533 : vector<8x256xf32>
      %535 = vector.broadcast %98 : f32 to vector<8x256xf32>
      %536 = arith.mulf %535, %520 : vector<8x256xf32>
      %537 = arith.addf %528, %536 : vector<8x256xf32>
      %538 = vector.broadcast %125 : f32 to vector<8x256xf32>
      %539 = arith.mulf %538, %520 : vector<8x256xf32>
      %540 = arith.addf %531, %539 : vector<8x256xf32>
      %c255_i32_153 = arith.constant 255 : i32
      %541 = tpu.dynamic_rotate %520 by %c255_i32_153 dim 1 : vector<8x256xf32>, i32 -> vector<8x256xf32>
      %542 = arith.mulf %541, %24 : vector<8x256xf32>
      %543 = vector.broadcast %72 : f32 to vector<8x256xf32>
      %544 = arith.mulf %543, %542 : vector<8x256xf32>
      %545 = arith.addf %534, %544 : vector<8x256xf32>
      %546 = vector.broadcast %99 : f32 to vector<8x256xf32>
      %547 = arith.mulf %546, %542 : vector<8x256xf32>
      %548 = arith.addf %537, %547 : vector<8x256xf32>
      %549 = vector.broadcast %126 : f32 to vector<8x256xf32>
      %550 = arith.mulf %549, %542 : vector<8x256xf32>
      %551 = arith.addf %540, %550 : vector<8x256xf32>
      %c1_i32_154 = arith.constant 1 : i32
      %552 = tpu.dynamic_rotate %327 by %c1_i32_154 dim 1 : vector<8x256xf32>, i32 -> vector<8x256xf32>
      %553 = arith.mulf %552, %19 : vector<8x256xf32>
      %554 = vector.broadcast %73 : f32 to vector<8x256xf32>
      %555 = arith.mulf %554, %553 : vector<8x256xf32>
      %556 = arith.addf %545, %555 : vector<8x256xf32>
      %557 = vector.broadcast %100 : f32 to vector<8x256xf32>
      %558 = arith.mulf %557, %553 : vector<8x256xf32>
      %559 = arith.addf %548, %558 : vector<8x256xf32>
      %560 = vector.broadcast %127 : f32 to vector<8x256xf32>
      %561 = arith.mulf %560, %553 : vector<8x256xf32>
      %562 = arith.addf %551, %561 : vector<8x256xf32>
      %563 = vector.broadcast %74 : f32 to vector<8x256xf32>
      %564 = arith.mulf %563, %327 : vector<8x256xf32>
      %565 = arith.addf %556, %564 : vector<8x256xf32>
      %566 = vector.broadcast %101 : f32 to vector<8x256xf32>
      %567 = arith.mulf %566, %327 : vector<8x256xf32>
      %568 = arith.addf %559, %567 : vector<8x256xf32>
      %569 = vector.broadcast %128 : f32 to vector<8x256xf32>
      %570 = arith.mulf %569, %327 : vector<8x256xf32>
      %571 = arith.addf %562, %570 : vector<8x256xf32>
      %c255_i32_155 = arith.constant 255 : i32
      %572 = tpu.dynamic_rotate %327 by %c255_i32_155 dim 1 : vector<8x256xf32>, i32 -> vector<8x256xf32>
      %573 = arith.mulf %572, %24 : vector<8x256xf32>
      %574 = vector.broadcast %75 : f32 to vector<8x256xf32>
      %575 = arith.mulf %574, %573 : vector<8x256xf32>
      %576 = arith.addf %565, %575 : vector<8x256xf32>
      %577 = vector.broadcast %102 : f32 to vector<8x256xf32>
      %578 = arith.mulf %577, %573 : vector<8x256xf32>
      %579 = arith.addf %568, %578 : vector<8x256xf32>
      %580 = vector.broadcast %129 : f32 to vector<8x256xf32>
      %581 = arith.mulf %580, %573 : vector<8x256xf32>
      %582 = arith.addf %571, %581 : vector<8x256xf32>
      %c240_i32_156 = arith.constant 240 : i32
      %583 = tpu.dynamic_rotate %327 by %c240_i32_156 dim 1 : vector<8x256xf32>, i32 -> vector<8x256xf32>
      %584 = arith.mulf %583, %14 : vector<8x256xf32>
      %c1_i32_157 = arith.constant 1 : i32
      %585 = tpu.dynamic_rotate %584 by %c1_i32_157 dim 1 : vector<8x256xf32>, i32 -> vector<8x256xf32>
      %586 = arith.mulf %585, %19 : vector<8x256xf32>
      %587 = vector.broadcast %76 : f32 to vector<8x256xf32>
      %588 = arith.mulf %587, %586 : vector<8x256xf32>
      %589 = arith.addf %576, %588 : vector<8x256xf32>
      %590 = vector.broadcast %103 : f32 to vector<8x256xf32>
      %591 = arith.mulf %590, %586 : vector<8x256xf32>
      %592 = arith.addf %579, %591 : vector<8x256xf32>
      %593 = vector.broadcast %130 : f32 to vector<8x256xf32>
      %594 = arith.mulf %593, %586 : vector<8x256xf32>
      %595 = arith.addf %582, %594 : vector<8x256xf32>
      %596 = vector.broadcast %77 : f32 to vector<8x256xf32>
      %597 = arith.mulf %596, %584 : vector<8x256xf32>
      %598 = arith.addf %589, %597 : vector<8x256xf32>
      %599 = vector.broadcast %104 : f32 to vector<8x256xf32>
      %600 = arith.mulf %599, %584 : vector<8x256xf32>
      %601 = arith.addf %592, %600 : vector<8x256xf32>
      %602 = vector.broadcast %131 : f32 to vector<8x256xf32>
      %603 = arith.mulf %602, %584 : vector<8x256xf32>
      %604 = arith.addf %595, %603 : vector<8x256xf32>
      %c255_i32_158 = arith.constant 255 : i32
      %605 = tpu.dynamic_rotate %584 by %c255_i32_158 dim 1 : vector<8x256xf32>, i32 -> vector<8x256xf32>
      %606 = arith.mulf %605, %24 : vector<8x256xf32>
      %607 = vector.broadcast %78 : f32 to vector<8x256xf32>
      %608 = arith.mulf %607, %606 : vector<8x256xf32>
      %609 = arith.addf %598, %608 : vector<8x256xf32>
      %610 = vector.broadcast %105 : f32 to vector<8x256xf32>
      %611 = arith.mulf %610, %606 : vector<8x256xf32>
      %612 = arith.addf %601, %611 : vector<8x256xf32>
      %613 = vector.broadcast %132 : f32 to vector<8x256xf32>
      %614 = arith.mulf %613, %606 : vector<8x256xf32>
      %615 = arith.addf %604, %614 : vector<8x256xf32>
      %616 = vector.broadcast %217 : f32 to vector<8x256xf32>
      %617 = arith.addf %609, %616 : vector<8x256xf32>
      %618 = vector.broadcast %218 : f32 to vector<8x256xf32>
      %619 = arith.addf %612, %618 : vector<8x256xf32>
      %620 = vector.broadcast %219 : f32 to vector<8x256xf32>
      %621 = arith.addf %615, %620 : vector<8x256xf32>
      %c16_i32_159 = arith.constant 16 : i32
      %622 = tpu.dynamic_rotate %617 by %c16_i32_159 dim 1 : vector<8x256xf32>, i32 -> vector<8x256xf32>
      %623 = arith.mulf %622, %9 : vector<8x256xf32>
      %c1_i32_160 = arith.constant 1 : i32
      %624 = tpu.dynamic_rotate %623 by %c1_i32_160 dim 1 : vector<8x256xf32>, i32 -> vector<8x256xf32>
      %625 = arith.mulf %624, %19 : vector<8x256xf32>
      %626 = vector.broadcast %133 : f32 to vector<8x256xf32>
      %627 = arith.mulf %626, %625 : vector<8x256xf32>
      %628 = vector.broadcast %160 : f32 to vector<8x256xf32>
      %629 = arith.mulf %628, %625 : vector<8x256xf32>
      %630 = vector.broadcast %187 : f32 to vector<8x256xf32>
      %631 = arith.mulf %630, %625 : vector<8x256xf32>
      %632 = vector.broadcast %134 : f32 to vector<8x256xf32>
      %633 = arith.mulf %632, %623 : vector<8x256xf32>
      %634 = arith.addf %627, %633 : vector<8x256xf32>
      %635 = vector.broadcast %161 : f32 to vector<8x256xf32>
      %636 = arith.mulf %635, %623 : vector<8x256xf32>
      %637 = arith.addf %629, %636 : vector<8x256xf32>
      %638 = vector.broadcast %188 : f32 to vector<8x256xf32>
      %639 = arith.mulf %638, %623 : vector<8x256xf32>
      %640 = arith.addf %631, %639 : vector<8x256xf32>
      %c255_i32_161 = arith.constant 255 : i32
      %641 = tpu.dynamic_rotate %623 by %c255_i32_161 dim 1 : vector<8x256xf32>, i32 -> vector<8x256xf32>
      %642 = arith.mulf %641, %24 : vector<8x256xf32>
      %643 = vector.broadcast %135 : f32 to vector<8x256xf32>
      %644 = arith.mulf %643, %642 : vector<8x256xf32>
      %645 = arith.addf %634, %644 : vector<8x256xf32>
      %646 = vector.broadcast %162 : f32 to vector<8x256xf32>
      %647 = arith.mulf %646, %642 : vector<8x256xf32>
      %648 = arith.addf %637, %647 : vector<8x256xf32>
      %649 = vector.broadcast %189 : f32 to vector<8x256xf32>
      %650 = arith.mulf %649, %642 : vector<8x256xf32>
      %651 = arith.addf %640, %650 : vector<8x256xf32>
      %c1_i32_162 = arith.constant 1 : i32
      %652 = tpu.dynamic_rotate %617 by %c1_i32_162 dim 1 : vector<8x256xf32>, i32 -> vector<8x256xf32>
      %653 = arith.mulf %652, %19 : vector<8x256xf32>
      %654 = vector.broadcast %136 : f32 to vector<8x256xf32>
      %655 = arith.mulf %654, %653 : vector<8x256xf32>
      %656 = arith.addf %645, %655 : vector<8x256xf32>
      %657 = vector.broadcast %163 : f32 to vector<8x256xf32>
      %658 = arith.mulf %657, %653 : vector<8x256xf32>
      %659 = arith.addf %648, %658 : vector<8x256xf32>
      %660 = vector.broadcast %190 : f32 to vector<8x256xf32>
      %661 = arith.mulf %660, %653 : vector<8x256xf32>
      %662 = arith.addf %651, %661 : vector<8x256xf32>
      %663 = vector.broadcast %137 : f32 to vector<8x256xf32>
      %664 = arith.mulf %663, %617 : vector<8x256xf32>
      %665 = arith.addf %656, %664 : vector<8x256xf32>
      %666 = vector.broadcast %164 : f32 to vector<8x256xf32>
      %667 = arith.mulf %666, %617 : vector<8x256xf32>
      %668 = arith.addf %659, %667 : vector<8x256xf32>
      %669 = vector.broadcast %191 : f32 to vector<8x256xf32>
      %670 = arith.mulf %669, %617 : vector<8x256xf32>
      %671 = arith.addf %662, %670 : vector<8x256xf32>
      %c255_i32_163 = arith.constant 255 : i32
      %672 = tpu.dynamic_rotate %617 by %c255_i32_163 dim 1 : vector<8x256xf32>, i32 -> vector<8x256xf32>
      %673 = arith.mulf %672, %24 : vector<8x256xf32>
      %674 = vector.broadcast %138 : f32 to vector<8x256xf32>
      %675 = arith.mulf %674, %673 : vector<8x256xf32>
      %676 = arith.addf %665, %675 : vector<8x256xf32>
      %677 = vector.broadcast %165 : f32 to vector<8x256xf32>
      %678 = arith.mulf %677, %673 : vector<8x256xf32>
      %679 = arith.addf %668, %678 : vector<8x256xf32>
      %680 = vector.broadcast %192 : f32 to vector<8x256xf32>
      %681 = arith.mulf %680, %673 : vector<8x256xf32>
      %682 = arith.addf %671, %681 : vector<8x256xf32>
      %c240_i32_164 = arith.constant 240 : i32
      %683 = tpu.dynamic_rotate %617 by %c240_i32_164 dim 1 : vector<8x256xf32>, i32 -> vector<8x256xf32>
      %684 = arith.mulf %683, %14 : vector<8x256xf32>
      %c1_i32_165 = arith.constant 1 : i32
      %685 = tpu.dynamic_rotate %684 by %c1_i32_165 dim 1 : vector<8x256xf32>, i32 -> vector<8x256xf32>
      %686 = arith.mulf %685, %19 : vector<8x256xf32>
      %687 = vector.broadcast %139 : f32 to vector<8x256xf32>
      %688 = arith.mulf %687, %686 : vector<8x256xf32>
      %689 = arith.addf %676, %688 : vector<8x256xf32>
      %690 = vector.broadcast %166 : f32 to vector<8x256xf32>
      %691 = arith.mulf %690, %686 : vector<8x256xf32>
      %692 = arith.addf %679, %691 : vector<8x256xf32>
      %693 = vector.broadcast %193 : f32 to vector<8x256xf32>
      %694 = arith.mulf %693, %686 : vector<8x256xf32>
      %695 = arith.addf %682, %694 : vector<8x256xf32>
      %696 = vector.broadcast %140 : f32 to vector<8x256xf32>
      %697 = arith.mulf %696, %684 : vector<8x256xf32>
      %698 = arith.addf %689, %697 : vector<8x256xf32>
      %699 = vector.broadcast %167 : f32 to vector<8x256xf32>
      %700 = arith.mulf %699, %684 : vector<8x256xf32>
      %701 = arith.addf %692, %700 : vector<8x256xf32>
      %702 = vector.broadcast %194 : f32 to vector<8x256xf32>
      %703 = arith.mulf %702, %684 : vector<8x256xf32>
      %704 = arith.addf %695, %703 : vector<8x256xf32>
      %c255_i32_166 = arith.constant 255 : i32
      %705 = tpu.dynamic_rotate %684 by %c255_i32_166 dim 1 : vector<8x256xf32>, i32 -> vector<8x256xf32>
      %706 = arith.mulf %705, %24 : vector<8x256xf32>
      %707 = vector.broadcast %141 : f32 to vector<8x256xf32>
      %708 = arith.mulf %707, %706 : vector<8x256xf32>
      %709 = arith.addf %698, %708 : vector<8x256xf32>
      %710 = vector.broadcast %168 : f32 to vector<8x256xf32>
      %711 = arith.mulf %710, %706 : vector<8x256xf32>
      %712 = arith.addf %701, %711 : vector<8x256xf32>
      %713 = vector.broadcast %195 : f32 to vector<8x256xf32>
      %714 = arith.mulf %713, %706 : vector<8x256xf32>
      %715 = arith.addf %704, %714 : vector<8x256xf32>
      %c16_i32_167 = arith.constant 16 : i32
      %716 = tpu.dynamic_rotate %619 by %c16_i32_167 dim 1 : vector<8x256xf32>, i32 -> vector<8x256xf32>
      %717 = arith.mulf %716, %9 : vector<8x256xf32>
      %c1_i32_168 = arith.constant 1 : i32
      %718 = tpu.dynamic_rotate %717 by %c1_i32_168 dim 1 : vector<8x256xf32>, i32 -> vector<8x256xf32>
      %719 = arith.mulf %718, %19 : vector<8x256xf32>
      %720 = vector.broadcast %142 : f32 to vector<8x256xf32>
      %721 = arith.mulf %720, %719 : vector<8x256xf32>
      %722 = arith.addf %709, %721 : vector<8x256xf32>
      %723 = vector.broadcast %169 : f32 to vector<8x256xf32>
      %724 = arith.mulf %723, %719 : vector<8x256xf32>
      %725 = arith.addf %712, %724 : vector<8x256xf32>
      %726 = vector.broadcast %196 : f32 to vector<8x256xf32>
      %727 = arith.mulf %726, %719 : vector<8x256xf32>
      %728 = arith.addf %715, %727 : vector<8x256xf32>
      %729 = vector.broadcast %143 : f32 to vector<8x256xf32>
      %730 = arith.mulf %729, %717 : vector<8x256xf32>
      %731 = arith.addf %722, %730 : vector<8x256xf32>
      %732 = vector.broadcast %170 : f32 to vector<8x256xf32>
      %733 = arith.mulf %732, %717 : vector<8x256xf32>
      %734 = arith.addf %725, %733 : vector<8x256xf32>
      %735 = vector.broadcast %197 : f32 to vector<8x256xf32>
      %736 = arith.mulf %735, %717 : vector<8x256xf32>
      %737 = arith.addf %728, %736 : vector<8x256xf32>
      %c255_i32_169 = arith.constant 255 : i32
      %738 = tpu.dynamic_rotate %717 by %c255_i32_169 dim 1 : vector<8x256xf32>, i32 -> vector<8x256xf32>
      %739 = arith.mulf %738, %24 : vector<8x256xf32>
      %740 = vector.broadcast %144 : f32 to vector<8x256xf32>
      %741 = arith.mulf %740, %739 : vector<8x256xf32>
      %742 = arith.addf %731, %741 : vector<8x256xf32>
      %743 = vector.broadcast %171 : f32 to vector<8x256xf32>
      %744 = arith.mulf %743, %739 : vector<8x256xf32>
      %745 = arith.addf %734, %744 : vector<8x256xf32>
      %746 = vector.broadcast %198 : f32 to vector<8x256xf32>
      %747 = arith.mulf %746, %739 : vector<8x256xf32>
      %748 = arith.addf %737, %747 : vector<8x256xf32>
      %c1_i32_170 = arith.constant 1 : i32
      %749 = tpu.dynamic_rotate %619 by %c1_i32_170 dim 1 : vector<8x256xf32>, i32 -> vector<8x256xf32>
      %750 = arith.mulf %749, %19 : vector<8x256xf32>
      %751 = vector.broadcast %145 : f32 to vector<8x256xf32>
      %752 = arith.mulf %751, %750 : vector<8x256xf32>
      %753 = arith.addf %742, %752 : vector<8x256xf32>
      %754 = vector.broadcast %172 : f32 to vector<8x256xf32>
      %755 = arith.mulf %754, %750 : vector<8x256xf32>
      %756 = arith.addf %745, %755 : vector<8x256xf32>
      %757 = vector.broadcast %199 : f32 to vector<8x256xf32>
      %758 = arith.mulf %757, %750 : vector<8x256xf32>
      %759 = arith.addf %748, %758 : vector<8x256xf32>
      %760 = vector.broadcast %146 : f32 to vector<8x256xf32>
      %761 = arith.mulf %760, %619 : vector<8x256xf32>
      %762 = arith.addf %753, %761 : vector<8x256xf32>
      %763 = vector.broadcast %173 : f32 to vector<8x256xf32>
      %764 = arith.mulf %763, %619 : vector<8x256xf32>
      %765 = arith.addf %756, %764 : vector<8x256xf32>
      %766 = vector.broadcast %200 : f32 to vector<8x256xf32>
      %767 = arith.mulf %766, %619 : vector<8x256xf32>
      %768 = arith.addf %759, %767 : vector<8x256xf32>
      %c255_i32_171 = arith.constant 255 : i32
      %769 = tpu.dynamic_rotate %619 by %c255_i32_171 dim 1 : vector<8x256xf32>, i32 -> vector<8x256xf32>
      %770 = arith.mulf %769, %24 : vector<8x256xf32>
      %771 = vector.broadcast %147 : f32 to vector<8x256xf32>
      %772 = arith.mulf %771, %770 : vector<8x256xf32>
      %773 = arith.addf %762, %772 : vector<8x256xf32>
      %774 = vector.broadcast %174 : f32 to vector<8x256xf32>
      %775 = arith.mulf %774, %770 : vector<8x256xf32>
      %776 = arith.addf %765, %775 : vector<8x256xf32>
      %777 = vector.broadcast %201 : f32 to vector<8x256xf32>
      %778 = arith.mulf %777, %770 : vector<8x256xf32>
      %779 = arith.addf %768, %778 : vector<8x256xf32>
      %c240_i32_172 = arith.constant 240 : i32
      %780 = tpu.dynamic_rotate %619 by %c240_i32_172 dim 1 : vector<8x256xf32>, i32 -> vector<8x256xf32>
      %781 = arith.mulf %780, %14 : vector<8x256xf32>
      %c1_i32_173 = arith.constant 1 : i32
      %782 = tpu.dynamic_rotate %781 by %c1_i32_173 dim 1 : vector<8x256xf32>, i32 -> vector<8x256xf32>
      %783 = arith.mulf %782, %19 : vector<8x256xf32>
      %784 = vector.broadcast %148 : f32 to vector<8x256xf32>
      %785 = arith.mulf %784, %783 : vector<8x256xf32>
      %786 = arith.addf %773, %785 : vector<8x256xf32>
      %787 = vector.broadcast %175 : f32 to vector<8x256xf32>
      %788 = arith.mulf %787, %783 : vector<8x256xf32>
      %789 = arith.addf %776, %788 : vector<8x256xf32>
      %790 = vector.broadcast %202 : f32 to vector<8x256xf32>
      %791 = arith.mulf %790, %783 : vector<8x256xf32>
      %792 = arith.addf %779, %791 : vector<8x256xf32>
      %793 = vector.broadcast %149 : f32 to vector<8x256xf32>
      %794 = arith.mulf %793, %781 : vector<8x256xf32>
      %795 = arith.addf %786, %794 : vector<8x256xf32>
      %796 = vector.broadcast %176 : f32 to vector<8x256xf32>
      %797 = arith.mulf %796, %781 : vector<8x256xf32>
      %798 = arith.addf %789, %797 : vector<8x256xf32>
      %799 = vector.broadcast %203 : f32 to vector<8x256xf32>
      %800 = arith.mulf %799, %781 : vector<8x256xf32>
      %801 = arith.addf %792, %800 : vector<8x256xf32>
      %c255_i32_174 = arith.constant 255 : i32
      %802 = tpu.dynamic_rotate %781 by %c255_i32_174 dim 1 : vector<8x256xf32>, i32 -> vector<8x256xf32>
      %803 = arith.mulf %802, %24 : vector<8x256xf32>
      %804 = vector.broadcast %150 : f32 to vector<8x256xf32>
      %805 = arith.mulf %804, %803 : vector<8x256xf32>
      %806 = arith.addf %795, %805 : vector<8x256xf32>
      %807 = vector.broadcast %177 : f32 to vector<8x256xf32>
      %808 = arith.mulf %807, %803 : vector<8x256xf32>
      %809 = arith.addf %798, %808 : vector<8x256xf32>
      %810 = vector.broadcast %204 : f32 to vector<8x256xf32>
      %811 = arith.mulf %810, %803 : vector<8x256xf32>
      %812 = arith.addf %801, %811 : vector<8x256xf32>
      %c16_i32_175 = arith.constant 16 : i32
      %813 = tpu.dynamic_rotate %621 by %c16_i32_175 dim 1 : vector<8x256xf32>, i32 -> vector<8x256xf32>
      %814 = arith.mulf %813, %9 : vector<8x256xf32>
      %c1_i32_176 = arith.constant 1 : i32
      %815 = tpu.dynamic_rotate %814 by %c1_i32_176 dim 1 : vector<8x256xf32>, i32 -> vector<8x256xf32>
      %816 = arith.mulf %815, %19 : vector<8x256xf32>
      %817 = vector.broadcast %151 : f32 to vector<8x256xf32>
      %818 = arith.mulf %817, %816 : vector<8x256xf32>
      %819 = arith.addf %806, %818 : vector<8x256xf32>
      %820 = vector.broadcast %178 : f32 to vector<8x256xf32>
      %821 = arith.mulf %820, %816 : vector<8x256xf32>
      %822 = arith.addf %809, %821 : vector<8x256xf32>
      %823 = vector.broadcast %205 : f32 to vector<8x256xf32>
      %824 = arith.mulf %823, %816 : vector<8x256xf32>
      %825 = arith.addf %812, %824 : vector<8x256xf32>
      %826 = vector.broadcast %152 : f32 to vector<8x256xf32>
      %827 = arith.mulf %826, %814 : vector<8x256xf32>
      %828 = arith.addf %819, %827 : vector<8x256xf32>
      %829 = vector.broadcast %179 : f32 to vector<8x256xf32>
      %830 = arith.mulf %829, %814 : vector<8x256xf32>
      %831 = arith.addf %822, %830 : vector<8x256xf32>
      %832 = vector.broadcast %206 : f32 to vector<8x256xf32>
      %833 = arith.mulf %832, %814 : vector<8x256xf32>
      %834 = arith.addf %825, %833 : vector<8x256xf32>
      %c255_i32_177 = arith.constant 255 : i32
      %835 = tpu.dynamic_rotate %814 by %c255_i32_177 dim 1 : vector<8x256xf32>, i32 -> vector<8x256xf32>
      %836 = arith.mulf %835, %24 : vector<8x256xf32>
      %837 = vector.broadcast %153 : f32 to vector<8x256xf32>
      %838 = arith.mulf %837, %836 : vector<8x256xf32>
      %839 = arith.addf %828, %838 : vector<8x256xf32>
      %840 = vector.broadcast %180 : f32 to vector<8x256xf32>
      %841 = arith.mulf %840, %836 : vector<8x256xf32>
      %842 = arith.addf %831, %841 : vector<8x256xf32>
      %843 = vector.broadcast %207 : f32 to vector<8x256xf32>
      %844 = arith.mulf %843, %836 : vector<8x256xf32>
      %845 = arith.addf %834, %844 : vector<8x256xf32>
      %c1_i32_178 = arith.constant 1 : i32
      %846 = tpu.dynamic_rotate %621 by %c1_i32_178 dim 1 : vector<8x256xf32>, i32 -> vector<8x256xf32>
      %847 = arith.mulf %846, %19 : vector<8x256xf32>
      %848 = vector.broadcast %154 : f32 to vector<8x256xf32>
      %849 = arith.mulf %848, %847 : vector<8x256xf32>
      %850 = arith.addf %839, %849 : vector<8x256xf32>
      %851 = vector.broadcast %181 : f32 to vector<8x256xf32>
      %852 = arith.mulf %851, %847 : vector<8x256xf32>
      %853 = arith.addf %842, %852 : vector<8x256xf32>
      %854 = vector.broadcast %208 : f32 to vector<8x256xf32>
      %855 = arith.mulf %854, %847 : vector<8x256xf32>
      %856 = arith.addf %845, %855 : vector<8x256xf32>
      %857 = vector.broadcast %155 : f32 to vector<8x256xf32>
      %858 = arith.mulf %857, %621 : vector<8x256xf32>
      %859 = arith.addf %850, %858 : vector<8x256xf32>
      %860 = vector.broadcast %182 : f32 to vector<8x256xf32>
      %861 = arith.mulf %860, %621 : vector<8x256xf32>
      %862 = arith.addf %853, %861 : vector<8x256xf32>
      %863 = vector.broadcast %209 : f32 to vector<8x256xf32>
      %864 = arith.mulf %863, %621 : vector<8x256xf32>
      %865 = arith.addf %856, %864 : vector<8x256xf32>
      %c255_i32_179 = arith.constant 255 : i32
      %866 = tpu.dynamic_rotate %621 by %c255_i32_179 dim 1 : vector<8x256xf32>, i32 -> vector<8x256xf32>
      %867 = arith.mulf %866, %24 : vector<8x256xf32>
      %868 = vector.broadcast %156 : f32 to vector<8x256xf32>
      %869 = arith.mulf %868, %867 : vector<8x256xf32>
      %870 = arith.addf %859, %869 : vector<8x256xf32>
      %871 = vector.broadcast %183 : f32 to vector<8x256xf32>
      %872 = arith.mulf %871, %867 : vector<8x256xf32>
      %873 = arith.addf %862, %872 : vector<8x256xf32>
      %874 = vector.broadcast %210 : f32 to vector<8x256xf32>
      %875 = arith.mulf %874, %867 : vector<8x256xf32>
      %876 = arith.addf %865, %875 : vector<8x256xf32>
      %c240_i32_180 = arith.constant 240 : i32
      %877 = tpu.dynamic_rotate %621 by %c240_i32_180 dim 1 : vector<8x256xf32>, i32 -> vector<8x256xf32>
      %878 = arith.mulf %877, %14 : vector<8x256xf32>
      %c1_i32_181 = arith.constant 1 : i32
      %879 = tpu.dynamic_rotate %878 by %c1_i32_181 dim 1 : vector<8x256xf32>, i32 -> vector<8x256xf32>
      %880 = arith.mulf %879, %19 : vector<8x256xf32>
      %881 = vector.broadcast %157 : f32 to vector<8x256xf32>
      %882 = arith.mulf %881, %880 : vector<8x256xf32>
      %883 = arith.addf %870, %882 : vector<8x256xf32>
      %884 = vector.broadcast %184 : f32 to vector<8x256xf32>
      %885 = arith.mulf %884, %880 : vector<8x256xf32>
      %886 = arith.addf %873, %885 : vector<8x256xf32>
      %887 = vector.broadcast %211 : f32 to vector<8x256xf32>
      %888 = arith.mulf %887, %880 : vector<8x256xf32>
      %889 = arith.addf %876, %888 : vector<8x256xf32>
      %890 = vector.broadcast %158 : f32 to vector<8x256xf32>
      %891 = arith.mulf %890, %878 : vector<8x256xf32>
      %892 = arith.addf %883, %891 : vector<8x256xf32>
      %893 = vector.broadcast %185 : f32 to vector<8x256xf32>
      %894 = arith.mulf %893, %878 : vector<8x256xf32>
      %895 = arith.addf %886, %894 : vector<8x256xf32>
      %896 = vector.broadcast %212 : f32 to vector<8x256xf32>
      %897 = arith.mulf %896, %878 : vector<8x256xf32>
      %898 = arith.addf %889, %897 : vector<8x256xf32>
      %c255_i32_182 = arith.constant 255 : i32
      %899 = tpu.dynamic_rotate %878 by %c255_i32_182 dim 1 : vector<8x256xf32>, i32 -> vector<8x256xf32>
      %900 = arith.mulf %899, %24 : vector<8x256xf32>
      %901 = vector.broadcast %159 : f32 to vector<8x256xf32>
      %902 = arith.mulf %901, %900 : vector<8x256xf32>
      %903 = arith.addf %892, %902 : vector<8x256xf32>
      %904 = vector.broadcast %186 : f32 to vector<8x256xf32>
      %905 = arith.mulf %904, %900 : vector<8x256xf32>
      %906 = arith.addf %895, %905 : vector<8x256xf32>
      %907 = vector.broadcast %213 : f32 to vector<8x256xf32>
      %908 = arith.mulf %907, %900 : vector<8x256xf32>
      %909 = arith.addf %898, %908 : vector<8x256xf32>
      %910 = vector.broadcast %220 : f32 to vector<8x256xf32>
      %911 = arith.addf %903, %910 : vector<8x256xf32>
      %912 = vector.broadcast %221 : f32 to vector<8x256xf32>
      %913 = arith.addf %906, %912 : vector<8x256xf32>
      %914 = vector.broadcast %222 : f32 to vector<8x256xf32>
      %915 = arith.addf %909, %914 : vector<8x256xf32>
      %cst_183 = arith.constant 0.000000e+00 : f32
      %916 = vector.broadcast %cst_183 : f32 to vector<8x256xf32>
      %917 = arith.maximumf %911, %916 : vector<8x256xf32>
      %918 = arith.addf %323, %917 : vector<8x256xf32>
      %c0_184 = arith.constant 0 : index
      %919 = arith.index_cast %225 : i32 to index
      %c0_185 = arith.constant 0 : index
      %920 = vector.load %arg8[%c0_184, %919, %c0_185] : memref<3x16x256xf32, #tpu.memory_space<vmem>>, vector<1x8x256xf32>
      %921 = vector.shape_cast %920 : vector<1x8x256xf32> to vector<8x256xf32>
      %922 = vector.shape_cast %918 : vector<8x256xf32> to vector<1x8x256xf32>
      tpu.vector_store %arg8[%c0_184, %919, %c0_185], %922 {strides = array<i32>} : memref<3x16x256xf32, #tpu.memory_space<vmem>>, vector<1x8x256xf32>,
      %cst_186 = arith.constant 0.000000e+00 : f32
      %923 = vector.broadcast %cst_186 : f32 to vector<8x256xf32>
      %924 = arith.maximumf %913, %923 : vector<8x256xf32>
      %925 = arith.addf %325, %924 : vector<8x256xf32>
      %c1_187 = arith.constant 1 : index
      %926 = arith.index_cast %225 : i32 to index
      %c0_188 = arith.constant 0 : index
      %927 = vector.load %arg8[%c1_187, %926, %c0_188] : memref<3x16x256xf32, #tpu.memory_space<vmem>>, vector<1x8x256xf32>
      %928 = vector.shape_cast %927 : vector<1x8x256xf32> to vector<8x256xf32>
      %929 = vector.shape_cast %925 : vector<8x256xf32> to vector<1x8x256xf32>
      tpu.vector_store %arg8[%c1_187, %926, %c0_188], %929 {strides = array<i32>} : memref<3x16x256xf32, #tpu.memory_space<vmem>>, vector<1x8x256xf32>,
      %cst_189 = arith.constant 0.000000e+00 : f32
      %930 = vector.broadcast %cst_189 : f32 to vector<8x256xf32>
      %931 = arith.maximumf %915, %930 : vector<8x256xf32>
      %932 = arith.addf %327, %931 : vector<8x256xf32>
      %c2_190 = arith.constant 2 : index
      %933 = arith.index_cast %225 : i32 to index
      %c0_191 = arith.constant 0 : index
      %934 = vector.load %arg8[%c2_190, %933, %c0_191] : memref<3x16x256xf32, #tpu.memory_space<vmem>>, vector<1x8x256xf32>
      %935 = vector.shape_cast %934 : vector<1x8x256xf32> to vector<8x256xf32>
      %936 = vector.shape_cast %932 : vector<8x256xf32> to vector<1x8x256xf32>
      tpu.vector_store %arg8[%c2_190, %933, %c0_191], %936 {strides = array<i32>} : memref<3x16x256xf32, #tpu.memory_space<vmem>>, vector<1x8x256xf32>,
    }
    %c2_i32_128 = arith.constant 2 : i32
    return
  }
  func.func @transform_0(%arg0: i32) -> (i32, i32) {
    %c0_i32 = arith.constant 0 : i32
    %c0_i32_0 = arith.constant 0 : i32
    return %arg0, %c0_i32 : i32, i32
  }
  func.func @transform_1(%arg0: i32) -> i32 {
    %c0_i32 = arith.constant 0 : i32
    %c0_i32_0 = arith.constant 0 : i32
    return %c0_i32 : i32
  }
  func.func @transform_2(%arg0: i32) -> i32 {
    %c0_i32 = arith.constant 0 : i32
    %c0_i32_0 = arith.constant 0 : i32
    return %c0_i32 : i32
  }
  func.func @transform_3(%arg0: i32) -> i32 {
    %c0_i32 = arith.constant 0 : i32
    %c0_i32_0 = arith.constant 0 : i32
    return %c0_i32 : i32
  }
  func.func @transform_4(%arg0: i32) -> i32 {
    %c0_i32 = arith.constant 0 : i32
    %c0_i32_0 = arith.constant 0 : i32
    return %c0_i32 : i32
  }
  func.func @transform_5(%arg0: i32) -> i32 {
    %c0_i32 = arith.constant 0 : i32
    %c0_i32_0 = arith.constant 0 : i32
    return %c0_i32 : i32
  }
  func.func @transform_6(%arg0: i32) -> i32 {
    %c0_i32 = arith.constant 0 : i32
    %c0_i32_0 = arith.constant 0 : i32
    return %c0_i32 : i32
  }
  func.func @transform_7(%arg0: i32) -> (i32, i32, i32) {
    %c0_i32 = arith.constant 0 : i32
    %c0_i32_0 = arith.constant 0 : i32
    %c0_i32_1 = arith.constant 0 : i32
    return %c0_i32, %arg0, %c0_i32_0 : i32, i32, i32
  }
}

</mosaic_0001>

<bundles_post_ra>
// kernel: residual_net4_forward.1
= control target key start
LH: loop header
LB: loop body
LE: loop exit
PB: predicated region body
PF: predicated region fallthrough
CT: control target
= control target key end

     0   :  { %s4495_s0 = inlined_call_operand.vmem [shape: f32[16,256], index: 0, kind: input, shape index: {}]   ;;  %s4496_s1 = inlined_call_operand.vmem [shape: f32[27], index: 1, kind: input, shape index: {}]   ;;  %s4497_s2 = inlined_call_operand.vmem [shape: f32[3], index: 2, kind: input, shape index: {}]   ;;  %s4498_s3 = inlined_call_operand.vmem [shape: f32[81], index: 3, kind: input, shape index: {}]   ;;  %s4499_s4 = inlined_call_operand.vmem [shape: f32[3], index: 4, kind: input, shape index: {}]   ;;  %s4500_s5 = inlined_call_operand.vmem [shape: f32[81], index: 5, kind: input, shape index: {}]   ;;  %s4501_s6 = inlined_call_operand.vmem [shape: f32[3], index: 6, kind: input, shape index: {}]   ;;  %s4502_s7 = inlined_call_operand.vmem [shape: f32[3,16,256], index: 7, kind: output, shape index: {}]  }
   0x1   :  { %4647 = sst [smem:[#allocation266_spill]] %s4495_s0 }
   0x2   :  { %4648 = sst [smem:[#allocation267_spill]] %s4502_s7 }
   0x3   :  { %12 = vsyncpa [#allocation3], 0 }
   0x4   :  { %13 = vsyncpa [#allocation5], 0 }
   0x5   :  { %14 = vsyncpa [#allocation8], 0  ;;  %s32_s26 = sshll.u32 %s4497_s2, 4  ;;  %s33_s26 = int_to_ptr.vmem [resolvable:$true] %s32_s26 }
   0x6   :  { %15 = vsyncpa [#allocation11], 0  ;;  %s50_s29 = sshll.u32 %s4499_s4, 4  ;;  %s2104_s30 = smov [#allocation4]   ;;  %s51_s29 = int_to_ptr.vmem [resolvable:$true] %s50_s29 }
   0x7   :  { %35 = dma.vmem_to_smem %s33_s26, 16, %s2104_s30, [#allocation5]  }
   0x8   :  { %s2105_s8 = smov [#allocation7]   ;;  %s23_s11 = sshll.u32 %s4496_s1, 4  ;;  %s24_s11 = int_to_ptr.vmem [resolvable:$true] %s23_s11 }
   0x9   :  { %53 = dma.vmem_to_smem %s51_s29, 16, %s2105_s8, [#allocation8]  }
   0xa   :  { %s41_s2 = sshll.u32 %s4498_s3, 4  ;;  %s2106_s14 = smov [#allocation2]   ;;  %s42_s2 = int_to_ptr.vmem [resolvable:$true] %s41_s2 }
   0xb   :  { %26 = dma.vmem_to_smem %s24_s11, 16, %s2106_s14, [#allocation3]  }
   0xc   :  { %s2107_s15 = smov [#allocation6]   ;;  %s59_s17 = sshll.u32 %s4500_s5, 4  ;;  %s60_s17 = int_to_ptr.vmem [resolvable:$true] %s59_s17 }
   0xd   :  { %44 = dma.vmem_to_smem %s42_s2, 16, %s2107_s15, [#allocation5]  }
   0xe   :  { %s68_s20 = sshll.u32 %s4501_s6, 4  ;;  %s2108_s1 = smov [#allocation9]   ;;  %s69_s20 = int_to_ptr.vmem [resolvable:$true] %s68_s20 }
   0xf   :  { %62 = dma.vmem_to_smem %s60_s17, 16, %s2108_s1, [#allocation8]  }
  0x10   :  { %s2109_s21 = smov [#allocation10]  }
  0x11   :  { %71 = dma.vmem_to_smem %s69_s20, 16, %s2109_s21, [#allocation11]  }
  0x12   :  { %2092 = dma.done.wait [#allocation3], 16  }
  0x13   :  { %2093 = vsyncadd [#allocation3], 4294967280 }
  0x14   :  { %2094 = dma.done.wait [#allocation5], 32  }
  0x15   :  { %2095 = vsyncadd [#allocation5], 4294967264 }
  0x16   :  { %2096 = dma.done.wait [#allocation8], 32  }
  0x17   :  { %2097 = vsyncadd [#allocation8], 4294967264 }
  0x18   :  { %2098 = dma.done.wait [#allocation11], 16  }
  0x19   :  { %2099 = vsyncadd [#allocation11], 4294967280 }
  0x1a   :  { %96 = sfence }
  0x1b   :  { %v97_v0 = vlaneseq  ;;  %s2173_s3 = sld [smem:[#allocation2]]  ;;  %v2110_v7 = vmov 0.0  }
  0x1c   :  { %s2175_s5 = sld [smem:[#allocation2 + $0x1]] }
  0x1d   :  { %v2177_v1 = vand.u32 127, %v97_v0  ;;  %s2179_s6 = sld [smem:[#allocation2 + $0x2]] }
  0x1e   :  { %s2181_s22 = sld [smem:[#allocation2 + $0x3]] }
  0x1f   :  { %v99_v2 = vadd.s32 128, %v2177_v1  ;;  %v100_v3 = vshra.s32 %v2177_v1, 4  ;;  %v102_v4 = vand.u32 15, %v2177_v1  ;;  %s2186_s23 = sld [smem:[#allocation2 + $0x4]] }
  0x20   :  { %s2188_s24 = sld [smem:[#allocation2 + $0x5]] }
  0x21   :  { %4649 = sst [smem:[#allocation16_spill]] %s2173_s3  ;;  %v101_v5 = vshra.s32 %v99_v2, 4  ;;  %v103_v6 = vand.u32 15, %v99_v2  ;;  %vm104_vm0 = vcmp.ge.s32.totalorder %v100_v3, 1  ;;  %vm108_vm1 = vcmp.lt.s32.totalorder %v100_v3, 15 }
  0x22   :  { %4650 = sst [smem:[#allocation17_spill]] %s2175_s5  ;;  %v2192_v8 = vsel %vm104_vm0, 1.0, %v2110_v7  ;;  %v2194_v9 = vsel %vm108_vm1, 1.0, %v2110_v7  ;;  %vm112_vm2 = vcmp.ge.s32.totalorder %v102_v4, 1  ;;  %vm116_vm3 = vcmp.lt.s32.totalorder %v102_v4, 15 }
  0x23   :  { %4651 = sst [smem:[#allocation18_spill]] %s2179_s6  ;;  %4655 = vst [vmem:[#allocation22_spill] sm:$0xff] %v2192_v8  ;;  %vm105_vm4 = vcmp.ge.s32.totalorder %v101_v5, 1  ;;  %vm109_vm5 = vcmp.lt.s32.totalorder %v101_v5, 15  ;;  %vm113_vm6 = vcmp.ge.s32.totalorder %v103_v6, 1  ;;  %v2198_v10 = vsel %vm112_vm2, 1.0, %v2110_v7 }
  0x24   :  { %4652 = sst [smem:[#allocation19_spill]] %s2181_s22  ;;  %4656 = vst [vmem:[#allocation23_spill] sm:$0xff] %v2194_v9  ;;  %v2202_v11 = vsel %vm105_vm4, 1.0, %v2110_v7  ;;  %v2204_v12 = vsel %vm109_vm5, 1.0, %v2110_v7  ;;  %v2206_v13 = vsel %vm113_vm6, 1.0, %v2110_v7  ;;  %vm117_vm7 = vcmp.lt.s32.totalorder %v103_v6, 15 }
  0x25   :  { %4653 = sst [smem:[#allocation20_spill]] %s2186_s23  ;;  %4658 = vst [vmem:[#allocation25_spill] sm:$0xff] %v2202_v11  ;;  %v2210_v14 = vsel %vm116_vm3, 1.0, %v2110_v7  ;;  %v2212_v15 = vsel %vm117_vm7, 1.0, %v2110_v7 }
  0x26   :  { %s2190_s25 = sld [smem:[#allocation2 + $0x6]]  ;;  %4659 = vst [vmem:[#allocation26_spill] sm:$0xff] %v2204_v12 }
  0x27   :  { %s2196_s26 = sld [smem:[#allocation2 + $0x7]] }
  0x28   :  { %s2200_s27 = sld [smem:[#allocation2 + $0x8]] }
  0x29   :  { %s2208_s28 = sld [smem:[#allocation2 + $0x9]] }
  0x2a   :  { %s2214_s29 = sld [smem:[#allocation2 + $0xa]] }
  0x2b   :  { %s2216_s30 = sld [smem:[#allocation2 + $0xb]] }
  0x2c   :  { %4654 = sst [smem:[#allocation21_spill]] %s2190_s25 }
  0x2d   :  { %s2218_s8 = sld [smem:[#allocation2 + $0xc]] }
  0x2e   :  { %4657 = sst [smem:[#allocation24_spill]] %s2200_s27 }
  0x2f   :  { %s2220_s9 = sld [smem:[#allocation2 + $0xd]] }
  0x30   :  { %s2222_s10 = sld [smem:[#allocation2 + $0xe]] }
  0x31   :  { %4660 = sst [smem:[#allocation27_spill]] %s2216_s30 }
  0x32   :  { %s2224_s11 = sld [smem:[#allocation2 + $0xf]] }
  0x33   :  { %4661 = sst [smem:[#allocation28_spill]] %s2218_s8 }
  0x34   :  { %s2226_s12 = sld [smem:[#allocation2 + $0x10]] }
  0x35   :  { %4662 = sst [smem:[#allocation29_spill]] %s2220_s9 }
  0x36   :  { %4663 = sst [smem:[#allocation30_spill]] %s2222_s10 }
  0x37   :  { %s2228_s13 = sld [smem:[#allocation2 + $0x11]] }
  0x38   :  { %4664 = sst [smem:[#allocation31_spill]] %s2224_s11 }
  0x39   :  { %s2230_s2 = sld [smem:[#allocation2 + $0x12]] }
  0x3a   :  { %4665 = sst [smem:[#allocation32_spill]] %s2226_s12 }
  0x3b   :  { %s2232_s14 = sld [smem:[#allocation2 + $0x13]] }
  0x3c   :  { %s2234_s15 = sld [smem:[#allocation2 + $0x14]] }
  0x3d   :  { %4666 = sst [smem:[#allocation33_spill]] %s2228_s13 }
  0x3e   :  { %s2236_s4 = sld [smem:[#allocation2 + $0x15]] }
  0x3f   :  { %4667 = sst [smem:[#allocation34_spill]] %s2230_s2 }
  0x40   :  { %s2238_s16 = sld [smem:[#allocation2 + $0x16]] }
  0x41   :  { %4668 = sst [smem:[#allocation35_spill]] %s2232_s14 }
  0x42   :  { %4669 = sst [smem:[#allocation36_spill]] %s2234_s15 }
  0x43   :  { %s2240_s17 = sld [smem:[#allocation2 + $0x17]] }
  0x44   :  { %4670 = sst [smem:[#allocation37_spill]] %s2236_s4 }
  0x45   :  { %s2242_s18 = sld [smem:[#allocation2 + $0x18]] }
  0x46   :  { %4671 = sst [smem:[#allocation38_spill]] %s2238_s16 }
  0x47   :  { %s2244_s19 = sld [smem:[#allocation2 + $0x19]] }
  0x48   :  { %s2246_s20 = sld [smem:[#allocation2 + $0x1a]] }
  0x49   :  { %4672 = sst [smem:[#allocation39_spill]] %s2240_s17 }
  0x4a   :  { %s2248_s1 = sld [smem:[#allocation6]] }
  0x4b   :  { %4673 = sst [smem:[#allocation40_spill]] %s2242_s18 }
  0x4c   :  { %s2250_s21 = sld [smem:[#allocation6 + $0x1]] }
  0x4d   :  { %4674 = sst [smem:[#allocation41_spill]] %s2244_s19 }
  0x4e   :  { %4675 = sst [smem:[#allocation42_spill]] %s2246_s20 }
  0x4f   :  { %s2252_s7 = sld [smem:[#allocation6 + $0x2]] }
  0x50   :  { %4676 = sst [smem:[#allocation43_spill]] %s2248_s1 }
  0x51   :  { %s2254_s13 = sld [smem:[#allocation6 + $0x3]] }
  0x52   :  { %4677 = sst [smem:[#allocation44_spill]] %s2250_s21 }
  0x53   :  { %s2256_s27 = sld [smem:[#allocation6 + $0x4]] }
  0x54   :  { %s2258_s11 = sld [smem:[#allocation6 + $0x5]] }
  0x55   :  { %4678 = sst [smem:[#allocation45_spill]] %s2252_s7 }
  0x56   :  { %s2260_s25 = sld [smem:[#allocation6 + $0x6]] }
  0x57   :  { %4679 = sst [smem:[#allocation46_spill]] %s2254_s13 }
  0x58   :  { %s2262_s15 = sld [smem:[#allocation6 + $0x7]] }
  0x59   :  { %4680 = sst [smem:[#allocation47_spill]] %s2256_s27 }
  0x5a   :  { %4681 = sst [smem:[#allocation48_spill]] %s2258_s11 }
  0x5b   :  { %s2264_s18 = sld [smem:[#allocation6 + $0x8]] }
  0x5c   :  { %4682 = sst [smem:[#allocation49_spill]] %s2260_s25 }
  0x5d   :  { %s2266_s30 = sld [smem:[#allocation6 + $0x9]] }
  0x5e   :  { %4683 = sst [smem:[#allocation50_spill]] %s2262_s15 }
  0x5f   :  { %s2268_s20 = sld [smem:[#allocation6 + $0xa]] }
  0x60   :  { %s2270_s1 = sld [smem:[#allocation6 + $0xb]] }
  0x61   :  { %4684 = sst [smem:[#allocation51_spill]] %s2264_s18 }
  0x62   :  { %s2272_s21 = sld [smem:[#allocation6 + $0xc]] }
  0x63   :  { %4685 = sst [smem:[#allocation52_spill]] %s2266_s30 }
  0x64   :  { %s2274_s7 = sld [smem:[#allocation6 + $0xd]] }
  0x65   :  { %4686 = sst [smem:[#allocation53_spill]] %s2268_s20 }
  0x66   :  { %4687 = sst [smem:[#allocation54_spill]] %s2270_s1 }
  0x67   :  { %s2276_s13 = sld [smem:[#allocation6 + $0xe]] }
  0x68   :  { %4688 = sst [smem:[#allocation55_spill]] %s2272_s21 }
  0x69   :  { %s2278_s27 = sld [smem:[#allocation6 + $0xf]] }
  0x6a   :  { %4689 = sst [smem:[#allocation56_spill]] %s2274_s7 }
  0x6b   :  { %s2280_s11 = sld [smem:[#allocation6 + $0x10]] }
  0x6c   :  { %s2282_s25 = sld [smem:[#allocation6 + $0x11]] }
  0x6d   :  { %4690 = sst [smem:[#allocation57_spill]] %s2276_s13 }
  0x6e   :  { %s2284_s15 = sld [smem:[#allocation6 + $0x12]] }
  0x6f   :  { %4691 = sst [smem:[#allocation58_spill]] %s2278_s27 }
  0x70   :  { %s2286_s18 = sld [smem:[#allocation6 + $0x13]] }
  0x71   :  { %4692 = sst [smem:[#allocation59_spill]] %s2280_s11 }
  0x72   :  { %4693 = sst [smem:[#allocation60_spill]] %s2282_s25 }
  0x73   :  { %s2288_s30 = sld [smem:[#allocation6 + $0x14]] }
  0x74   :  { %4694 = sst [smem:[#allocation61_spill]] %s2284_s15 }
  0x75   :  { %s2290_s20 = sld [smem:[#allocation6 + $0x15]] }
  0x76   :  { %4695 = sst [smem:[#allocation62_spill]] %s2286_s18 }
  0x77   :  { %s2292_s1 = sld [smem:[#allocation6 + $0x16]] }
  0x78   :  { %s2294_s21 = sld [smem:[#allocation6 + $0x17]] }
  0x79   :  { %4696 = sst [smem:[#allocation63_spill]] %s2288_s30 }
  0x7a   :  { %s2296_s7 = sld [smem:[#allocation6 + $0x18]] }
  0x7b   :  { %4697 = sst [smem:[#allocation64_spill]] %s2290_s20 }
  0x7c   :  { %s2298_s13 = sld [smem:[#allocation6 + $0x19]] }
  0x7d   :  { %4698 = sst [smem:[#allocation65_spill]] %s2292_s1 }
  0x7e   :  { %4699 = sst [smem:[#allocation66_spill]] %s2294_s21 }
  0x7f   :  { %s2300_s27 = sld [smem:[#allocation6 + $0x1a]] }
  0x80   :  { %4700 = sst [smem:[#allocation67_spill]] %s2296_s7 }
  0x81   :  { %s2302_s11 = sld [smem:[#allocation6 + $0x1b]] }
  0x82   :  { %4701 = sst [smem:[#allocation68_spill]] %s2298_s13 }
  0x83   :  { %s2304_s25 = sld [smem:[#allocation6 + $0x1c]] }
  0x84   :  { %s2306_s15 = sld [smem:[#allocation6 + $0x1d]] }
  0x85   :  { %4702 = sst [smem:[#allocation69_spill]] %s2300_s27 }
  0x86   :  { %s2308_s18 = sld [smem:[#allocation6 + $0x1e]] }
  0x87   :  { %4703 = sst [smem:[#allocation70_spill]] %s2302_s11 }
  0x88   :  { %s2310_s30 = sld [smem:[#allocation6 + $0x1f]] }
  0x89   :  { %4704 = sst [smem:[#allocation71_spill]] %s2304_s25 }
  0x8a   :  { %4705 = sst [smem:[#allocation72_spill]] %s2306_s15 }
  0x8b   :  { %s2312_s20 = sld [smem:[#allocation6 + $0x20]] }
  0x8c   :  { %4706 = sst [smem:[#allocation73_spill]] %s2308_s18 }
  0x8d   :  { %s2314_s1 = sld [smem:[#allocation6 + $0x21]] }
  0x8e   :  { %4707 = sst [smem:[#allocation74_spill]] %s2310_s30 }
  0x8f   :  { %s2316_s21 = sld [smem:[#allocation6 + $0x22]] }
  0x90   :  { %s2318_s7 = sld [smem:[#allocation6 + $0x23]] }
  0x91   :  { %4708 = sst [smem:[#allocation75_spill]] %s2312_s20 }
  0x92   :  { %s2320_s13 = sld [smem:[#allocation6 + $0x24]] }
  0x93   :  { %4709 = sst [smem:[#allocation76_spill]] %s2314_s1 }
  0x94   :  { %s2322_s27 = sld [smem:[#allocation6 + $0x25]] }
  0x95   :  { %4710 = sst [smem:[#allocation77_spill]] %s2316_s21 }
  0x96   :  { %4711 = sst [smem:[#allocation78_spill]] %s2318_s7 }
  0x97   :  { %s2324_s11 = sld [smem:[#allocation6 + $0x26]] }
  0x98   :  { %4712 = sst [smem:[#allocation79_spill]] %s2320_s13 }
  0x99   :  { %s2326_s25 = sld [smem:[#allocation6 + $0x27]] }
  0x9a   :  { %4713 = sst [smem:[#allocation80_spill]] %s2322_s27 }
  0x9b   :  { %s2328_s15 = sld [smem:[#allocation6 + $0x28]] }
  0x9c   :  { %s2330_s18 = sld [smem:[#allocation6 + $0x29]] }
  0x9d   :  { %4714 = sst [smem:[#allocation81_spill]] %s2324_s11 }
  0x9e   :  { %s2332_s30 = sld [smem:[#allocation6 + $0x2a]] }
  0x9f   :  { %4715 = sst [smem:[#allocation82_spill]] %s2326_s25 }
  0xa0   :  { %s2334_s20 = sld [smem:[#allocation6 + $0x2b]] }
  0xa1   :  { %4716 = sst [smem:[#allocation83_spill]] %s2328_s15 }
  0xa2   :  { %4717 = sst [smem:[#allocation84_spill]] %s2330_s18 }
  0xa3   :  { %s2336_s1 = sld [smem:[#allocation6 + $0x2c]] }
  0xa4   :  { %4718 = sst [smem:[#allocation85_spill]] %s2332_s30 }
  0xa5   :  { %s2338_s21 = sld [smem:[#allocation6 + $0x2d]] }
  0xa6   :  { %4719 = sst [smem:[#allocation86_spill]] %s2334_s20 }
  0xa7   :  { %s2340_s7 = sld [smem:[#allocation6 + $0x2e]] }
  0xa8   :  { %s2342_s13 = sld [smem:[#allocation6 + $0x2f]] }
  0xa9   :  { %4720 = sst [smem:[#allocation87_spill]] %s2336_s1 }
  0xaa   :  { %s2344_s27 = sld [smem:[#allocation6 + $0x30]] }
  0xab   :  { %4721 = sst [smem:[#allocation88_spill]] %s2338_s21 }
  0xac   :  { %s2346_s11 = sld [smem:[#allocation6 + $0x31]] }
  0xad   :  { %4722 = sst [smem:[#allocation89_spill]] %s2340_s7 }
  0xae   :  { %4723 = sst [smem:[#allocation90_spill]] %s2342_s13 }
  0xaf   :  { %s2348_s25 = sld [smem:[#allocation6 + $0x32]] }
  0xb0   :  { %4724 = sst [smem:[#allocation91_spill]] %s2344_s27 }
  0xb1   :  { %s2350_s15 = sld [smem:[#allocation6 + $0x33]] }
  0xb2   :  { %4725 = sst [smem:[#allocation92_spill]] %s2346_s11 }
  0xb3   :  { %s2352_s18 = sld [smem:[#allocation6 + $0x34]] }
  0xb4   :  { %s2354_s30 = sld [smem:[#allocation6 + $0x35]] }
  0xb5   :  { %4726 = sst [smem:[#allocation93_spill]] %s2348_s25 }
  0xb6   :  { %s2356_s20 = sld [smem:[#allocation6 + $0x36]] }
  0xb7   :  { %4727 = sst [smem:[#allocation94_spill]] %s2350_s15 }
  0xb8   :  { %s2358_s1 = sld [smem:[#allocation6 + $0x37]] }
  0xb9   :  { %4728 = sst [smem:[#allocation95_spill]] %s2352_s18 }
  0xba   :  { %4729 = sst [smem:[#allocation96_spill]] %s2354_s30 }
  0xbb   :  { %s2360_s21 = sld [smem:[#allocation6 + $0x38]] }
  0xbc   :  { %4730 = sst [smem:[#allocation97_spill]] %s2356_s20 }
  0xbd   :  { %s2362_s7 = sld [smem:[#allocation6 + $0x39]] }
  0xbe   :  { %4731 = sst [smem:[#allocation98_spill]] %s2358_s1 }
  0xbf   :  { %s2364_s13 = sld [smem:[#allocation6 + $0x3a]] }
  0xc0   :  { %s2366_s27 = sld [smem:[#allocation6 + $0x3b]] }
  0xc1   :  { %4732 = sst [smem:[#allocation99_spill]] %s2360_s21 }
  0xc2   :  { %s2368_s11 = sld [smem:[#allocation6 + $0x3c]] }
  0xc3   :  { %4733 = sst [smem:[#allocation100_spill]] %s2362_s7 }
  0xc4   :  { %s2370_s25 = sld [smem:[#allocation6 + $0x3d]] }
  0xc5   :  { %4734 = sst [smem:[#allocation101_spill]] %s2364_s13 }
  0xc6   :  { %4735 = sst [smem:[#allocation102_spill]] %s2366_s27 }
  0xc7   :  { %s2372_s15 = sld [smem:[#allocation6 + $0x3e]] }
  0xc8   :  { %4736 = sst [smem:[#allocation103_spill]] %s2368_s11 }
  0xc9   :  { %s2374_s18 = sld [smem:[#allocation6 + $0x3f]] }
  0xca   :  { %4737 = sst [smem:[#allocation104_spill]] %s2370_s25 }
  0xcb   :  { %s2376_s30 = sld [smem:[#allocation6 + $0x40]] }
  0xcc   :  { %s2378_s20 = sld [smem:[#allocation6 + $0x41]] }
  0xcd   :  { %4738 = sst [smem:[#allocation105_spill]] %s2372_s15 }
  0xce   :  { %s2380_s1 = sld [smem:[#allocation6 + $0x42]] }
  0xcf   :  { %4739 = sst [smem:[#allocation106_spill]] %s2374_s18 }
  0xd0   :  { %s2382_s21 = sld [smem:[#allocation6 + $0x43]] }
  0xd1   :  { %4740 = sst [smem:[#allocation107_spill]] %s2376_s30 }
  0xd2   :  { %4741 = sst [smem:[#allocation108_spill]] %s2378_s20 }
  0xd3   :  { %s2384_s7 = sld [smem:[#allocation6 + $0x44]] }
  0xd4   :  { %4742 = sst [smem:[#allocation109_spill]] %s2380_s1 }
  0xd5   :  { %s2386_s13 = sld [smem:[#allocation6 + $0x45]] }
  0xd6   :  { %4743 = sst [smem:[#allocation110_spill]] %s2382_s21 }
  0xd7   :  { %s2388_s27 = sld [smem:[#allocation6 + $0x46]] }
  0xd8   :  { %s2390_s11 = sld [smem:[#allocation6 + $0x47]] }
  0xd9   :  { %4744 = sst [smem:[#allocation111_spill]] %s2384_s7 }
  0xda   :  { %s2392_s25 = sld [smem:[#allocation6 + $0x48]] }
  0xdb   :  { %4745 = sst [smem:[#allocation112_spill]] %s2386_s13 }
  0xdc   :  { %s2394_s15 = sld [smem:[#allocation6 + $0x49]] }
  0xdd   :  { %4746 = sst [smem:[#allocation113_spill]] %s2388_s27 }
  0xde   :  { %4747 = sst [smem:[#allocation114_spill]] %s2390_s11 }
  0xdf   :  { %s2396_s18 = sld [smem:[#allocation6 + $0x4a]] }
  0xe0   :  { %4748 = sst [smem:[#allocation115_spill]] %s2392_s25 }
  0xe1   :  { %s2398_s30 = sld [smem:[#allocation6 + $0x4b]] }
  0xe2   :  { %4749 = sst [smem:[#allocation116_spill]] %s2394_s15 }
  0xe3   :  { %s2400_s20 = sld [smem:[#allocation6 + $0x4c]] }
  0xe4   :  { %s2402_s1 = sld [smem:[#allocation6 + $0x4d]] }
  0xe5   :  { %4750 = sst [smem:[#allocation117_spill]] %s2396_s18 }
  0xe6   :  { %s2404_s21 = sld [smem:[#allocation6 + $0x4e]] }
  0xe7   :  { %4751 = sst [smem:[#allocation118_spill]] %s2398_s30 }
  0xe8   :  { %s2406_s7 = sld [smem:[#allocation6 + $0x4f]] }
  0xe9   :  { %4752 = sst [smem:[#allocation119_spill]] %s2400_s20 }
  0xea   :  { %4753 = sst [smem:[#allocation120_spill]] %s2402_s1 }
  0xeb   :  { %s2408_s13 = sld [smem:[#allocation6 + $0x50]] }
  0xec   :  { %4754 = sst [smem:[#allocation121_spill]] %s2404_s21 }
  0xed   :  { %s2410_s27 = sld [smem:[#allocation9]] }
  0xee   :  { %4755 = sst [smem:[#allocation122_spill]] %s2406_s7 }
  0xef   :  { %s2412_s11 = sld [smem:[#allocation9 + $0x1]] }
  0xf0   :  { %s2414_s25 = sld [smem:[#allocation9 + $0x2]] }
  0xf1   :  { %4756 = sst [smem:[#allocation123_spill]] %s2408_s13 }
  0xf2   :  { %s2416_s15 = sld [smem:[#allocation9 + $0x3]] }
  0xf3   :  { %4757 = sst [smem:[#allocation124_spill]] %s2410_s27 }
  0xf4   :  { %s2418_s18 = sld [smem:[#allocation9 + $0x4]] }
  0xf5   :  { %4758 = sst [smem:[#allocation125_spill]] %s2412_s11 }
  0xf6   :  { %4759 = sst [smem:[#allocation126_spill]] %s2414_s25 }
  0xf7   :  { %s2420_s30 = sld [smem:[#allocation9 + $0x5]] }
  0xf8   :  { %4760 = sst [smem:[#allocation127_spill]] %s2416_s15 }
  0xf9   :  { %s2422_s20 = sld [smem:[#allocation9 + $0x6]] }
  0xfa   :  { %4761 = sst [smem:[#allocation128_spill]] %s2418_s18 }
  0xfb   :  { %s2424_s1 = sld [smem:[#allocation9 + $0x7]] }
  0xfc   :  { %s2426_s21 = sld [smem:[#allocation9 + $0x8]] }
  0xfd   :  { %4762 = sst [smem:[#allocation129_spill]] %s2420_s30 }
  0xfe   :  { %s2428_s7 = sld [smem:[#allocation9 + $0x9]] }
  0xff   :  { %4763 = sst [smem:[#allocation130_spill]] %s2422_s20 }
 0x100   :  { %s2430_s13 = sld [smem:[#allocation9 + $0xa]] }
 0x101   :  { %4764 = sst [smem:[#allocation131_spill]] %s2424_s1 }
 0x102   :  { %4765 = sst [smem:[#allocation132_spill]] %s2426_s21 }
 0x103   :  { %s2432_s27 = sld [smem:[#allocation9 + $0xb]] }
 0x104   :  { %4766 = sst [smem:[#allocation133_spill]] %s2428_s7 }
 0x105   :  { %s2434_s11 = sld [smem:[#allocation9 + $0xc]] }
 0x106   :  { %4767 = sst [smem:[#allocation134_spill]] %s2430_s13 }
 0x107   :  { %s2436_s25 = sld [smem:[#allocation9 + $0xd]] }
 0x108   :  { %s2438_s15 = sld [smem:[#allocation9 + $0xe]] }
 0x109   :  { %4768 = sst [smem:[#allocation135_spill]] %s2432_s27 }
 0x10a   :  { %s2440_s18 = sld [smem:[#allocation9 + $0xf]] }
 0x10b   :  { %4769 = sst [smem:[#allocation136_spill]] %s2434_s11 }
 0x10c   :  { %s2442_s30 = sld [smem:[#allocation9 + $0x10]] }
 0x10d   :  { %4770 = sst [smem:[#allocation137_spill]] %s2436_s25 }
 0x10e   :  { %4771 = sst [smem:[#allocation138_spill]] %s2438_s15 }
 0x10f   :  { %s2444_s20 = sld [smem:[#allocation9 + $0x11]] }
 0x110   :  { %4772 = sst [smem:[#allocation139_spill]] %s2440_s18 }
 0x111   :  { %s2446_s1 = sld [smem:[#allocation9 + $0x12]] }
 0x112   :  { %4773 = sst [smem:[#allocation140_spill]] %s2442_s30 }
 0x113   :  { %s2448_s21 = sld [smem:[#allocation9 + $0x13]] }
 0x114   :  { %s2450_s7 = sld [smem:[#allocation9 + $0x14]] }
 0x115   :  { %4774 = sst [smem:[#allocation141_spill]] %s2444_s20 }
 0x116   :  { %s2452_s13 = sld [smem:[#allocation9 + $0x15]] }
 0x117   :  { %4775 = sst [smem:[#allocation142_spill]] %s2446_s1 }
 0x118   :  { %s2454_s27 = sld [smem:[#allocation9 + $0x16]] }
 0x119   :  { %4776 = sst [smem:[#allocation143_spill]] %s2448_s21 }
 0x11a   :  { %4777 = sst [smem:[#allocation144_spill]] %s2450_s7 }
 0x11b   :  { %s2456_s11 = sld [smem:[#allocation9 + $0x17]] }
 0x11c   :  { %4778 = sst [smem:[#allocation145_spill]] %s2452_s13 }
 0x11d   :  { %s2458_s25 = sld [smem:[#allocation9 + $0x18]] }
 0x11e   :  { %4779 = sst [smem:[#allocation146_spill]] %s2454_s27 }
 0x11f   :  { %s2460_s15 = sld [smem:[#allocation9 + $0x19]] }
 0x120   :  { %s2462_s18 = sld [smem:[#allocation9 + $0x1a]] }
 0x121   :  { %4780 = sst [smem:[#allocation147_spill]] %s2456_s11 }
 0x122   :  { %s2464_s30 = sld [smem:[#allocation9 + $0x1b]] }
 0x123   :  { %4781 = sst [smem:[#allocation148_spill]] %s2458_s25 }
 0x124   :  { %s2466_s20 = sld [smem:[#allocation9 + $0x1c]] }
 0x125   :  { %4782 = sst [smem:[#allocation149_spill]] %s2460_s15 }
 0x126   :  { %4783 = sst [smem:[#allocation150_spill]] %s2462_s18 }
 0x127   :  { %s2468_s1 = sld [smem:[#allocation9 + $0x1d]] }
 0x128   :  { %4784 = sst [smem:[#allocation151_spill]] %s2464_s30 }
 0x129   :  { %s2470_s21 = sld [smem:[#allocation9 + $0x1e]] }
 0x12a   :  { %4785 = sst [smem:[#allocation152_spill]] %s2466_s20 }
 0x12b   :  { %s2472_s7 = sld [smem:[#allocation9 + $0x1f]] }
 0x12c   :  { %s2474_s13 = sld [smem:[#allocation9 + $0x20]] }
 0x12d   :  { %4786 = sst [smem:[#allocation153_spill]] %s2468_s1 }
 0x12e   :  { %s2476_s27 = sld [smem:[#allocation9 + $0x21]] }
 0x12f   :  { %4787 = sst [smem:[#allocation154_spill]] %s2470_s21 }
 0x130   :  { %s2478_s11 = sld [smem:[#allocation9 + $0x22]] }
 0x131   :  { %4788 = sst [smem:[#allocation155_spill]] %s2472_s7 }
 0x132   :  { %4789 = sst [smem:[#allocation156_spill]] %s2474_s13 }
 0x133   :  { %s2480_s25 = sld [smem:[#allocation9 + $0x23]] }
 0x134   :  { %4790 = sst [smem:[#allocation157_spill]] %s2476_s27 }
 0x135   :  { %s2482_s15 = sld [smem:[#allocation9 + $0x24]] }
 0x136   :  { %4791 = sst [smem:[#allocation158_spill]] %s2478_s11 }
 0x137   :  { %s2484_s18 = sld [smem:[#allocation9 + $0x25]] }
 0x138   :  { %s2486_s30 = sld [smem:[#allocation9 + $0x26]] }
 0x139   :  { %4792 = sst [smem:[#allocation159_spill]] %s2480_s25 }
 0x13a   :  { %s2488_s20 = sld [smem:[#allocation9 + $0x27]] }
 0x13b   :  { %4793 = sst [smem:[#allocation160_spill]] %s2482_s15 }
 0x13c   :  { %s2490_s1 = sld [smem:[#allocation9 + $0x28]] }
 0x13d   :  { %4794 = sst [smem:[#allocation161_spill]] %s2484_s18 }
 0x13e   :  { %4795 = sst [smem:[#allocation162_spill]] %s2486_s30 }
 0x13f   :  { %s2492_s21 = sld [smem:[#allocation9 + $0x29]] }
 0x140   :  { %4796 = sst [smem:[#allocation163_spill]] %s2488_s20 }
 0x141   :  { %s2494_s7 = sld [smem:[#allocation9 + $0x2a]] }
 0x142   :  { %4797 = sst [smem:[#allocation164_spill]] %s2490_s1 }
 0x143   :  { %s2496_s13 = sld [smem:[#allocation9 + $0x2b]] }
 0x144   :  { %s2498_s27 = sld [smem:[#allocation9 + $0x2c]] }
 0x145   :  { %4798 = sst [smem:[#allocation165_spill]] %s2492_s21 }
 0x146   :  { %s2500_s11 = sld [smem:[#allocation9 + $0x2d]] }
 0x147   :  { %4799 = sst [smem:[#allocation166_spill]] %s2494_s7 }
 0x148   :  { %s2502_s25 = sld [smem:[#allocation9 + $0x2e]] }
 0x149   :  { %4800 = sst [smem:[#allocation167_spill]] %s2496_s13 }
 0x14a   :  { %4801 = sst [smem:[#allocation168_spill]] %s2498_s27 }
 0x14b   :  { %s2504_s15 = sld [smem:[#allocation9 + $0x2f]] }
 0x14c   :  { %4802 = sst [smem:[#allocation169_spill]] %s2500_s11 }
 0x14d   :  { %s2506_s18 = sld [smem:[#allocation9 + $0x30]] }
 0x14e   :  { %4803 = sst [smem:[#allocation170_spill]] %s2502_s25 }
 0x14f   :  { %s2508_s30 = sld [smem:[#allocation9 + $0x31]] }
 0x150   :  { %s2510_s20 = sld [smem:[#allocation9 + $0x32]] }
 0x151   :  { %4804 = sst [smem:[#allocation171_spill]] %s2504_s15 }
 0x152   :  { %s2512_s1 = sld [smem:[#allocation9 + $0x33]] }
 0x153   :  { %4805 = sst [smem:[#allocation172_spill]] %s2506_s18 }
 0x154   :  { %s2514_s21 = sld [smem:[#allocation9 + $0x34]] }
 0x155   :  { %4806 = sst [smem:[#allocation173_spill]] %s2508_s30 }
 0x156   :  { %4807 = sst [smem:[#allocation174_spill]] %s2510_s20 }
 0x157   :  { %s2516_s7 = sld [smem:[#allocation9 + $0x35]] }
 0x158   :  { %4808 = sst [smem:[#allocation175_spill]] %s2512_s1 }
 0x159   :  { %s2518_s13 = sld [smem:[#allocation9 + $0x36]] }
 0x15a   :  { %4809 = sst [smem:[#allocation176_spill]] %s2514_s21 }
 0x15b   :  { %s2520_s27 = sld [smem:[#allocation9 + $0x37]] }
 0x15c   :  { %s2522_s11 = sld [smem:[#allocation9 + $0x38]] }
 0x15d   :  { %4810 = sst [smem:[#allocation177_spill]] %s2516_s7 }
 0x15e   :  { %s2524_s25 = sld [smem:[#allocation9 + $0x39]] }
 0x15f   :  { %4811 = sst [smem:[#allocation178_spill]] %s2518_s13 }
 0x160   :  { %s2526_s15 = sld [smem:[#allocation9 + $0x3a]] }
 0x161   :  { %4812 = sst [smem:[#allocation179_spill]] %s2520_s27 }
 0x162   :  { %4813 = sst [smem:[#allocation180_spill]] %s2522_s11 }
 0x163   :  { %s2528_s18 = sld [smem:[#allocation9 + $0x3b]] }
 0x164   :  { %4814 = sst [smem:[#allocation181_spill]] %s2524_s25 }
 0x165   :  { %s2530_s30 = sld [smem:[#allocation9 + $0x3c]] }
 0x166   :  { %4815 = sst [smem:[#allocation182_spill]] %s2526_s15 }
 0x167   :  { %s2532_s20 = sld [smem:[#allocation9 + $0x3d]] }
 0x168   :  { %s2534_s1 = sld [smem:[#allocation9 + $0x3e]] }
 0x169   :  { %4816 = sst [smem:[#allocation183_spill]] %s2528_s18 }
 0x16a   :  { %s2536_s21 = sld [smem:[#allocation9 + $0x3f]] }
 0x16b   :  { %4817 = sst [smem:[#allocation184_spill]] %s2530_s30 }
 0x16c   :  { %s2538_s7 = sld [smem:[#allocation9 + $0x40]] }
 0x16d   :  { %4818 = sst [smem:[#allocation185_spill]] %s2532_s20 }
 0x16e   :  { %4819 = sst [smem:[#allocation186_spill]] %s2534_s1 }
 0x16f   :  { %s2540_s13 = sld [smem:[#allocation9 + $0x41]] }
 0x170   :  { %4820 = sst [smem:[#allocation187_spill]] %s2536_s21 }
 0x171   :  { %s2542_s27 = sld [smem:[#allocation9 + $0x42]] }
 0x172   :  { %4821 = sst [smem:[#allocation188_spill]] %s2538_s7 }
 0x173   :  { %s2544_s11 = sld [smem:[#allocation9 + $0x43]] }
 0x174   :  { %s2546_s25 = sld [smem:[#allocation9 + $0x44]] }
 0x175   :  { %4822 = sst [smem:[#allocation189_spill]] %s2540_s13 }
 0x176   :  { %s2548_s15 = sld [smem:[#allocation9 + $0x45]] }
 0x177   :  { %4823 = sst [smem:[#allocation190_spill]] %s2542_s27 }
 0x178   :  { %s2550_s18 = sld [smem:[#allocation9 + $0x46]] }
 0x179   :  { %4824 = sst [smem:[#allocation191_spill]] %s2544_s11 }
 0x17a   :  { %4825 = sst [smem:[#allocation192_spill]] %s2546_s25 }
 0x17b   :  { %s2552_s30 = sld [smem:[#allocation9 + $0x47]] }
 0x17c   :  { %4826 = sst [smem:[#allocation193_spill]] %s2548_s15 }
 0x17d   :  { %s2554_s20 = sld [smem:[#allocation9 + $0x48]] }
 0x17e   :  { %4827 = sst [smem:[#allocation194_spill]] %s2550_s18 }
 0x17f   :  { %s2556_s1 = sld [smem:[#allocation9 + $0x49]] }
 0x180   :  { %s2558_s21 = sld [smem:[#allocation9 + $0x4a]] }
 0x181   :  { %4828 = sst [smem:[#allocation195_spill]] %s2552_s30 }
 0x182   :  { %s2560_s7 = sld [smem:[#allocation9 + $0x4b]] }
 0x183   :  { %4829 = sst [smem:[#allocation196_spill]] %s2554_s20 }
 0x184   :  { %s2562_s13 = sld [smem:[#allocation9 + $0x4c]] }
 0x185   :  { %4830 = sst [smem:[#allocation197_spill]] %s2556_s1 }
 0x186   :  { %4831 = sst [smem:[#allocation198_spill]] %s2558_s21 }
 0x187   :  { %s2564_s27 = sld [smem:[#allocation9 + $0x4d]] }
 0x188   :  { %4832 = sst [smem:[#allocation199_spill]] %s2560_s7 }
 0x189   :  { %s2566_s11 = sld [smem:[#allocation9 + $0x4e]] }
 0x18a   :  { %4833 = sst [smem:[#allocation200_spill]] %s2562_s13 }
 0x18b   :  { %s2568_s25 = sld [smem:[#allocation9 + $0x4f]] }
 0x18c   :  { %s2570_s15 = sld [smem:[#allocation9 + $0x50]] }
 0x18d   :  { %4834 = sst [smem:[#allocation201_spill]] %s2564_s27 }
 0x18e   :  { %s2572_s18 = sld [smem:[#allocation4]] }
 0x18f   :  { %4835 = sst [smem:[#allocation202_spill]] %s2566_s11 }
 0x190   :  { %s2574_s30 = sld [smem:[#allocation4 + $0x1]] }
 0x191   :  { %4836 = sst [smem:[#allocation203_spill]] %s2568_s25  ;;  %s2590_s25 = smov 0  }
 0x192   :  { %4837 = sst [smem:[#allocation204_spill]] %s2570_s15 }
 0x193   :  { %s2576_s20 = sld [smem:[#allocation4 + $0x2]] }
 0x194   :  { %4838 = sst [smem:[#allocation205_spill]] %s2572_s18 }
 0x195   :  { %s2578_s1 = sld [smem:[#allocation7]] }
 0x196   :  { %s2580_s21 = sld [smem:[#allocation7 + $0x1]] }
 0x197   :  { %s2582_s7 = sld [smem:[#allocation7 + $0x2]] }
 0x198   :  { %s2584_s13 = sld [smem:[#allocation10]] }
 0x199   :  { %4839 = sst [smem:[#allocation206_spill]] %s2576_s20 }
 0x19a   :  { %s2586_s27 = sld [smem:[#allocation10 + $0x1]] }
 0x19b   :  { %4840 = sst [smem:[#allocation207_spill]] %s2578_s1 }
 0x19c   :  { %4841 = sst [smem:[#allocation208_spill]] %s2580_s21 }
 0x19d   :  { %4842 = sst [smem:[#allocation209_spill]] %s2582_s7 }
 0x19e   :  { %4843 = sst [smem:[#allocation210_spill]] %s2584_s13 }
 0x19f   :  { %s2588_s11 = sld [smem:[#allocation10 + $0x2]] }
 0x1a0   :  { %4844 = sst [smem:[#allocation211_spill]] %s2586_s27 }
 0x1a5   :  { %4845 = sst [smem:[#allocation212_spill]] %s2588_s11 }
 0x1a6 LB: > { %v4846_v8 = vld [vmem:[#allocation22_spill] sm:$0xff]  ;;  %s4847_s19 = sld [smem:[#allocation41_spill]]  ;;  %s1981_s15 = sshll.u32 %s2102_s25, 3  ;;  %vm336_vm8 = vcmp.lt.s32.totalorder %v2177_v1, 16  ;;  %v4849_v11 = vld [vmem:[#allocation25_spill] sm:$0xff]  ;;  %vm463_vm9 = vcmp.lt.s32.totalorder %v2177_v1, 112  ;;  %v364_v34 = vstv %s2214_s29  ;;  %v491_v39 = vstv %s2196_s26  ;;  %s2102_s25 = sphi %s2590_s25, %s323_s25  }
 0x1a7   : > { %s2596_s1 = sshra.s32 %s1981_s15, 3  ;;  %s4848_s0 = sld [smem:[#allocation266_spill]]  ;;  %v4852_v9 = vld [vmem:[#allocation23_spill] sm:$0xff]  ;;  %v4853_v12 = vld [vmem:[#allocation26_spill] sm:$0xff]  ;;  %vm345_vm10 = vcmp.lt.s32.totalorder %v2177_v1, 1  ;;  %v353_v62 = vstv %s2208_s28  ;;  %vm378_vm11 = vcmp.lt.s32.totalorder %v2177_v1, 127 }
 0x1a8   : > { %s4570_s7 = sshll.u32 %s2596_s1, 4  ;;  %s4581_s11 = smov 112  }
 0x1a9   : > { %s4579_s20 = smov 16   ;;  %s4573_s15 = smov 1  }
 0x1aa   : > { %s4571_s13 = smov 127   ;;  %s4850_s5 = sld [smem:[#allocation17_spill]] }
 0x1ab   : > { %s4851_s14 = sld [smem:[#allocation35_spill]]  ;;  %s323_s25 = sadd.s32 1, %s2102_s25  }
 0x1ac   : > { %s4854_s12 = sld [smem:[#allocation32_spill]]  ;;  %v4575_v43 = vstv %s4847_s19  ;;  %p320_p0 = scmp.ge.s32.totalorder %s323_s25, 2  }
 0x1ad   : > { %s329_s27 = scalar_lea.vmem %s4848_s0, %s4570_s7  ;;  %s4855_s22 = sld [smem:[#allocation19_spill]] }
 0x1ae   : > { %v2604_v16 = vld [vmem:[%s329_s27] sm:$0xff]  ;;  %v2612_v17 = vld [vmem:[%s329_s27 + $0x8] sm:$0xff]  ;;  %s4856_s8 = sld [smem:[#allocation28_spill]] }
 0x1af   : > { %459 = vrot.lane.b32.xlu1 %v2604_v16, %s4581_s11  ;;  %332 = vrot.lane.b32.xlu0 %v2604_v16, %s4579_s20  ;;  %s4857_s4 = sld [smem:[#allocation37_spill]] }
 0x1b0   : > { %398 = vrot.lane.b32.xlu2 %v2604_v16, %s4573_s15  ;;  %v359_v33 = vstv %s4850_s5  ;;  %s4858_s3 = sld [smem:[#allocation16_spill]] }
 0x1b1   : > { %v369_v35 = vstv %s4851_s14  ;;  %s4859_s2 = sld [smem:[#allocation34_spill]] }
 0x1b2   : > { %v496_v42 = vstv %s4854_s12  ;;  %s4860_s23 = sld [smem:[#allocation20_spill]] }
 0x1b3   : > { %v406_v49 = vstv %s4855_s22  ;;  %s4861_s9 = sld [smem:[#allocation29_spill]] }
 0x1b4   : > { %v411_v52 = vstv %s4856_s8  ;;  %s4862_s16 = sld [smem:[#allocation38_spill]] }
 0x1b5   : > { %v416_v53 = vstv %s4857_s4  ;;  %s4863_s10 = sld [smem:[#allocation30_spill]] }
 0x1b6   : > { %v350_v61 = vstv %s4858_s3  ;;  %s4864_s17 = sld [smem:[#allocation39_spill]] }
 0x1b7   : > { %461 = vrot.lane.b32.xlu1 %v2612_v17, %s4581_s11  ;;  %334 = vrot.lane.b32.xlu0 %v2612_v17, %s4579_s20  ;;  %v356_v63 = vstv %s4859_s2  ;;  %s4865_s6 = sld [smem:[#allocation18_spill]] }
 0x1b8   : > { %s4866_s27 = sld [smem:[#allocation27_spill]] }
 0x1b9   : > { %s4867_s21 = sld [smem:[#allocation36_spill]] }
 0x1ba   : > { %s4868_s7 = sld [smem:[#allocation21_spill]] }
 0x1bb   : > { %s4874_s18 = sld [smem:[#allocation205_spill]] }
 0x1bc   : > { %s4894_s0 = sld [smem:[#allocation110_spill]] }
 0x1bd   : > { %s4895_s2 = sld [smem:[#allocation65_spill]] }
 0x1be   : > { %s4896_s3 = sld [smem:[#allocation92_spill]] }
 0x1bf   : > { %400 = vrot.lane.b32.xlu0 %v2612_v17, %s4573_s15  ;;  %436 = vrot.lane.b32.xlu1 %v2604_v16, %s4571_s13  ;;  %s4897_s4 = sld [smem:[#allocation119_spill]] }
 0x1c0   : > { %s4915_s5 = sld [smem:[#allocation53_spill]] }
 0x1c1   : > { %s4919_s8 = sld [smem:[#allocation107_spill]] }
 0x1c2   : > { %s4925_s12 = sld [smem:[#allocation100_spill]] }
 0x1c3   : > { %s4926_s14 = sld [smem:[#allocation59_spill]] }
 0x1c4   : > { %s4931_s22 = sld [smem:[#allocation109_spill]] }
 0x20a   : > { %v399_v30 = vpop.permute.xlu2 %398 }
 0x221   : > { %v333_v18 = vpop.permute.xlu0 %332  ;;  %v460_v19 = vpop.permute.xlu1 %459 }
 0x229   : > { %v335_v20 = vpop.permute.xlu0 %334  ;;  %v462_v25 = vpop.permute.xlu1 %461 }
 0x22a   : > { %v337_v21 = vsel %vm336_vm8, %v333_v18, %v335_v20  ;;  %v338_v22 = vsel %vm336_vm8, %v335_v20, %v333_v18  ;;  %v464_v26 = vsel %vm463_vm9, %v460_v19, %v462_v25  ;;  %v465_v27 = vsel %vm463_vm9, %v462_v25, %v460_v19 }
 0x22b   : > { %v339_v23 = vmul.f32 %v338_v22, %v4846_v8  ;;  %v340_v24 = vmul.f32 %v337_v21, %v4849_v11  ;;  %v466_v28 = vmul.f32 %v464_v26, %v4852_v9  ;;  %v2639_v29 = vmul.f32 %v465_v27, %v4853_v12 }
 0x22c   : > { %v421_v18 = vstv %s4860_s23  ;;  %v444_v20 = vstv %s2188_s24  ;;  %v426_v21 = vstv %s4861_s9  ;;  %v431_v22 = vstv %s4862_s16  ;;  %s4921_s9 = sld [smem:[#allocation46_spill]] }
 0x22d   : > { %374 = vrot.lane.b32.xlu0 %v339_v23, %s4571_s13  ;;  %341 = vrot.lane.b32.xlu2 %v339_v23, %s4573_s15  ;;  %v2659_v40 = vmul.f32 %v359_v33, %v339_v23  ;;  %v2661_v41 = vmul.f32 %v364_v34, %v339_v23  ;;  %v2665_v44 = vmul.f32 %v369_v35, %v339_v23  ;;  %v449_v23 = vstv %s4863_s10  ;;  %s4923_s10 = sld [smem:[#allocation73_spill]] }
 0x22e   : > { %376 = vrot.lane.b32.xlu1 %v340_v24, %s4571_s13  ;;  %v361_v45 = vmul.f32 %v359_v33, %v340_v24  ;;  %v2667_v46 = vmul.f32 %v364_v34, %v340_v24  ;;  %v2670_v48 = vmul.f32 %v369_v35, %v340_v24  ;;  %v2674_v51 = vmul.f32 %v491_v39, %v466_v28  ;;  %s4927_s16 = sld [smem:[#allocation86_spill]] }
 0x22f   : > { %v2679_v54 = vmul.f32 %v491_v39, %v2639_v29  ;;  %v2681_v55 = vmul.f32 %v496_v42, %v466_v28  ;;  %v2688_v59 = vmul.f32 %v496_v42, %v2639_v29  ;;  %v2692_v60 = vmul.f32 %v4575_v43, %v466_v28  ;;  %s5127_s23 = sld [smem:[#allocation156_spill]] }
 0x230   : > { %v383_v26 = vstv %s4865_s6  ;;  %v388_v27 = vstv %s4866_s27  ;;  %v428_v35 = vmul.f32 %v426_v21, %v2612_v17  ;;  %v422_v39 = vmul.f32 %v421_v18, %v2604_v16  ;;  %s4878_s27 = sld [smem:[#allocation206_spill]] }
 0x231   : > { %v401_v32 = vpop.permute.xlu0 %400  ;;  %v437_v58 = vpop.permute.xlu1 %436  ;;  %v427_v42 = vmul.f32 %v426_v21, %v2604_v16  ;;  %s4917_s6 = sld [smem:[#allocation80_spill]] }
 0x232   : > { %v403_v36 = vsel %vm345_vm10, %v401_v32, %v399_v30  ;;  %v402_v38 = vsel %vm345_vm10, %v399_v30, %v401_v32  ;;  %v423_v32 = vmul.f32 %v421_v18, %v2612_v17 }
 0x233   : > { %v404_v47 = vmul.f32 %v403_v36, %v2198_v10  ;;  %v405_v50 = vmul.f32 %v402_v38, %v2206_v13  ;;  %v433_v36 = vmul.f32 %v431_v22, %v2612_v17 }
 0x235   : > { %468 = vrot.lane.b32.xlu0 %v466_v28, %s4573_s15  ;;  %343 = vrot.lane.b32.xlu2 %v340_v24, %s4573_s15  ;;  %v2697_v0 = vmul.f32 %v406_v49, %v404_v47  ;;  %v2699_v2 = vmul.f32 %v406_v49, %v405_v50  ;;  %v2701_v3 = vmul.f32 %v411_v52, %v404_v47  ;;  %v454_v24 = vstv %s4864_s17  ;;  %s4928_s17 = sld [smem:[#allocation113_spill]] }
 0x236   : > { %470 = vrot.lane.b32.xlu1 %v2639_v29, %s4573_s15  ;;  %v2703_v4 = vmul.f32 %v411_v52, %v405_v50  ;;  %v2705_v5 = vmul.f32 %v416_v53, %v404_v47  ;;  %v2711_v19 = vmul.f32 %v416_v53, %v405_v50  ;;  %s4870_s15 = sld [smem:[#allocation40_spill]] }
 0x23d   : > { %508 = vrot.lane.b32.xlu0 %v2639_v29, %s4571_s13  ;;  %438 = vrot.lane.b32.xlu2 %v2612_v17, %s4571_s13 }
 0x245   : > { %506 = vrot.lane.b32.xlu2 %v466_v28, %s4571_s13  ;;  %s4869_s13 = sld [smem:[#allocation31_spill]] }
 0x287   : > { %v342_v31 = vpop.permute.xlu2 %341 }
 0x28f   : > { %v344_v37 = vpop.permute.xlu2 %343 }
 0x290   : > { %v346_v56 = vsel %vm345_vm10, %v342_v31, %v344_v37  ;;  %v347_v57 = vsel %vm345_vm10, %v344_v37, %v342_v31  ;;  %v393_v31 = vstv %s4867_s21  ;;  %s4881_s21 = smov 1  }
 0x291   : > { %v348_v6 = vmul.f32 %v347_v57, %v2198_v10  ;;  %v349_v7 = vmul.f32 %v346_v56, %v2206_v13  ;;  %v476_v57 = vstv %s4868_s7  ;;  %s4871_s7 = sld [smem:[#allocation24_spill]] }
 0x293   : > { %v351_v33 = vmul.f32 %v350_v61, %v348_v6  ;;  %v352_v34 = vmul.f32 %v350_v61, %v349_v7  ;;  %v354_v37 = vmul.f32 %v353_v62, %v348_v6  ;;  %v355_v38 = vmul.f32 %v353_v62, %v349_v7 }
 0x294   : > { %v357_v47 = vmul.f32 %v356_v63, %v348_v6  ;;  %v358_v49 = vmul.f32 %v356_v63, %v349_v7  ;;  %v486_v61 = vstv %s4870_s15  ;;  %s4873_s15 = sld [smem:[#allocation33_spill]] }
 0x295   : > { %v362_v17 = vadd.f32 %v2659_v40, %v351_v33  ;;  %v363_v62 = vadd.f32 %v361_v45, %v352_v34  ;;  %v367_v6 = vadd.f32 %v2661_v41, %v354_v37  ;;  %v368_v7 = vadd.f32 %v2667_v46, %v355_v38 }
 0x297   : > { %v439_v25 = vpop.permute.xlu2 %438 }
 0x298   : > { %v440_v28 = vsel %vm378_vm11, %v437_v58, %v439_v25  ;;  %v441_v30 = vsel %vm378_vm11, %v439_v25, %v437_v58  ;;  %v481_v58 = vstv %s4869_s13  ;;  %v432_v25 = vmul.f32 %v431_v22, %v2604_v16  ;;  %s4875_s13 = sld [smem:[#allocation42_spill]] }
 0x299   : > { %v442_v50 = vmul.f32 %v440_v28, %v2210_v14  ;;  %v443_v52 = vmul.f32 %v441_v30, %v2212_v15  ;;  %v372_v30 = vadd.f32 %v2665_v44, %v357_v47  ;;  %v373_v16 = vadd.f32 %v2670_v48, %v358_v49 }
 0x29b   : > { %v445_v40 = vmul.f32 %v444_v20, %v442_v50  ;;  %v446_v45 = vmul.f32 %v444_v20, %v443_v52  ;;  %v450_v12 = vmul.f32 %v449_v23, %v442_v50  ;;  %v455_v9 = vmul.f32 %v454_v24, %v442_v50 }
 0x29f   : > { %v375_v53 = vpop.permute.xlu0 %374 }
 0x2a0   : > { %v377_v56 = vpop.permute.xlu1 %376 }
 0x2a1   : > { %v379_v18 = vsel %vm378_vm11, %v375_v53, %v377_v56  ;;  %v380_v63 = vsel %vm378_vm11, %v377_v56, %v375_v53  ;;  %v451_v53 = vmul.f32 %v449_v23, %v443_v52 }
 0x2a2   : > { %v381_v21 = vmul.f32 %v379_v18, %v2210_v14  ;;  %v382_v28 = vmul.f32 %v380_v63, %v2212_v15  ;;  %v456_v63 = vmul.f32 %v454_v24, %v443_v52 }
 0x2a4   : > { %v384_v22 = vmul.f32 %v383_v26, %v381_v21  ;;  %v385_v33 = vmul.f32 %v383_v26, %v382_v28  ;;  %v389_v34 = vmul.f32 %v388_v27, %v381_v21  ;;  %v390_v43 = vmul.f32 %v388_v27, %v382_v28 }
 0x2a5   : > { %v394_v56 = vmul.f32 %v393_v31, %v381_v21  ;;  %v395_v41 = vmul.f32 %v393_v31, %v382_v28 }
 0x2a6   : > { %v386_v37 = vadd.f32 %v384_v22, %v362_v17  ;;  %v387_v46 = vadd.f32 %v385_v33, %v363_v62  ;;  %v391_v38 = vadd.f32 %v389_v34, %v367_v6  ;;  %v392_v18 = vadd.f32 %v390_v43, %v368_v7 }
 0x2a7   : > { %v396_v11 = vadd.f32 %v394_v56, %v372_v30  ;;  %v397_v44 = vadd.f32 %v395_v41, %v373_v16  ;;  %v469_v47 = vpop.permute.xlu0 %468  ;;  %v4872_v16 = vstv %s4847_s19  ;;  %v514_v33 = vstv %s4871_s7  ;;  %v507_v56 = vpop.permute.xlu2 %506  ;;  %s4884_s7 = smov 127   ;;  %s4930_s19 = sld [smem:[#allocation82_spill]] }
 0x2a8   : > { %v409_v48 = vadd.f32 %v2697_v0, %v386_v37  ;;  %v410_v20 = vadd.f32 %v2699_v2, %v387_v46  ;;  %v414_v26 = vadd.f32 %v2701_v3, %v391_v38  ;;  %v415_v27 = vadd.f32 %v2703_v4, %v392_v18  ;;  %v471_v23 = vpop.permute.xlu1 %470 }
 0x2a9   : > { %v419_v31 = vadd.f32 %v2705_v5, %v396_v11  ;;  %v420_v49 = vadd.f32 %v2711_v19, %v397_v44  ;;  %v472_v43 = vsel %vm345_vm10, %v469_v47, %v471_v23  ;;  %v473_v24 = vsel %vm345_vm10, %v471_v23, %v469_v47 }
 0x2aa   : > { %v425_v50 = vadd.f32 %v423_v32, %v410_v20  ;;  %v430_v52 = vadd.f32 %v428_v35, %v415_v27  ;;  %v424_v0 = vadd.f32 %v422_v39, %v409_v48  ;;  %v429_v17 = vadd.f32 %v427_v42, %v414_v26 }
 0x2ab   : > { %v435_v2 = vadd.f32 %v433_v36, %v420_v49  ;;  %v434_v62 = vadd.f32 %v432_v25, %v419_v31  ;;  %v474_v3 = vmul.f32 %v473_v24, %v2198_v10  ;;  %v475_v4 = vmul.f32 %v472_v43, %v2206_v13 }
 0x2ac   : > { %v448_v11 = vadd.f32 %v446_v45, %v425_v50  ;;  %v453_v5 = vadd.f32 %v451_v53, %v430_v52  ;;  %v447_v19 = vadd.f32 %v445_v40, %v424_v0  ;;  %v452_v6 = vadd.f32 %v450_v12, %v429_v17 }
 0x2ad   : > { %v458_v7 = vadd.f32 %v456_v63, %v435_v2  ;;  %v457_v21 = vadd.f32 %v455_v9, %v434_v62  ;;  %v477_v28 = vmul.f32 %v476_v57, %v474_v3  ;;  %v478_v30 = vmul.f32 %v476_v57, %v475_v4 }
 0x2ae   : > { %v482_v32 = vmul.f32 %v481_v58, %v474_v3  ;;  %v483_v35 = vmul.f32 %v481_v58, %v475_v4  ;;  %v487_v39 = vmul.f32 %v486_v61, %v474_v3  ;;  %v488_v42 = vmul.f32 %v486_v61, %v475_v4 }
 0x2af   : > { %v479_v36 = vadd.f32 %v477_v28, %v447_v19  ;;  %v480_v25 = vadd.f32 %v478_v30, %v448_v11  ;;  %v503_v22 = vmul.f32 %v4872_v16, %v2639_v29  ;;  %v509_v34 = vpop.permute.xlu0 %508  ;;  %v519_v63 = vstv %s4873_s15  ;;  %s4888_s15 = sld [smem:[#allocation47_spill]] }
 0x2b0   : > { %v484_v45 = vadd.f32 %v482_v32, %v452_v6  ;;  %v485_v40 = vadd.f32 %v483_v35, %v453_v5  ;;  %v489_v12 = vadd.f32 %v487_v39, %v457_v21  ;;  %v490_v9 = vadd.f32 %v488_v42, %v458_v7  ;;  %v4885_v7 = vld [vmem:[#allocation25_spill] sm:$0xff]  ;;  %v4886_v32 = vld [vmem:[#allocation23_spill] sm:$0xff] }
 0x2b1   : > { %v495_v57 = vadd.f32 %v2679_v54, %v480_v25  ;;  %v494_v58 = vadd.f32 %v2674_v51, %v479_v36  ;;  %v510_v61 = vsel %vm378_vm11, %v507_v56, %v509_v34  ;;  %v511_v53 = vsel %vm378_vm11, %v509_v34, %v507_v56 }
 0x2b2   : > { %v500_v29 = vadd.f32 %v2688_v59, %v485_v40  ;;  %v505_v41 = vadd.f32 %v503_v22, %v490_v9  ;;  %v499_v37 = vadd.f32 %v2681_v55, %v484_v45  ;;  %v504_v46 = vadd.f32 %v2692_v60, %v489_v12 }
 0x2b3   : > { %v512_v38 = vmul.f32 %v510_v61, %v2210_v14  ;;  %v513_v18 = vmul.f32 %v511_v53, %v2212_v15  ;;  %v529_v44 = vstv %s4874_s18  ;;  %v532_v23 = vstv %s2574_s30  ;;  %s4929_s18 = sld [smem:[#allocation55_spill]] }
 0x2b4   : > { %v524_v43 = vstv %s4875_s13  ;;  %v535_v17 = vstv %s4878_s27  ;;  %s4889_s13 = sld [smem:[#allocation74_spill]] }
 0x2b5   : > { %v515_v54 = vmul.f32 %v514_v33, %v512_v38  ;;  %v516_v51 = vmul.f32 %v514_v33, %v513_v18  ;;  %v520_v20 = vmul.f32 %v519_v63, %v512_v38  ;;  %v521_v26 = vmul.f32 %v519_v63, %v513_v18  ;;  %v4887_v33 = vld [vmem:[#allocation26_spill] sm:$0xff]  ;;  %s4891_s27 = sld [smem:[#allocation101_spill]] }
 0x2b6   : > { %v525_v24 = vmul.f32 %v524_v43, %v512_v38  ;;  %v526_v50 = vmul.f32 %v524_v43, %v513_v18  ;;  %v624_v43 = vstv %s4888_s15  ;;  %s4899_s15 = sld [smem:[#allocation48_spill]] }
 0x2b7   : > { %v517_v47 = vadd.f32 %v515_v54, %v494_v58  ;;  %v518_v48 = vadd.f32 %v516_v51, %v495_v57  ;;  %v522_v55 = vadd.f32 %v520_v20, %v499_v37  ;;  %v523_v60 = vadd.f32 %v521_v26, %v500_v29 }
 0x2b8   : > { %v527_v52 = vadd.f32 %v525_v24, %v504_v46  ;;  %v528_v0 = vadd.f32 %v526_v50, %v505_v41 }
 0x2b9   : > { %v2776_v59 = vadd.f32 %v529_v44, %v517_v47  ;;  %v2778_v27 = vadd.f32 %v529_v44, %v518_v48  ;;  %v2787_v31 = vadd.f32 %v532_v23, %v522_v55  ;;  %v2789_v49 = vadd.f32 %v532_v23, %v523_v60 }
 0x2ba   : > { %v2805_v2 = vadd.f32 %v535_v17, %v527_v52  ;;  %v2807_v62 = vadd.f32 %v535_v17, %v528_v0  ;;  %v629_v24 = vstv %s4889_s13  ;;  %s4911_s13 = sld [smem:[#allocation77_spill]] }
 0x2bb   : > { %4876 = vst [vmem:[#allocation213_spill] sm:$0xff] %v2776_v59  ;;  %540 = vrot.lane.b32.xlu2 %v2778_v27, %s4579_s20  ;;  %662 = vrot.lane.b32.xlu0 %v2776_v59, %s4581_s11  ;;  %v634_v52 = vstv %s4891_s27  ;;  %s4913_s27 = sld [smem:[#allocation104_spill]] }
 0x2bc   : > { %4877 = vst [vmem:[#allocation214_spill] sm:$0xff] %v2778_v27  ;;  %538 = vrot.lane.b32.xlu1 %v2776_v59, %s4579_s20 }
 0x2bd   : > { %4879 = vst [vmem:[#allocation215_spill] sm:$0xff] %v2787_v31 }
 0x2be   : > { %4880 = vst [vmem:[#allocation216_spill] sm:$0xff] %v2789_v49 }
 0x2bf   : > { %4882 = vst [vmem:[#allocation217_spill] sm:$0xff] %v2805_v2 }
 0x2c0   : > { %4883 = vst [vmem:[#allocation218_spill] sm:$0xff] %v2807_v62 }
 0x2c3   : > { %731 = vrot.lane.b32.xlu2 %v2787_v31, %s4579_s20  ;;  %733 = vrot.lane.b32.xlu0 %v2789_v49, %s4579_s20 }
 0x2c4   : > { %664 = vrot.lane.b32.xlu1 %v2778_v27, %s4581_s11 }
 0x2cb   : > { %601 = vrot.lane.b32.xlu2 %v2776_v59, %s4881_s21  ;;  %861 = vrot.lane.b32.xlu0 %v2787_v31, %s4581_s11 }
 0x2cc   : > { %863 = vrot.lane.b32.xlu1 %v2789_v49, %s4581_s11 }
 0x2d3   : > { %930 = vrot.lane.b32.xlu2 %v2805_v2, %s4579_s20  ;;  %932 = vrot.lane.b32.xlu0 %v2807_v62, %s4579_s20  ;;  %s4892_s20 = sld [smem:[#allocation56_spill]] }
 0x2d4   : > { %603 = vrot.lane.b32.xlu1 %v2778_v27, %s4881_s21 }
 0x2d9   : > { %v823_v0 = vstv %s4892_s20  ;;  %s4900_s20 = sld [smem:[#allocation44_spill]] }
 0x2db   : > { %639 = vrot.lane.b32.xlu2 %v2776_v59, %s4884_s7  ;;  %1060 = vrot.lane.b32.xlu0 %v2805_v2, %s4581_s11 }
 0x2dc   : > { %1062 = vrot.lane.b32.xlu1 %v2807_v62, %s4581_s11  ;;  %s4893_s11 = sld [smem:[#allocation83_spill]] }
 0x2e2   : > { %v828_v17 = vstv %s4893_s11  ;;  %s4902_s11 = sld [smem:[#allocation98_spill]] }
 0x2e3   : > { %641 = vrot.lane.b32.xlu2 %v2778_v27, %s4884_s7  ;;  %802 = vrot.lane.b32.xlu0 %v2789_v49, %s4881_s21 }
 0x2e4   : > { %838 = vrot.lane.b32.xlu1 %v2787_v31, %s4884_s7 }
 0x2eb   : > { %800 = vrot.lane.b32.xlu2 %v2787_v31, %s4881_s21 }
 0x2f3   : > { %840 = vrot.lane.b32.xlu2 %v2789_v49, %s4884_s7 }
 0x315   : > { %v541_v3 = vpop.permute.xlu2 %540 }
 0x31d   : > { %v732_v42 = vpop.permute.xlu2 %731 }
 0x325   : > { %v602_v56 = vpop.permute.xlu2 %601 }
 0x32d   : > { %v663_v19 = vpop.permute.xlu0 %662  ;;  %v931_v41 = vpop.permute.xlu2 %930 }
 0x32e   : > { %v539_v4 = vpop.permute.xlu1 %538 }
 0x32f   : > { %v542_v11 = vsel %vm336_vm8, %v539_v4, %v541_v3  ;;  %v543_v5 = vsel %vm336_vm8, %v541_v3, %v539_v4  ;;  %v833_v3 = vstv %s4894_s0  ;;  %v1022_v4 = vstv %s4895_s2  ;;  %s4901_s0 = sld [smem:[#allocation71_spill]] }
 0x330   : > { %v2836_v6 = vmul.f32 %v543_v5, %v4846_v8  ;;  %v2839_v21 = vmul.f32 %v542_v11, %v4885_v7  ;;  %v2969_v11 = vmul.f32 %v624_v43, %v2778_v27  ;;  %v2972_v5 = vmul.f32 %v629_v24, %v2778_v27  ;;  %s4906_s2 = sld [smem:[#allocation102_spill]] }
 0x332   : > { %578 = vrot.lane.b32.xlu2 %v2836_v6, %s4884_s7  ;;  %546 = vrot.lane.b32.xlu0 %v2836_v6, %s4881_s21 }
 0x333   : > { %548 = vrot.lane.b32.xlu1 %v2839_v21, %s4881_s21 }
 0x335   : > { %v734_v39 = vpop.permute.xlu0 %733  ;;  %v2942_v20 = vpop.permute.xlu2 %639 }
 0x336   : > { %v665_v28 = vpop.permute.xlu1 %664  ;;  %v735_v36 = vsel %vm336_vm8, %v732_v42, %v734_v39  ;;  %v736_v45 = vsel %vm336_vm8, %v734_v39, %v732_v42  ;;  %v2980_v39 = vmul.f32 %v624_v43, %v2776_v59  ;;  %v2983_v42 = vmul.f32 %v629_v24, %v2776_v59 }
 0x337   : > { %v666_v30 = vsel %vm463_vm9, %v663_v19, %v665_v28  ;;  %v667_v25 = vsel %vm463_vm9, %v665_v28, %v663_v19  ;;  %v2863_v22 = vmul.f32 %v735_v36, %v4885_v7  ;;  %v2885_v58 = vmul.f32 %v736_v45, %v4846_v8 }
 0x338   : > { %v2850_v35 = vmul.f32 %v666_v30, %v4886_v32  ;;  %v2866_v34 = vmul.f32 %v667_v25, %v4887_v33  ;;  %v1027_v19 = vstv %s4896_s3  ;;  %v1032_v28 = vstv %s4897_s4  ;;  %s4904_s3 = sld [smem:[#allocation75_spill]] }
 0x339   : > { %v2977_v30 = vmul.f32 %v634_v52, %v2778_v27  ;;  %v2986_v36 = vmul.f32 %v634_v52, %v2776_v59  ;;  %v2989_v25 = vmul.f32 %v823_v0, %v2787_v31  ;;  %v2998_v45 = vmul.f32 %v828_v17, %v2789_v49  ;;  %s4909_s4 = sld [smem:[#allocation50_spill]] }
 0x33a   : > { %708 = vrot.lane.b32.xlu2 %v2850_v35, %s4884_s7  ;;  %670 = vrot.lane.b32.xlu0 %v2850_v35, %s4881_s21  ;;  %v657_v24 = vstv %s4906_s2  ;;  %s4964_s2 = sld [smem:[#allocation97_spill]] }
 0x33b   : > { %580 = vrot.lane.b32.xlu1 %v2839_v21, %s4884_s7  ;;  %4903 = vst [vmem:[#allocation221_spill] sm:$0xff] %v2989_v25 }
 0x33c   : > { %4908 = vst [vmem:[#allocation224_spill] sm:$0xff] %v2998_v45  ;;  %v4958_v45 = vstv %s4923_s10 }
 0x33d   : > { %v862_v57 = vpop.permute.xlu0 %861  ;;  %v642_v55 = vpop.permute.xlu2 %641 }
 0x33e   : > { %v864_v16 = vpop.permute.xlu1 %863  ;;  %v652_v43 = vstv %s4904_s3  ;;  %s4960_s3 = sld [smem:[#allocation70_spill]] }
 0x33f   : > { %v865_v61 = vsel %vm463_vm9, %v862_v57, %v864_v16  ;;  %v866_v38 = vsel %vm463_vm9, %v864_v16, %v862_v57  ;;  %v2992_v16 = vmul.f32 %v823_v0, %v2789_v49  ;;  %v3004_v57 = vmul.f32 %v833_v3, %v2789_v49 }
 0x340   : > { %v2896_v53 = vmul.f32 %v865_v61, %v4886_v32  ;;  %v2918_v18 = vmul.f32 %v866_v38, %v4887_v33  ;;  %v3007_v61 = vmul.f32 %v1022_v4, %v2805_v2  ;;  %v3019_v38 = vmul.f32 %v1032_v28, %v2805_v2 }
 0x341   : > { %4905 = vst [vmem:[#allocation222_spill] sm:$0xff] %v2992_v16  ;;  %v693_v0 = vstv %s4909_s4  ;;  %v643_v49 = vsel %vm378_vm11, %v2942_v20, %v642_v55  ;;  %s4969_s4 = sld [smem:[#allocation45_spill]] }
 0x342   : > { %741 = vrot.lane.b32.xlu2 %v2863_v22, %s4881_s21  ;;  %710 = vrot.lane.b32.xlu0 %v2866_v34, %s4884_s7  ;;  %4912 = vst [vmem:[#allocation226_spill] sm:$0xff] %v3004_v57 }
 0x343   : > { %672 = vrot.lane.b32.xlu1 %v2866_v34, %s4881_s21  ;;  %4914 = vst [vmem:[#allocation227_spill] sm:$0xff] %v3007_v61 }
 0x344   : > { %4922 = vst [vmem:[#allocation231_spill] sm:$0xff] %v3019_v38 }
 0x345   : > { %v933_v29 = vpop.permute.xlu0 %932  ;;  %v2957_v23 = vpop.permute.xlu2 %800 }
 0x346   : > { %v604_v40 = vpop.permute.xlu1 %603  ;;  %v934_v37 = vsel %vm336_vm8, %v931_v41, %v933_v29  ;;  %v935_v44 = vsel %vm336_vm8, %v933_v29, %v931_v41  ;;  %v3010_v29 = vmul.f32 %v1022_v4, %v2807_v62  ;;  %v3013_v41 = vmul.f32 %v1027_v19, %v2805_v2 }
 0x347   : > { %v2878_v12 = vsel %vm345_vm10, %v602_v56, %v604_v40  ;;  %v2882_v9 = vsel %vm345_vm10, %v604_v40, %v602_v56  ;;  %v2907_v46 = vmul.f32 %v934_v37, %v4885_v7  ;;  %v2934_v48 = vmul.f32 %v935_v44, %v4846_v8 }
 0x348   : > { %v2995_v56 = vmul.f32 %v828_v17, %v2787_v31  ;;  %v3001_v40 = vmul.f32 %v833_v3, %v2787_v31  ;;  %4916 = vst [vmem:[#allocation228_spill] sm:$0xff] %v3010_v29  ;;  %v3016_v37 = vmul.f32 %v1027_v19, %v2807_v62  ;;  %v568_v44 = vstv %s4901_s0  ;;  %s4934_s0 = sld [smem:[#allocation116_spill]] }
 0x349   : > { %4918 = vst [vmem:[#allocation229_spill] sm:$0xff] %v3013_v41  ;;  %v698_v17 = vstv %s4911_s13  ;;  %v703_v3 = vstv %s4913_s27  ;;  %v762_v4 = vstv %s4915_s5  ;;  %v767_v19 = vstv %s4917_s6  ;;  %s4935_s5 = sld [smem:[#allocation57_spill]] }
 0x34a   : > { %999 = vrot.lane.b32.xlu2 %v2805_v2, %s4881_s21  ;;  %1001 = vrot.lane.b32.xlu0 %v2807_v62, %s4881_s21  ;;  %4907 = vst [vmem:[#allocation223_spill] sm:$0xff] %v2995_v56  ;;  %v892_v31 = vstv %s4926_s14  ;;  %v902_v7 = vstv %s4928_s17  ;;  %s4936_s6 = sld [smem:[#allocation84_spill]]  ;;  %v3075_v61 = vmul.f32 %v762_v4, %v2885_v58  ;;  %v3095_v56 = vmul.f32 %v693_v0, %v2866_v34 }
 0x34b   : > { %739 = vrot.lane.b32.xlu1 %v2885_v58, %s4881_s21  ;;  %4910 = vst [vmem:[#allocation225_spill] sm:$0xff] %v3001_v40  ;;  %s4941_s14 = sld [smem:[#allocation68_spill]]  ;;  %v3106_v25 = vmul.f32 %v703_v3, %v2850_v35  ;;  %v3109_v40 = vmul.f32 %v703_v3, %v2866_v34  ;;  %v3143_v3 = vmul.f32 %v892_v31, %v2918_v18 }
 0x34c   : > { %4920 = vst [vmem:[#allocation230_spill] sm:$0xff] %v3016_v37  ;;  %v3078_v37 = vmul.f32 %v762_v4, %v2863_v22  ;;  %s4943_s17 = sld [smem:[#allocation122_spill]]  ;;  %v3092_v4 = vmul.f32 %v693_v0, %v2850_v35 }
 0x34d   : > { %v1061_v54 = vpop.permute.xlu0 %1060  ;;  %v2961_v50 = vpop.permute.xlu2 %840  ;;  %4938 = vst [vmem:[#allocation233_spill] sm:$0xff] %v3075_v61  ;;  %s4972_s13 = sld [smem:[#allocation72_spill]] }
 0x34e   : > { %v1063_v51 = vpop.permute.xlu1 %1062  ;;  %v971_v41 = vstv %s4934_s0  ;;  %4947 = vst [vmem:[#allocation239_spill] sm:$0xff] %v3143_v3  ;;  %s4981_s27 = sld [smem:[#allocation99_spill]] }
 0x34f   : > { %v1064_v63 = vsel %vm463_vm9, %v1061_v54, %v1063_v51  ;;  %v1065_v26 = vsel %vm463_vm9, %v1063_v51, %v1061_v54  ;;  %v3022_v54 = vmul.f32 %v1032_v28, %v2807_v62  ;;  %v647_v51 = vstv %s4899_s15  ;;  %s4932_s15 = sld [smem:[#allocation62_spill]] }
 0x350   : > { %v2931_v47 = vmul.f32 %v1064_v63, %v4886_v32  ;;  %v2951_v60 = vmul.f32 %v1065_v26, %v4887_v33  ;;  %v563_v63 = vstv %s4900_s20  ;;  %v573_v26 = vstv %s4902_s11  ;;  %s4933_s20 = sld [smem:[#allocation89_spill]] }
 0x351   : > { %4924 = vst [vmem:[#allocation232_spill] sm:$0xff] %v3022_v54  ;;  %v772_v28 = vstv %s4919_s8  ;;  %v3043_v27 = vmul.f32 %v563_v63, %v2836_v6  ;;  %v3046_v59 = vmul.f32 %v563_v63, %v2839_v21  ;;  %v897_v33 = vstv %s4927_s16  ;;  %s4937_s8 = sld [smem:[#allocation111_spill]] }
 0x352   : > { %907 = vrot.lane.b32.xlu2 %v2896_v53, %s4884_s7  ;;  %777 = vrot.lane.b32.xlu0 %v2885_v58, %s4884_s7  ;;  %4890 = vst [vmem:[#allocation219_spill] sm:$0xff] %v2931_v47  ;;  %v3054_v54 = vmul.f32 %v568_v44, %v2836_v6  ;;  %v3063_v63 = vmul.f32 %v568_v44, %v2839_v21  ;;  %s4942_s16 = sld [smem:[#allocation95_spill]] }
 0x353   : > { %1037 = vrot.lane.b32.xlu1 %v2805_v2, %s4884_s7  ;;  %4898 = vst [vmem:[#allocation220_spill] sm:$0xff] %v2951_v60  ;;  %v644_v2 = vsel %vm378_vm11, %v642_v55, %v2942_v20  ;;  %v3066_v32 = vmul.f32 %v573_v26, %v2836_v6  ;;  %v3069_v38 = vmul.f32 %v573_v26, %v2839_v21  ;;  %v1091_v26 = vstv %s4941_s14  ;;  %s4959_s11 = sld [smem:[#allocation43_spill]] }
 0x354   : > { %v3081_v20 = vmul.f32 %v767_v19, %v2885_v58  ;;  %v3084_v55 = vmul.f32 %v767_v19, %v2863_v22  ;;  %v645_v6 = vmul.f32 %v643_v49, %v2210_v14  ;;  %v646_v21 = vmul.f32 %v644_v2, %v2212_v15  ;;  %s4992_s0 = sld [smem:[#allocation105_spill]] }
 0x355   : > { %v961_v8 = vstv %s4932_s15  ;;  %v803_v44 = vpop.permute.xlu0 %802  ;;  %v3098_v19 = vmul.f32 %v698_v17, %v2850_v35  ;;  %v3103_v2 = vmul.f32 %v698_v17, %v2866_v34  ;;  %v3112_v29 = vmul.f32 %v772_v28, %v2885_v58  ;;  %s4988_s15 = sld [smem:[#allocation51_spill]] }
 0x356   : > { %4939 = vst [vmem:[#allocation234_spill] sm:$0xff] %v3081_v20  ;;  %v839_v57 = vpop.permute.xlu1 %838  ;;  %v3115_v0 = vmul.f32 %v772_v28, %v2863_v22  ;;  %v3120_v20 = vmul.f32 %v647_v51, %v645_v6  ;;  %v3122_v61 = vmul.f32 %v647_v51, %v646_v21  ;;  %v3124_v17 = vmul.f32 %v652_v43, %v645_v6  ;;  %s4993_s14 = sld [smem:[#allocation49_spill]] }
 0x357   : > { %4940 = vst [vmem:[#allocation235_spill] sm:$0xff] %v3084_v55  ;;  %v3126_v35 = vmul.f32 %v652_v43, %v646_v21  ;;  %v3128_v55 = vmul.f32 %v657_v24, %v645_v6  ;;  %v3130_v34 = vmul.f32 %v657_v24, %v646_v21  ;;  %v608_v58 = vmul.f32 %v2878_v12, %v2206_v13 }
 0x358   : > { %4944 = vst [vmem:[#allocation236_spill] sm:$0xff] %v3112_v29  ;;  %v805_v51 = vsel %vm345_vm10, %v803_v44, %v2957_v23  ;;  %v3140_v43 = vmul.f32 %v892_v31, %v2896_v53  ;;  %v3146_v24 = vmul.f32 %v897_v33, %v2896_v53  ;;  %v3152_v12 = vmul.f32 %v897_v33, %v2918_v18 }
 0x359   : > { %4945 = vst [vmem:[#allocation237_spill] sm:$0xff] %v3115_v0  ;;  %v3155_v28 = vmul.f32 %v902_v7, %v2896_v53  ;;  %v3158_v6 = vmul.f32 %v902_v7, %v2918_v18  ;;  %v3161_v21 = vmul.f32 %v961_v8, %v2934_v48  ;;  %v3164_v16 = vmul.f32 %v961_v8, %v2907_v46 }
 0x35a   : > { %940 = vrot.lane.b32.xlu2 %v2907_v46, %s4881_s21  ;;  %869 = vrot.lane.b32.xlu0 %v2896_v53, %s4881_s21  ;;  %4946 = vst [vmem:[#allocation238_spill] sm:$0xff] %v3140_v43  ;;  %v4956_v53 = vstv %s4921_s9  ;;  %s5022_s9 = sld [smem:[#allocation115_spill]] }
 0x35b   : > { %779 = vrot.lane.b32.xlu1 %v2863_v22, %s4884_s7  ;;  %v607_v22 = vmul.f32 %v2882_v9, %v2198_v10  ;;  %4948 = vst [vmem:[#allocation240_spill] sm:$0xff] %v3146_v24  ;;  %v804_v9 = vsel %vm345_vm10, %v2957_v23, %v803_v44  ;;  %v4957_v7 = vmov %v4956_v53 }
 0x35c   : > { %4949 = vst [vmem:[#allocation241_spill] sm:$0xff] %v3152_v12  ;;  %v843_v12 = vsel %vm378_vm11, %v2961_v50, %v839_v57 }
 0x35d   : > { %4950 = vst [vmem:[#allocation242_spill] sm:$0xff] %v3155_v28  ;;  %v3174_v44 = vmul.f32 %v4956_v53, %v607_v22 }
 0x35e   : > { %4951 = vst [vmem:[#allocation243_spill] sm:$0xff] %v3158_v6  ;;  %v3182_v6 = vmul.f32 %v4958_v45, %v607_v22 }
 0x35f   : > { %4952 = vst [vmem:[#allocation244_spill] sm:$0xff] %v3161_v21  ;;  %v806_v21 = vmul.f32 %v805_v51, %v2198_v10  ;;  %v4962_v51 = vstv %s4925_s12  ;;  %s5113_s12 = sld [smem:[#allocation167_spill]] }
 0x360   : > { %4953 = vst [vmem:[#allocation245_spill] sm:$0xff] %v3164_v16  ;;  %v807_v16 = vmul.f32 %v804_v9, %v2206_v13  ;;  %v4963_v28 = vmov %v4962_v51 }
 0x361   : > { %v3203_v9 = vmul.f32 %v4963_v28, %v608_v58  ;;  %v554_v28 = vstv %s4959_s11  ;;  %s4994_s11 = sld [smem:[#allocation76_spill]] }
 0x362   : > { %1039 = vrot.lane.b32.xlu2 %v2807_v62, %s4884_s7  ;;  %909 = vrot.lane.b32.xlu0 %v2918_v18, %s4884_s7  ;;  %v966_v62 = vstv %s4933_s20  ;;  %s4990_s20 = sld [smem:[#allocation78_spill]] }
 0x363   : > { %871 = vrot.lane.b32.xlu1 %v2918_v18, %s4881_s21  ;;  %v3167_v23 = vmul.f32 %v966_v62, %v2934_v48  ;;  %v3170_v33 = vmul.f32 %v966_v62, %v2907_v46  ;;  %v3178_v18 = vmul.f32 %v4957_v7, %v608_v58  ;;  %v842_v62 = vsel %vm378_vm11, %v839_v57, %v2961_v50 }
 0x364   : > { %v4961_v7 = vstv %s4923_s10  ;;  %v3222_v50 = vmul.f32 %v1091_v26, %v2931_v47  ;;  %v4968_v57 = vstv %s4929_s18  ;;  %s5024_s10 = sld [smem:[#allocation63_spill]] }
 0x365   : > { %4954 = vst [vmem:[#allocation246_spill] sm:$0xff] %v3167_v23  ;;  %v3195_v23 = vmul.f32 %v4961_v7, %v608_v58  ;;  %v3216_v7 = vmul.f32 %v971_v41, %v2907_v46  ;;  %v844_v58 = vmul.f32 %v842_v62, %v2210_v14  ;;  %v4975_v62 = vstv %s4930_s19  ;;  %s5121_s18 = sld [smem:[#allocation136_spill]] }
 0x366   : > { %4955 = vst [vmem:[#allocation247_spill] sm:$0xff] %v3170_v33  ;;  %v3199_v33 = vmul.f32 %v4962_v51, %v607_v22  ;;  %v3213_v22 = vmul.f32 %v971_v41, %v2934_v48  ;;  %v557_v51 = vstv %s4960_s3  ;;  %v3234_v41 = vmul.f32 %v1091_v26, %v2951_v60  ;;  %s4995_s3 = sld [smem:[#allocation103_spill]] }
 0x367   : > { %4966 = vst [vmem:[#allocation249_spill] sm:$0xff] %v3216_v7  ;;  %v4977_v7 = vmov %v4975_v62  ;;  %s5122_s19 = sld [smem:[#allocation163_spill]] }
 0x368   : > { %4965 = vst [vmem:[#allocation248_spill] sm:$0xff] %v3213_v22  ;;  %v3238_v22 = vmul.f32 %v4975_v62, %v806_v21  ;;  %v3242_v3 = vmul.f32 %v4977_v7, %v807_v16  ;;  %v4984_v62 = vstv %s4935_s5  ;;  %v586_v7 = vstv %s4969_s4  ;;  %s4998_s4 = sld [smem:[#allocation91_spill]] }
 0x369   : > { %4967 = vst [vmem:[#allocation250_spill] sm:$0xff] %v3222_v50  ;;  %v4979_v50 = vstv %s4931_s22  ;;  %s5002_s5 = sld [smem:[#allocation79_spill]] }
 0x36a   : > { %1106 = vrot.lane.b32.xlu2 %v2931_v47, %s4884_s7  ;;  %976 = vrot.lane.b32.xlu0 %v2934_v48, %s4884_s7  ;;  %4974 = vst [vmem:[#allocation253_spill] sm:$0xff] %v3234_v41  ;;  %v4982_v26 = vmov %v4979_v50  ;;  %s5126_s22 = sld [smem:[#allocation129_spill]] }
 0x36b   : > { %938 = vrot.lane.b32.xlu1 %v2934_v48, %s4881_s21  ;;  %4976 = vst [vmem:[#allocation254_spill] sm:$0xff] %v3238_v22  ;;  %v3253_v41 = vmul.f32 %v4982_v26, %v807_v16 }
 0x36c   : > { %4978 = vst [vmem:[#allocation255_spill] sm:$0xff] %v3242_v3  ;;  %v591_v3 = vstv %s4972_s13  ;;  %s5000_s13 = sld [smem:[#allocation118_spill]] }
 0x36d   : > { %4983 = vst [vmem:[#allocation257_spill] sm:$0xff] %v3253_v41 }
 0x372   : > { %1068 = vrot.lane.b32.xlu0 %v2931_v47, %s4881_s21  ;;  %v3246_v47 = vmul.f32 %v4979_v50, %v806_v21 }
 0x373   : > { %978 = vrot.lane.b32.xlu1 %v2907_v46, %s4884_s7  ;;  %v845_v46 = vmul.f32 %v843_v12, %v2212_v15 }
 0x374   : > { %4980 = vst [vmem:[#allocation256_spill] sm:$0xff] %v3246_v47 }
 0x37a   : > { %1108 = vrot.lane.b32.xlu0 %v2951_v60, %s4884_s7 }
 0x37b   : > { %1070 = vrot.lane.b32.xlu1 %v2951_v60, %s4881_s21  ;;  %v3257_v60 = vmul.f32 %v4984_v62, %v844_v58 }
 0x37d   : > { %4985 = vst [vmem:[#allocation258_spill] sm:$0xff] %v3257_v60 }
 0x38c   : > { %v3030_v52 = vpop.permute.xlu2 %578 }
 0x394   : > { %v3100_v49 = vpop.permute.xlu2 %708 }
 0x39c   : > { %v3208_v24 = vpop.permute.xlu2 %741 }
 0x3a4   : > { %v547_v31 = vpop.permute.xlu0 %546 }
 0x3a5   : > { %v549_v8 = vpop.permute.xlu1 %548 }
 0x3a6   : > { %v550_v53 = vsel %vm345_vm10, %v547_v31, %v549_v8  ;;  %v551_v45 = vsel %vm345_vm10, %v549_v8, %v547_v31 }
 0x3a7   : > { %v552_v31 = vmul.f32 %v551_v45, %v2198_v10  ;;  %v553_v8 = vmul.f32 %v550_v53, %v2206_v13  ;;  %v3226_v45 = vmul.f32 %v4968_v57, %v806_v21  ;;  %v4971_v53 = vmov %v4968_v57 }
 0x3a8   : > { %v3230_v48 = vmul.f32 %v4971_v53, %v807_v16  ;;  %v560_v57 = vstv %s4964_s2  ;;  %v596_v16 = vstv %s4981_s27  ;;  %s4996_s2 = sld [smem:[#allocation64_spill]] }
 0x3a9   : > { %4970 = vst [vmem:[#allocation251_spill] sm:$0xff] %v3226_v45  ;;  %v555_v43 = vmul.f32 %v554_v28, %v552_v31  ;;  %v556_v53 = vmul.f32 %v554_v28, %v553_v8  ;;  %v559_v45 = vmul.f32 %v557_v51, %v553_v8  ;;  %v561_v21 = vmul.f32 %v560_v57, %v552_v31  ;;  %s5001_s27 = sld [smem:[#allocation52_spill]] }
 0x3aa   : > { %4973 = vst [vmem:[#allocation252_spill] sm:$0xff] %v3230_v48  ;;  %v558_v48 = vmul.f32 %v557_v51, %v552_v31  ;;  %v562_v50 = vmul.f32 %v560_v57, %v553_v8  ;;  %v4986_v51 = vmov %v4984_v62 }
 0x3ab   : > { %v3269_v29 = vmul.f32 %v4986_v51, %v845_v46  ;;  %v566_v60 = vadd.f32 %v3043_v27, %v555_v43  ;;  %v567_v31 = vadd.f32 %v3046_v59, %v556_v53  ;;  %v572_v57 = vadd.f32 %v3063_v63, %v559_v45 }
 0x3ac   : > { %v3249_v12 = vpop.permute.xlu0 %670  ;;  %v571_v8 = vadd.f32 %v3054_v54, %v558_v48  ;;  %v4989_v63 = vstv %s4936_s6  ;;  %s5003_s6 = sld [smem:[#allocation106_spill]] }
 0x3ad   : > { %v581_v22 = vpop.permute.xlu1 %580  ;;  %4987 = vst [vmem:[#allocation259_spill] sm:$0xff] %v3269_v29  ;;  %v3278_v29 = vpop.permute.xlu2 %999  ;;  %v3284_v45 = vmul.f32 %v4989_v63, %v844_v58 }
 0x3ae   : > { %v582_v47 = vsel %vm378_vm11, %v3030_v52, %v581_v22  ;;  %v583_v28 = vsel %vm378_vm11, %v581_v22, %v3030_v52 }
 0x3af   : > { %v584_v26 = vmul.f32 %v582_v47, %v2210_v14  ;;  %v585_v62 = vmul.f32 %v583_v28, %v2212_v15  ;;  %v576_v47 = vadd.f32 %v3066_v32, %v561_v21  ;;  %v577_v28 = vadd.f32 %v3069_v38, %v562_v50 }
 0x3b1   : > { %v587_v41 = vmul.f32 %v586_v7, %v584_v26  ;;  %v588_v52 = vmul.f32 %v586_v7, %v585_v62  ;;  %v592_v22 = vmul.f32 %v591_v3, %v584_v26  ;;  %v593_v51 = vmul.f32 %v591_v3, %v585_v62 }
 0x3b2   : > { %v597_v0 = vmul.f32 %v596_v16, %v584_v26  ;;  %v598_v27 = vmul.f32 %v596_v16, %v585_v62  ;;  %v4991_v3 = vmov %v4989_v63  ;;  %v4997_v26 = vstv %s4937_s8  ;;  %s5011_s8 = sld [smem:[#allocation58_spill]] }
 0x3b3   : > { %v589_v59 = vadd.f32 %v587_v41, %v566_v60  ;;  %v590_v43 = vadd.f32 %v588_v52, %v567_v31  ;;  %v594_v54 = vadd.f32 %v592_v22, %v571_v8  ;;  %v595_v48 = vadd.f32 %v593_v51, %v572_v57 }
 0x3b4   : > { %v3288_v53 = vmul.f32 %v4991_v3, %v845_v46  ;;  %v599_v32 = vadd.f32 %v597_v0, %v576_v47  ;;  %v600_v38 = vadd.f32 %v598_v27, %v577_v28  ;;  %v711_v7 = vpop.permute.xlu0 %710  ;;  %v3296_v62 = vmul.f32 %v4997_v26, %v844_v58 }
 0x3b5   : > { %v612_v21 = vadd.f32 %v3174_v44, %v589_v59  ;;  %v613_v60 = vadd.f32 %v3178_v18, %v590_v43  ;;  %v617_v41 = vadd.f32 %v3182_v6, %v594_v54  ;;  %v618_v50 = vadd.f32 %v3195_v23, %v595_v48  ;;  %v673_v16 = vpop.permute.xlu1 %672  ;;  %v3328_v54 = vpop.permute.xlu2 %907 }
 0x3b6   : > { %v4999_v31 = vmov %v4997_v26  ;;  %v622_v8 = vadd.f32 %v3199_v33, %v599_v32  ;;  %v623_v44 = vadd.f32 %v3203_v9, %v600_v38  ;;  %v716_v18 = vstv %s4988_s15  ;;  %s5004_s15 = sld [smem:[#allocation66_spill]] }
 0x3b7   : > { %v3300_v0 = vmul.f32 %v4999_v31, %v845_v46  ;;  %v721_v57 = vstv %s4990_s20  ;;  %v726_v6 = vstv %s4992_s0  ;;  %v678_v23 = vstv %s4993_s14  ;;  %s5005_s14 = sld [smem:[#allocation54_spill]] }
 0x3b8   : > { %v628_v52 = vadd.f32 %v2969_v11, %v613_v60  ;;  %v633_v58 = vadd.f32 %v2972_v5, %v618_v50  ;;  %v683_v22 = vstv %s4994_s11  ;;  %v688_v51 = vstv %s4995_s3  ;;  %s5006_s11 = sld [smem:[#allocation81_spill]] }
 0x3b9   : > { %v627_v46 = vadd.f32 %v2980_v39, %v612_v21  ;;  %v632_v33 = vadd.f32 %v2983_v42, %v617_v41  ;;  %v1007_v47 = vstv %s4996_s2  ;;  %v1012_v28 = vstv %s4998_s4  ;;  %s5007_s3 = sld [smem:[#allocation108_spill]] }
 0x3ba   : > { %v638_v9 = vadd.f32 %v2977_v30, %v623_v44  ;;  %v637_v27 = vadd.f32 %v2986_v36, %v622_v8  ;;  %v1017_v59 = vstv %s5000_s13  ;;  %v747_v43 = vstv %s5001_s27  ;;  %s5010_s0 = sld [smem:[#allocation114_spill]] }
 0x3bb   : > { %v712_v11 = vsel %vm378_vm11, %v3100_v49, %v711_v7  ;;  %v713_v5 = vsel %vm378_vm11, %v711_v7, %v3100_v49  ;;  %v752_v39 = vstv %s5002_s5  ;;  %v757_v42 = vstv %s5003_s6  ;;  %s5017_s5 = sld [smem:[#allocation85_spill]] }
 0x3bc   : > { %v651_v30 = vadd.f32 %v3122_v61, %v628_v52  ;;  %v656_v36 = vadd.f32 %v3126_v35, %v633_v58  ;;  %v674_v48 = vsel %vm345_vm10, %v3249_v12, %v673_v16  ;;  %v675_v63 = vsel %vm345_vm10, %v673_v16, %v3249_v12  ;;  %v1002_v7 = vpop.permute.xlu0 %1001  ;;  %s5018_s6 = sld [smem:[#allocation112_spill]] }
 0x3bd   : > { %v650_v49 = vadd.f32 %v3120_v20, %v627_v46  ;;  %v655_v3 = vadd.f32 %v3124_v17, %v632_v33  ;;  %v676_v32 = vmul.f32 %v675_v63, %v2198_v10  ;;  %v677_v38 = vmul.f32 %v674_v48, %v2206_v13  ;;  %v740_v61 = vpop.permute.xlu1 %739  ;;  %s5019_s2 = sld [smem:[#allocation61_spill]] }
 0x3be   : > { %v661_v35 = vadd.f32 %v3130_v34, %v638_v9  ;;  %v660_v21 = vadd.f32 %v3128_v55, %v637_v27  ;;  %v1045_v60 = vstv %s5004_s15  ;;  %v785_v41 = vstv %s5005_s14  ;;  %s5020_s4 = sld [smem:[#allocation88_spill]] }
 0x3bf   : > { %v679_v50 = vmul.f32 %v678_v23, %v676_v32  ;;  %v680_v26 = vmul.f32 %v678_v23, %v677_v38  ;;  %v684_v31 = vmul.f32 %v683_v22, %v676_v32  ;;  %v685_v12 = vmul.f32 %v683_v22, %v677_v38  ;;  %s5114_s13 = sld [smem:[#allocation194_spill]] }
 0x3c0   : > { %v714_v20 = vmul.f32 %v712_v11, %v2210_v14  ;;  %v715_v17 = vmul.f32 %v713_v5, %v2212_v15  ;;  %v689_v16 = vmul.f32 %v688_v51, %v676_v32  ;;  %v690_v8 = vmul.f32 %v688_v51, %v677_v38  ;;  %s5115_s14 = sld [smem:[#allocation181_spill]] }
 0x3c1   : > { %v681_v44 = vadd.f32 %v679_v50, %v650_v49  ;;  %v682_v52 = vadd.f32 %v680_v26, %v651_v30  ;;  %v686_v58 = vadd.f32 %v684_v31, %v655_v3  ;;  %v687_v46 = vadd.f32 %v685_v12, %v656_v36  ;;  %s5116_s15 = sld [smem:[#allocation143_spill]] }
 0x3c2   : > { %v691_v33 = vadd.f32 %v689_v16, %v660_v21  ;;  %v692_v34 = vadd.f32 %v690_v8, %v661_v35  ;;  %v1003_v55 = vsel %vm345_vm10, %v3278_v29, %v1002_v7  ;;  %v1004_v23 = vsel %vm345_vm10, %v1002_v7, %v3278_v29  ;;  %s5123_s20 = sld [smem:[#allocation190_spill]] }
 0x3c3   : > { %v696_v22 = vadd.f32 %v3092_v4, %v681_v44  ;;  %v697_v51 = vadd.f32 %v3095_v56, %v682_v52  ;;  %v701_v9 = vadd.f32 %v3098_v19, %v686_v58  ;;  %v702_v27 = vadd.f32 %v3103_v2, %v687_v46 }
 0x3c4   : > { %v706_v11 = vadd.f32 %v3106_v25, %v691_v33  ;;  %v707_v5 = vadd.f32 %v3109_v40, %v692_v34  ;;  %v743_v30 = vsel %vm345_vm10, %v740_v61, %v3208_v24  ;;  %v744_v29 = vsel %vm345_vm10, %v3208_v24, %v740_v61  ;;  %v778_v56 = vpop.permute.xlu0 %777  ;;  %v3376_v24 = vpop.permute.xlu2 %940  ;;  %v5012_v34 = vld [vmem:[#allocation235_spill] sm:$0xff] }
 0x3c5   : > { %v717_v4 = vmul.f32 %v716_v18, %v714_v20  ;;  %v718_v36 = vmul.f32 %v716_v18, %v715_v17  ;;  %v1038_v48 = vpop.permute.xlu1 %1037  ;;  %v790_v19 = vstv %s5006_s11  ;;  %v795_v2 = vstv %s5007_s3  ;;  %s5008_s11 = sld [smem:[#allocation60_spill]] }
 0x3c6   : > { %v722_v25 = vmul.f32 %v721_v57, %v714_v20  ;;  %v723_v40 = vmul.f32 %v721_v57, %v715_v17  ;;  %v727_v63 = vmul.f32 %v726_v6, %v714_v20  ;;  %v728_v49 = vmul.f32 %v726_v6, %v715_v17  ;;  %s5009_s3 = sld [smem:[#allocation87_spill]] }
 0x3c7   : > { %v1005_v18 = vmul.f32 %v1004_v23, %v2198_v10  ;;  %v1006_v3 = vmul.f32 %v1003_v55, %v2206_v13  ;;  %v745_v32 = vmul.f32 %v744_v29, %v2198_v10  ;;  %v746_v38 = vmul.f32 %v743_v30, %v2206_v13  ;;  %v5015_v30 = vld [vmem:[#allocation234_spill] sm:$0xff] }
 0x3c8   : > { %v720_v7 = vadd.f32 %v718_v36, %v697_v51  ;;  %v725_v61 = vadd.f32 %v723_v40, %v702_v27  ;;  %v719_v35 = vadd.f32 %v717_v4, %v696_v22  ;;  %v724_v57 = vadd.f32 %v722_v25, %v701_v9  ;;  %v5013_v9 = vld [vmem:[#allocation237_spill] sm:$0xff]  ;;  %v5016_v4 = vld [vmem:[#allocation236_spill] sm:$0xff] }
 0x3c9   : > { %v748_v6 = vmul.f32 %v747_v43, %v745_v32  ;;  %v749_v21 = vmul.f32 %v747_v43, %v746_v38  ;;  %v753_v50 = vmul.f32 %v752_v39, %v745_v32  ;;  %v754_v26 = vmul.f32 %v752_v39, %v746_v38 }
 0x3ca   : > { %v730_v31 = vadd.f32 %v728_v49, %v707_v5  ;;  %v729_v12 = vadd.f32 %v727_v63, %v706_v11  ;;  %v758_v20 = vmul.f32 %v757_v42, %v745_v32  ;;  %v759_v17 = vmul.f32 %v757_v42, %v746_v38  ;;  %v5014_v11 = vld [vmem:[#allocation233_spill] sm:$0xff] }
 0x3cb   : > { %v750_v16 = vadd.f32 %v748_v6, %v719_v35  ;;  %v751_v8 = vadd.f32 %v749_v21, %v720_v7  ;;  %v755_v44 = vadd.f32 %v753_v50, %v724_v57  ;;  %v756_v52 = vadd.f32 %v754_v26, %v725_v61 }
 0x3cc   : > { %v760_v58 = vadd.f32 %v758_v20, %v729_v12  ;;  %v761_v43 = vadd.f32 %v759_v17, %v730_v31  ;;  %v915_v46 = vstv %s5008_s11  ;;  %v920_v33 = vstv %s5009_s3  ;;  %v3400_v51 = vpop.permute.xlu0 %869  ;;  %v1040_v38 = vpop.permute.xlu2 %1039  ;;  %s5075_s3 = smov 112   ;;  %s5111_s11 = sld [smem:[#allocation154_spill]] }
 0x3cd   : > { %v766_v39 = vadd.f32 %v3078_v37, %v751_v8  ;;  %v771_v55 = vadd.f32 %v5012_v34, %v756_v52  ;;  %v780_v23 = vpop.permute.xlu1 %779  ;;  %v925_v22 = vstv %s5010_s0  ;;  %v877_v42 = vstv %s5011_s8  ;;  %v5023_v34 = vld [vmem:[#allocation252_spill] sm:$0xff]  ;;  %s5061_s0 = sld [smem:[#allocation121_spill]] }
 0x3ce   : > { %v776_v27 = vadd.f32 %v5013_v9, %v761_v43  ;;  %v765_v5 = vadd.f32 %v5014_v11, %v750_v16  ;;  %v770_v29 = vadd.f32 %v5015_v30, %v755_v44  ;;  %v775_v36 = vadd.f32 %v5016_v4, %v760_v58  ;;  %v5021_v58 = vld [vmem:[#allocation251_spill] sm:$0xff]  ;;  %s5089_s8 = sld [smem:[#allocation173_spill]] }
 0x3cf   : > { %v3408_v37 = vmul.f32 %v1007_v47, %v1005_v18  ;;  %v3412_v25 = vmul.f32 %v1007_v47, %v1006_v3  ;;  %v781_v40 = vsel %vm378_vm11, %v778_v56, %v780_v23  ;;  %v782_v63 = vsel %vm378_vm11, %v780_v23, %v778_v56 }
 0x3d0   : > { %v3420_v49 = vmul.f32 %v1012_v28, %v1005_v18  ;;  %v3424_v32 = vmul.f32 %v1012_v28, %v1006_v3  ;;  %v783_v7 = vmul.f32 %v781_v40, %v2210_v14  ;;  %v784_v47 = vmul.f32 %v782_v63, %v2212_v15  ;;  %v5031_v40 = vld [vmem:[#allocation222_spill] sm:$0xff] }
 0x3d1   : > { %v3430_v61 = vmul.f32 %v1017_v59, %v1005_v18  ;;  %v3434_v35 = vmul.f32 %v1017_v59, %v1006_v3  ;;  %v3438_v56 = vsel %vm378_vm11, %v1038_v48, %v1040_v38  ;;  %v3442_v57 = vsel %vm378_vm11, %v1040_v38, %v1038_v48  ;;  %v5032_v38 = vld [vmem:[#allocation224_spill] sm:$0xff] }
 0x3d2   : > { %v786_v28 = vmul.f32 %v785_v41, %v783_v7  ;;  %v787_v6 = vmul.f32 %v785_v41, %v784_v47  ;;  %v791_v21 = vmul.f32 %v790_v19, %v783_v7  ;;  %v792_v18 = vmul.f32 %v790_v19, %v784_v47  ;;  %v5025_v19 = vld [vmem:[#allocation254_spill] sm:$0xff] }
 0x3d3   : > { %v796_v50 = vmul.f32 %v795_v2, %v783_v7  ;;  %v797_v26 = vmul.f32 %v795_v2, %v784_v47  ;;  %v882_v59 = vstv %s5017_s5  ;;  %v887_v3 = vstv %s5018_s6  ;;  %v5026_v2 = vld [vmem:[#allocation255_spill] sm:$0xff]  ;;  %s5027_s5 = sld [smem:[#allocation90_spill]]  ;;  %v5033_v47 = vld [vmem:[#allocation221_spill] sm:$0xff] }
 0x3d4   : > { %v788_v31 = vadd.f32 %v786_v28, %v765_v5  ;;  %v789_v12 = vadd.f32 %v787_v6, %v766_v39  ;;  %v793_v20 = vadd.f32 %v791_v21, %v770_v29  ;;  %v794_v17 = vadd.f32 %v792_v18, %v771_v55  ;;  %v910_v11 = vpop.permute.xlu0 %909  ;;  %v5028_v39 = vld [vmem:[#allocation256_spill] sm:$0xff]  ;;  %s5029_s6 = sld [smem:[#allocation117_spill]]  ;;  %v5030_v5 = vld [vmem:[#allocation257_spill] sm:$0xff]  ;;  %v5034_v6 = vld [vmem:[#allocation223_spill] sm:$0xff] }
 0x3d5   : > { %v798_v16 = vadd.f32 %v796_v50, %v775_v36  ;;  %v799_v8 = vadd.f32 %v797_v26, %v776_v27  ;;  %v872_v48 = vpop.permute.xlu1 %871  ;;  %v946_v44 = vstv %s5019_s2  ;;  %v951_v52 = vstv %s5020_s4  ;;  %v5035_v26 = vld [vmem:[#allocation226_spill] sm:$0xff]  ;;  %s5052_s2 = sld [smem:[#allocation120_spill]] }
 0x3d6   : > { %v811_v43 = vadd.f32 %v5021_v58, %v788_v31  ;;  %v812_v41 = vadd.f32 %v5023_v34, %v789_v12  ;;  %v816_v23 = vadd.f32 %v5025_v19, %v793_v20  ;;  %v817_v9 = vadd.f32 %v5026_v2, %v794_v17  ;;  %v5037_v19 = vld [vmem:[#allocation259_spill] sm:$0xff]  ;;  %s5053_s4 = sld [smem:[#allocation69_spill]] }
 0x3d7   : > { %v821_v55 = vadd.f32 %v5028_v39, %v798_v16  ;;  %v822_v27 = vadd.f32 %v5030_v5, %v799_v8  ;;  %v911_v30 = vsel %vm378_vm11, %v3328_v54, %v910_v11  ;;  %v912_v29 = vsel %vm378_vm11, %v910_v11, %v3328_v54  ;;  %v5036_v54 = vld [vmem:[#allocation225_spill] sm:$0xff] }
 0x3d8   : > { %v913_v4 = vmul.f32 %v911_v30, %v2210_v14  ;;  %v914_v36 = vmul.f32 %v912_v29, %v2212_v15  ;;  %v827_v63 = vadd.f32 %v5031_v40, %v812_v41  ;;  %v832_v7 = vadd.f32 %v5032_v38, %v817_v9  ;;  %v5038_v9 = vld [vmem:[#allocation258_spill] sm:$0xff] }
 0x3d9   : > { %v826_v28 = vadd.f32 %v5033_v47, %v811_v43  ;;  %v831_v21 = vadd.f32 %v5034_v6, %v816_v23  ;;  %v956_v18 = vstv %s5022_s9  ;;  %v984_v50 = vstv %s5024_s10  ;;  %s5051_s9 = sld [smem:[#allocation93_spill]] }
 0x3da   : > { %v837_v31 = vadd.f32 %v5035_v26, %v822_v27  ;;  %v836_v12 = vadd.f32 %v5036_v54, %v821_v55  ;;  %v989_v20 = vstv %s5027_s5  ;;  %v994_v17 = vstv %s5029_s6  ;;  %s5076_s5 = sld [smem:[#allocation209_spill]]  ;;  %s5077_s6 = smov 16  }
 0x3db   : > { %v916_v16 = vmul.f32 %v915_v46, %v913_v4  ;;  %v917_v8 = vmul.f32 %v915_v46, %v914_v36  ;;  %v921_v58 = vmul.f32 %v920_v33, %v913_v4  ;;  %v922_v34 = vmul.f32 %v920_v33, %v914_v36  ;;  %s5090_s10 = sld [smem:[#allocation200_spill]] }
 0x3dc   : > { %v926_v43 = vmul.f32 %v925_v22, %v913_v4  ;;  %v927_v41 = vmul.f32 %v925_v22, %v914_v36  ;;  %v850_v23 = vadd.f32 %v5037_v19, %v827_v63  ;;  %v855_v2 = vadd.f32 %v3288_v53, %v832_v7  ;;  %v977_v27 = vpop.permute.xlu0 %976 }
 0x3dd   : > { %v849_v11 = vadd.f32 %v5038_v9, %v826_v28  ;;  %v854_v39 = vadd.f32 %v3284_v45, %v831_v21  ;;  %v873_v46 = vsel %vm345_vm10, %v3400_v51, %v872_v48  ;;  %v874_v33 = vsel %vm345_vm10, %v872_v48, %v3400_v51  ;;  %v939_v55 = vpop.permute.xlu1 %938  ;;  %v5040_v9 = vld [vmem:[#allocation239_spill] sm:$0xff] }
 0x3de   : > { %v875_v22 = vmul.f32 %v874_v33, %v2198_v10  ;;  %v876_v5 = vmul.f32 %v873_v46, %v2206_v13  ;;  %v942_v53 = vsel %vm345_vm10, %v939_v55, %v3376_v24  ;;  %v943_v45 = vsel %vm345_vm10, %v3376_v24, %v939_v55  ;;  %v5041_v33 = vld [vmem:[#allocation240_spill] sm:$0xff]  ;;  %v5042_v55 = vld [vmem:[#allocation241_spill] sm:$0xff] }
 0x3df   : > { %v860_v30 = vadd.f32 %v3300_v0, %v837_v31  ;;  %v859_v29 = vadd.f32 %v3296_v62, %v836_v12  ;;  %v944_v51 = vmul.f32 %v943_v45, %v2198_v10  ;;  %v945_v48 = vmul.f32 %v942_v53, %v2206_v13  ;;  %v5039_v12 = vld [vmem:[#allocation238_spill] sm:$0xff] }
 0x3e0   : > { %v878_v4 = vmul.f32 %v877_v42, %v875_v22  ;;  %v879_v36 = vmul.f32 %v877_v42, %v876_v5  ;;  %v883_v40 = vmul.f32 %v882_v59, %v875_v22  ;;  %v884_v63 = vmul.f32 %v882_v59, %v876_v5 }
 0x3e1   : > { %v888_v38 = vmul.f32 %v887_v3, %v875_v22  ;;  %v889_v7 = vmul.f32 %v887_v3, %v876_v5  ;;  %v947_v47 = vmul.f32 %v946_v44, %v944_v51  ;;  %v948_v28 = vmul.f32 %v946_v44, %v945_v48  ;;  %v5043_v22 = vld [vmem:[#allocation242_spill] sm:$0xff]  ;;  %v5044_v5 = vld [vmem:[#allocation243_spill] sm:$0xff] }
 0x3e2   : > { %v880_v6 = vadd.f32 %v878_v4, %v849_v11  ;;  %v881_v24 = vadd.f32 %v879_v36, %v850_v23  ;;  %v885_v21 = vadd.f32 %v883_v40, %v854_v39  ;;  %v886_v0 = vadd.f32 %v884_v63, %v855_v2 }
 0x3e3   : > { %v890_v26 = vadd.f32 %v888_v38, %v859_v29  ;;  %v891_v62 = vadd.f32 %v889_v7, %v860_v30  ;;  %v952_v31 = vmul.f32 %v951_v52, %v944_v51  ;;  %v953_v54 = vmul.f32 %v951_v52, %v945_v48  ;;  %v5047_v7 = vld [vmem:[#allocation244_spill] sm:$0xff] }
 0x3e4   : > { %v895_v19 = vadd.f32 %v5039_v12, %v880_v6  ;;  %v896_v46 = vadd.f32 %v5040_v9, %v881_v24  ;;  %v900_v42 = vadd.f32 %v5041_v33, %v885_v21  ;;  %v901_v59 = vadd.f32 %v5042_v55, %v886_v0  ;;  %v5049_v24 = vld [vmem:[#allocation249_spill] sm:$0xff]  ;;  %v5050_v0 = vld [vmem:[#allocation248_spill] sm:$0xff] }
 0x3e5   : > { %v905_v3 = vadd.f32 %v5043_v22, %v890_v26  ;;  %v906_v44 = vadd.f32 %v5044_v5, %v891_v62  ;;  %v957_v11 = vmul.f32 %v956_v18, %v944_v51  ;;  %v958_v23 = vmul.f32 %v956_v18, %v945_v48  ;;  %v979_v39 = vpop.permute.xlu1 %978 }
 0x3e6   : > { %v919_v2 = vadd.f32 %v917_v8, %v896_v46  ;;  %v924_v53 = vadd.f32 %v922_v34, %v901_v59  ;;  %v918_v45 = vadd.f32 %v916_v16, %v895_v19  ;;  %v923_v30 = vadd.f32 %v921_v58, %v900_v42  ;;  %v1069_v8 = vpop.permute.xlu0 %1068 }
 0x3e7   : > { %v929_v52 = vadd.f32 %v927_v41, %v906_v44  ;;  %v928_v29 = vadd.f32 %v926_v43, %v905_v3  ;;  %v980_v4 = vsel %vm378_vm11, %v977_v27, %v979_v39  ;;  %v981_v36 = vsel %vm378_vm11, %v979_v39, %v977_v27  ;;  %v5045_v41 = vld [vmem:[#allocation245_spill] sm:$0xff]  ;;  %v5046_v27 = vld [vmem:[#allocation247_spill] sm:$0xff] }
 0x3e8   : > { %v949_v40 = vadd.f32 %v947_v47, %v918_v45  ;;  %v950_v63 = vadd.f32 %v948_v28, %v919_v2  ;;  %v954_v51 = vadd.f32 %v952_v31, %v923_v30  ;;  %v955_v18 = vadd.f32 %v953_v54, %v924_v53  ;;  %v5048_v28 = vld [vmem:[#allocation246_spill] sm:$0xff]  ;;  %v5054_v53 = vld [vmem:[#allocation219_spill] sm:$0xff] }
 0x3e9   : > { %v959_v16 = vadd.f32 %v957_v11, %v928_v29  ;;  %v960_v58 = vadd.f32 %v958_v23, %v929_v52  ;;  %v982_v34 = vmul.f32 %v980_v4, %v2210_v14  ;;  %v983_v43 = vmul.f32 %v981_v36, %v2212_v15  ;;  %v5060_v4 = vld [vmem:[#allocation228_spill] sm:$0xff] }
 0x3ea   : > { %v965_v48 = vadd.f32 %v5045_v41, %v950_v63  ;;  %v970_v38 = vadd.f32 %v5046_v27, %v955_v18  ;;  %v964_v47 = vadd.f32 %v5047_v7, %v949_v40  ;;  %v969_v6 = vadd.f32 %v5048_v28, %v954_v51  ;;  %v5065_v41 = vld [vmem:[#allocation232_spill] sm:$0xff] }
 0x3eb   : > { %v975_v21 = vadd.f32 %v5049_v24, %v960_v58  ;;  %v974_v26 = vadd.f32 %v5050_v0, %v959_v16  ;;  %v985_v62 = vmul.f32 %v984_v50, %v982_v34  ;;  %v986_v31 = vmul.f32 %v984_v50, %v983_v43  ;;  %v5064_v16 = vld [vmem:[#allocation229_spill] sm:$0xff] }
 0x3ec   : > { %v990_v54 = vmul.f32 %v989_v20, %v982_v34  ;;  %v991_v12 = vmul.f32 %v989_v20, %v983_v43  ;;  %v995_v19 = vmul.f32 %v994_v17, %v982_v34  ;;  %v996_v9 = vmul.f32 %v994_v17, %v983_v43  ;;  %v1107_v34 = vpop.permute.xlu2 %1106 }
 0x3ed   : > { %v1043_v46 = vmul.f32 %v3438_v56, %v2210_v14  ;;  %v1044_v33 = vmul.f32 %v3442_v57, %v2212_v15  ;;  %v987_v42 = vadd.f32 %v985_v62, %v964_v47  ;;  %v988_v55 = vadd.f32 %v986_v31, %v965_v48  ;;  %v1071_v51 = vpop.permute.xlu1 %1070 }
 0x3ee   : > { %v992_v50 = vadd.f32 %v990_v54, %v969_v6  ;;  %v993_v59 = vadd.f32 %v991_v12, %v970_v38  ;;  %v997_v22 = vadd.f32 %v995_v19, %v974_v26  ;;  %v998_v20 = vadd.f32 %v996_v9, %v975_v21  ;;  %v5066_v38 = vld [vmem:[#allocation231_spill] sm:$0xff] }
 0x3ef   : > { %v1050_v3 = vstv %s5051_s9  ;;  %v1055_v5 = vstv %s5052_s2  ;;  %v1010_v17 = vadd.f32 %v3408_v37, %v987_v42  ;;  %v1011_v44 = vadd.f32 %v3412_v25, %v988_v55  ;;  %s5056_s9 = sld [smem:[#allocation67_spill]]  ;;  %v5057_v37 = vld [vmem:[#allocation220_spill] sm:$0xff] }
 0x3f0   : > { %v1015_v56 = vadd.f32 %v3420_v49, %v992_v50  ;;  %v1016_v11 = vadd.f32 %v3424_v32, %v993_v59  ;;  %v1020_v57 = vadd.f32 %v3430_v61, %v997_v22  ;;  %v1021_v23 = vadd.f32 %v3434_v35, %v998_v20  ;;  %s5059_s2 = sld [smem:[#allocation94_spill]]  ;;  %v1109_v32 = vpop.permute.xlu0 %1108  ;;  %v5062_v35 = vld [vmem:[#allocation230_spill] sm:$0xff] }
 0x3f1   : > { %v1046_v39 = vmul.f32 %v1045_v60, %v1043_v46  ;;  %v1047_v2 = vmul.f32 %v1045_v60, %v1044_v33  ;;  %v5055_v45 = vstv %s4942_s16  ;;  %v1051_v29 = vmul.f32 %v1050_v3, %v1043_v46  ;;  %v5063_v60 = vld [vmem:[#allocation227_spill] sm:$0xff]  ;;  %s5118_s16 = sld [smem:[#allocation170_spill]] }
 0x3f2   : > { %v1097_v30 = vmul.f32 %v5055_v45, %v5054_v53  ;;  %v5058_v52 = vmov %v5055_v45  ;;  %v1052_v49 = vmul.f32 %v1050_v3, %v1044_v33  ;;  %v1026_v61 = vadd.f32 %v5060_v4, %v1011_v44 }
 0x3f3   : > { %v1098_v25 = vmul.f32 %v5058_v52, %v5057_v37  ;;  %v1031_v36 = vadd.f32 %v5062_v35, %v1016_v11  ;;  %v1056_v40 = vmul.f32 %v1055_v5, %v1043_v46  ;;  %v1057_v63 = vmul.f32 %v1055_v5, %v1044_v33 }
 0x3f4   : > { %v1025_v18 = vadd.f32 %v5063_v60, %v1010_v17  ;;  %v1030_v58 = vadd.f32 %v5064_v16, %v1015_v56  ;;  %v1114_v43 = vstv %s5053_s4  ;;  %v1036_v48 = vadd.f32 %v5065_v41, %v1021_v23  ;;  %s5070_s4 = sld [smem:[#allocation96_spill]] }
 0x3f5   : > { %v1076_v27 = vstv %s5056_s9  ;;  %v1035_v7 = vadd.f32 %v5066_v38, %v1020_v57  ;;  %v1110_v47 = vsel %vm378_vm11, %v1107_v34, %v1109_v32  ;;  %v1111_v28 = vsel %vm378_vm11, %v1109_v32, %v1107_v34  ;;  %v5072_v32 = vld [vmem:[#allocation253_spill] sm:$0xff]  ;;  %s5073_s9 = sld [smem:[#allocation208_spill]] }
 0x3f6   : > { %v1081_v6 = vstv %s5059_s2  ;;  %v1086_v24 = vstv %s5061_s0  ;;  %v1049_v21 = vadd.f32 %v1047_v2, %v1026_v61  ;;  %v1054_v0 = vadd.f32 %v1052_v49, %v1031_v36  ;;  %s5069_s0 = sld [smem:[#allocation207_spill]] }
 0x3f7   : > { %v1072_v26 = vsel %vm345_vm10, %v1069_v8, %v1071_v51  ;;  %v1073_v62 = vsel %vm345_vm10, %v1071_v51, %v1069_v8  ;;  %v1048_v31 = vadd.f32 %v1046_v39, %v1025_v18  ;;  %v1053_v54 = vadd.f32 %v1051_v29, %v1030_v58  ;;  %v5071_v29 = vld [vmem:[#allocation250_spill] sm:$0xff]  ;;  %s5074_s2 = sld [smem:[#allocation123_spill]] }
 0x3f8   : > { %v1074_v12 = vmul.f32 %v1073_v62, %v2198_v10  ;;  %v1075_v19 = vmul.f32 %v1072_v26, %v2206_v13  ;;  %v1112_v9 = vmul.f32 %v1110_v47, %v2210_v14  ;;  %v1113_v46 = vmul.f32 %v1111_v28, %v2212_v15 }
 0x3f9   : > { %v1059_v33 = vadd.f32 %v1057_v63, %v1036_v48  ;;  %v1058_v42 = vadd.f32 %v1056_v40, %v1035_v7  ;;  %v5067_v20 = vstv %s4943_s17  ;;  %v1135_v7 = vstv %s5076_s5  ;;  %s5083_s5 = sld [smem:[#allocation155_spill]] }
 0x3fa   : > { %v1077_v55 = vmul.f32 %v1076_v27, %v1074_v12  ;;  %v1078_v50 = vmul.f32 %v1076_v27, %v1075_v19  ;;  %v1082_v59 = vmul.f32 %v1081_v6, %v1074_v12  ;;  %v1083_v22 = vmul.f32 %v1081_v6, %v1075_v19  ;;  %s5120_s17 = sld [smem:[#allocation197_spill]] }
 0x3fb   : > { %v1102_v3 = vmul.f32 %v5067_v20, %v5054_v53  ;;  %v5068_v8 = vmov %v5067_v20  ;;  %v1087_v17 = vmul.f32 %v1086_v24, %v1074_v12  ;;  %v1088_v44 = vmul.f32 %v1086_v24, %v1075_v19 }
 0x3fc   : > { %v1103_v5 = vmul.f32 %v5068_v8, %v5057_v37  ;;  %v1079_v56 = vadd.f32 %v1077_v55, %v1048_v31  ;;  %v1080_v11 = vadd.f32 %v1078_v50, %v1049_v21  ;;  %v1084_v57 = vadd.f32 %v1082_v59, %v1053_v54  ;;  %v5078_v54 = vld [vmem:[#allocation23_spill] sm:$0xff]  ;;  %v5081_v8 = vld [vmem:[#allocation26_spill] sm:$0xff] }
 0x3fd   : > { %v1085_v23 = vadd.f32 %v1083_v22, %v1054_v0  ;;  %v1115_v39 = vmul.f32 %v1114_v43, %v1112_v9  ;;  %v1116_v2 = vmul.f32 %v1114_v43, %v1113_v46  ;;  %v1089_v45 = vadd.f32 %v1087_v17, %v1058_v42  ;;  %v5080_v42 = vld [vmem:[#allocation25_spill] sm:$0xff] }
 0x3fe   : > { %v1090_v52 = vadd.f32 %v1088_v44, %v1059_v33  ;;  %v1094_v49 = vadd.f32 %v5071_v29, %v1079_v56  ;;  %v1095_v4 = vadd.f32 %v5072_v32, %v1080_v11  ;;  %v1099_v53 = vadd.f32 %v1097_v30, %v1084_v57 }
 0x3ff   : > { %v1100_v61 = vadd.f32 %v1098_v25, %v1085_v23  ;;  %v1129_v35 = vstv %s5069_s0  ;;  %v1104_v37 = vadd.f32 %v1102_v3, %v1089_v45  ;;  %v1119_v51 = vstv %s5070_s4  ;;  %s5085_s0 = sld [smem:[#allocation137_spill]] }
 0x400   : > { %v1105_v36 = vadd.f32 %v1103_v5, %v1090_v52  ;;  %v1117_v40 = vadd.f32 %v1115_v39, %v1094_v49  ;;  %v1118_v63 = vadd.f32 %v1116_v2, %v1095_v4  ;;  %v1121_v16 = vmul.f32 %v1119_v51, %v1113_v46  ;;  %s5086_s4 = sld [smem:[#allocation164_spill]] }
 0x401   : > { %v1120_v30 = vmul.f32 %v1119_v51, %v1112_v9  ;;  %v1132_v58 = vstv %s5073_s9  ;;  %v1124_v43 = vstv %s5074_s2  ;;  %s5087_s9 = sld [smem:[#allocation191_spill]] }
 0x402   : > { %v3598_v60 = vadd.f32 %v1129_v35, %v1117_v40  ;;  %v3600_v18 = vadd.f32 %v1129_v35, %v1118_v63  ;;  %v1123_v25 = vadd.f32 %v1121_v16, %v1100_v61  ;;  %v1125_v27 = vmul.f32 %v1124_v43, %v1112_v9  ;;  %s5088_s2 = sld [smem:[#allocation146_spill]] }
 0x403   : > { %v1122_v34 = vadd.f32 %v1120_v30, %v1099_v53  ;;  %v1126_v28 = vmul.f32 %v1124_v43, %v1113_v46  ;;  %v5079_v46 = vld [vmem:[#allocation22_spill] sm:$0xff] }
 0x404   : > { %1264 = vrot.lane.b32.xlu0 %v3600_v18, %s5075_s3  ;;  %1140 = vrot.lane.b32.xlu2 %v3600_v18, %s5077_s6  ;;  %v3610_v41 = vadd.f32 %v1132_v58, %v1123_v25  ;;  %v1127_v38 = vadd.f32 %v1125_v27, %v1104_v37  ;;  %v1229_v25 = vstv %s5083_s5  ;;  %s5099_s5 = sld [smem:[#allocation185_spill]] }
 0x405   : > { %1138 = vrot.lane.b32.xlu1 %v3598_v60, %s5077_s6  ;;  %v3612_v48 = vadd.f32 %v1132_v58, %v1122_v34  ;;  %v1128_v6 = vadd.f32 %v1126_v28, %v1105_v36  ;;  %v1423_v34 = vstv %s5085_s0  ;;  %v1627_v28 = vstv %s5089_s8  ;;  %s5095_s8 = sld [smem:[#allocation131_spill]] }
 0x406   : > { %v3621_v47 = vadd.f32 %v1135_v7, %v1127_v38  ;;  %v1428_v43 = vstv %s5086_s4  ;;  %s5103_s0 = sld [smem:[#allocation161_spill]] }
 0x407   : > { %v3629_v24 = vadd.f32 %v1135_v7, %v1128_v6  ;;  %v1433_v38 = vstv %s5087_s9  ;;  %v1632_v6 = vstv %s5090_s10  ;;  %s5093_s10 = sld [smem:[#allocation179_spill]] }
 0x408   : > { %v1622_v7 = vstv %s5088_s2  ;;  %s5105_s4 = sld [smem:[#allocation188_spill]] }
 0x409   : > { %s5107_s9 = sld [smem:[#allocation140_spill]] }
 0x40a   : > { %s5109_s2 = sld [smem:[#allocation127_spill]] }
 0x40c   : > { %1463 = vrot.lane.b32.xlu0 %v3610_v41, %s5075_s3  ;;  %1262 = vrot.lane.b32.xlu2 %v3598_v60, %s5075_s3 }
 0x40d   : > { %1331 = vrot.lane.b32.xlu1 %v3612_v48, %s5077_s6 }
 0x414   : > { %1201 = vrot.lane.b32.xlu0 %v3598_v60, %s4881_s21  ;;  %1333 = vrot.lane.b32.xlu2 %v3610_v41, %s5077_s6 }
 0x415   : > { %1530 = vrot.lane.b32.xlu1 %v3621_v47, %s5077_s6 }
 0x41c   : > { %1662 = vrot.lane.b32.xlu0 %v3629_v24, %s5075_s3  ;;  %1461 = vrot.lane.b32.xlu2 %v3612_v48, %s5075_s3 }
 0x41d   : > { %1203 = vrot.lane.b32.xlu1 %v3600_v18, %s4881_s21 }
 0x424   : > { %1402 = vrot.lane.b32.xlu0 %v3610_v41, %s4881_s21  ;;  %1532 = vrot.lane.b32.xlu2 %v3629_v24, %s5077_s6  ;;  %s5084_s6 = sld [smem:[#allocation182_spill]] }
 0x425   : > { %1239 = vrot.lane.b32.xlu1 %v3598_v60, %s4884_s7 }
 0x42a   : > { %v1234_v58 = vstv %s5084_s6  ;;  %s5101_s6 = sld [smem:[#allocation134_spill]] }
 0x42c   : > { %1660 = vrot.lane.b32.xlu2 %v3621_v47, %s5075_s3  ;;  %s5082_s3 = sld [smem:[#allocation128_spill]] }
 0x42d   : > { %1438 = vrot.lane.b32.xlu1 %v3612_v48, %s4884_s7 }
 0x432   : > { %v1224_v30 = vstv %s5082_s3  ;;  %s5097_s3 = sld [smem:[#allocation158_spill]] }
 0x434   : > { %1241 = vrot.lane.b32.xlu2 %v3600_v18, %s4884_s7 }
 0x43c   : > { %1400 = vrot.lane.b32.xlu2 %v3612_v48, %s4881_s21 }
 0x444   : > { %1440 = vrot.lane.b32.xlu2 %v3610_v41, %s4884_s7 }
 0x45e   : > { %v1141_v21 = vpop.permute.xlu2 %1140 }
 0x466   : > { %v1263_v0 = vpop.permute.xlu2 %1262 }
 0x46e   : > { %v1334_v50 = vpop.permute.xlu2 %1333 }
 0x476   : > { %v1265_v26 = vpop.permute.xlu0 %1264  ;;  %v1462_v44 = vpop.permute.xlu2 %1461 }
 0x477   : > { %v1266_v62 = vsel %vm463_vm9, %v1263_v0, %v1265_v26  ;;  %v1139_v31 = vpop.permute.xlu1 %1138  ;;  %v1267_v3 = vsel %vm463_vm9, %v1265_v26, %v1263_v0  ;;  %v3790_v0 = vmul.f32 %v1229_v25, %v3600_v18  ;;  %v3793_v26 = vmul.f32 %v1234_v58, %v3600_v18 }
 0x478   : > { %v3656_v12 = vmul.f32 %v1266_v62, %v5078_v54  ;;  %v1142_v19 = vsel %vm336_vm8, %v1139_v31, %v1141_v21  ;;  %v1143_v9 = vsel %vm336_vm8, %v1141_v21, %v1139_v31  ;;  %v3688_v5 = vmul.f32 %v1267_v3, %v5081_v8 }
 0x479   : > { %v3663_v33 = vmul.f32 %v1143_v9, %v5079_v46  ;;  %v3666_v55 = vmul.f32 %v1142_v19, %v5080_v42  ;;  %v3787_v21 = vmul.f32 %v1224_v30, %v3600_v18  ;;  %v3796_v62 = vmul.f32 %v1224_v30, %v3598_v60 }
 0x47a   : > { %1308 = vrot.lane.b32.xlu2 %v3656_v12, %s4884_s7  ;;  %v3799_v31 = vmul.f32 %v1229_v25, %v3598_v60  ;;  %v3805_v19 = vmul.f32 %v1423_v34, %v3612_v48  ;;  %v3808_v9 = vmul.f32 %v1423_v34, %v3610_v41  ;;  %v3811_v18 = vmul.f32 %v1428_v43, %v3612_v48 }
 0x47b   : > { %1146 = vrot.lane.b32.xlu0 %v3663_v33, %s4881_s21  ;;  %1148 = vrot.lane.b32.xlu1 %v3666_v55, %s4881_s21  ;;  %v1561_v30 = vstv %s5116_s15  ;;  %v1566_v25 = vstv %s5118_s16  ;;  %s5131_s15 = sld [smem:[#allocation192_spill]] }
 0x47c   : > { %5094 = vst [vmem:[#allocation235_spill] sm:$0xff] %v3805_v19  ;;  %s5132_s16 = sld [smem:[#allocation203_spill]] }
 0x47d   : > { %5096 = vst [vmem:[#allocation237_spill] sm:$0xff] %v3808_v9 }
 0x47e   : > { %v1464_v17 = vpop.permute.xlu0 %1463  ;;  %v1533_v2 = vpop.permute.xlu2 %1532  ;;  %5098 = vst [vmem:[#allocation233_spill] sm:$0xff] %v3811_v18 }
 0x47f   : > { %v1332_v59 = vpop.permute.xlu1 %1331  ;;  %v1465_v56 = vsel %vm463_vm9, %v1462_v44, %v1464_v17  ;;  %v1466_v32 = vsel %vm463_vm9, %v1464_v17, %v1462_v44  ;;  %v3839_v17 = vmul.f32 %v1632_v6, %v3621_v47  ;;  %v3842_v44 = vmul.f32 %v1632_v6, %v3629_v24 }
 0x480   : > { %v1335_v22 = vsel %vm336_vm8, %v1332_v59, %v1334_v50  ;;  %v1336_v11 = vsel %vm336_vm8, %v1334_v50, %v1332_v59  ;;  %v3701_v57 = vmul.f32 %v1465_v56, %v5078_v54  ;;  %v3736_v61 = vmul.f32 %v1466_v32, %v5081_v8 }
 0x481   : > { %v3677_v20 = vmul.f32 %v1335_v22, %v5080_v42  ;;  %v3704_v23 = vmul.f32 %v1336_v11, %v5079_v46  ;;  %v3823_v50 = vmul.f32 %v1622_v7, %v3621_v47  ;;  %v3826_v59 = vmul.f32 %v1622_v7, %v3629_v24  ;;  %5117 = vst [vmem:[#allocation257_spill] sm:$0xff] %v3839_v17 }
 0x482   : > { %v3829_v22 = vmul.f32 %v1627_v28, %v3621_v47  ;;  %5119 = vst [vmem:[#allocation222_spill] sm:$0xff] %v3842_v44  ;;  %v1173_v56 = vstv %s5093_s10  ;;  %v1293_v11 = vstv %s5095_s8  ;;  %v1372_v32 = vstv %s5105_s4  ;;  %s5128_s10 = sld [smem:[#allocation183_spill]] }
 0x483   : > { %1178 = vrot.lane.b32.xlu0 %v3663_v33, %s4884_s7  ;;  %1180 = vrot.lane.b32.xlu1 %v3666_v55, %s4884_s7  ;;  %5106 = vst [vmem:[#allocation252_spill] sm:$0xff] %v3823_v50  ;;  %v3865_v6 = vmul.f32 %v1293_v11, %v3656_v12  ;;  %v3895_v34 = vmul.f32 %v1173_v56, %v3663_v33  ;;  %s5176_s8 = sld [smem:[#allocation151_spill]] }
 0x484   : > { %1341 = vrot.lane.b32.xlu2 %v3677_v20, %s4881_s21  ;;  %5108 = vst [vmem:[#allocation254_spill] sm:$0xff] %v3826_v59  ;;  %v3898_v17 = vmul.f32 %v1173_v56, %v3666_v55  ;;  %v3943_v59 = vmul.f32 %v1372_v32, %v3704_v23  ;;  %s5187_s4 = sld [smem:[#allocation130_spill]] }
 0x485   : > { %5110 = vst [vmem:[#allocation255_spill] sm:$0xff] %v3829_v22 }
 0x486   : > { %v3714_v52 = vpop.permute.xlu0 %1201  ;;  %v1661_v4 = vpop.permute.xlu2 %1660  ;;  %5140 = vst [vmem:[#allocation238_spill] sm:$0xff] %v3943_v59 }
 0x487   : > { %v1531_v39 = vpop.permute.xlu1 %1530 }
 0x488   : > { %v1534_v45 = vsel %vm336_vm8, %v1531_v39, %v1533_v2  ;;  %v1535_v37 = vsel %vm336_vm8, %v1533_v2, %v1531_v39  ;;  %v1298_v39 = vstv %s5097_s3  ;;  %v1303_v2 = vstv %s5099_s5  ;;  %s5179_s3 = sld [smem:[#allocation178_spill]] }
 0x489   : > { %v3717_v29 = vmul.f32 %v1534_v45, %v5080_v42  ;;  %v3750_v36 = vmul.f32 %v1535_v37, %v5079_v46  ;;  %v3814_v46 = vmul.f32 %v1428_v43, %v3610_v41  ;;  %v3820_v42 = vmul.f32 %v1433_v38, %v3610_v41  ;;  %s5181_s5 = sld [smem:[#allocation126_spill]] }
 0x48a   : > { %v1362_v45 = vstv %s5101_s6  ;;  %v1497_v37 = vstv %s5113_s12  ;;  %s5129_s12 = sld [smem:[#allocation138_spill]]  ;;  %v3880_v43 = vmul.f32 %v1298_v39, %v3688_v5  ;;  %v3904_v44 = vmul.f32 %v1303_v2, %v3688_v5 }
 0x48b   : > { %1270 = vrot.lane.b32.xlu0 %v3656_v12, %s4881_s21  ;;  %1272 = vrot.lane.b32.xlu1 %v3688_v5, %s4881_s21  ;;  %5100 = vst [vmem:[#allocation234_spill] sm:$0xff] %v3814_v46  ;;  %s5183_s6 = sld [smem:[#allocation153_spill]] }
 0x48c   : > { %1599 = vrot.lane.b32.xlu2 %v3621_v47, %s4881_s21  ;;  %5104 = vst [vmem:[#allocation251_spill] sm:$0xff] %v3820_v42  ;;  %v1701_v42 = vstv %s5132_s16  ;;  %s5202_s16 = sld [smem:[#allocation159_spill]] }
 0x48e   : > { %v1663_v49 = vpop.permute.xlu0 %1662  ;;  %v3765_v51 = vpop.permute.xlu2 %1241 }
 0x48f   : > { %v1664_v53 = vsel %vm463_vm9, %v1661_v4, %v1663_v49  ;;  %v1665_v40 = vsel %vm463_vm9, %v1663_v49, %v1661_v4  ;;  %v3780_v27 = vpop.permute.xlu1 %1203  ;;  %v1367_v49 = vstv %s5103_s0  ;;  %v1492_v4 = vstv %s5107_s9  ;;  %s5185_s0 = sld [smem:[#allocation180_spill]] }
 0x490   : > { %v3739_v35 = vmul.f32 %v1664_v53, %v5078_v54  ;;  %v3763_v63 = vmul.f32 %v1665_v40, %v5081_v8  ;;  %v3802_v54 = vmul.f32 %v1234_v58, %v3598_v60  ;;  %v3817_v60 = vmul.f32 %v1433_v38, %v3612_v48  ;;  %s5190_s9 = sld [smem:[#allocation157_spill]] }
 0x491   : > { %v3832_v48 = vmul.f32 %v1627_v28, %v3629_v24  ;;  %v1571_v58 = vstv %s5120_s17  ;;  %v3868_v53 = vmul.f32 %v1293_v11, %v3688_v5  ;;  %v3911_v18 = vmul.f32 %v1492_v4, %v3701_v57  ;;  %s5174_s17 = sld [smem:[#allocation124_spill]] }
 0x492   : > { %5102 = vst [vmem:[#allocation236_spill] sm:$0xff] %v3817_v60  ;;  %v3940_v60 = vmul.f32 %v1367_v49, %v3677_v20  ;;  %v5186_v19 = vstv %s5129_s12  ;;  %s5265_s12 = sld [smem:[#allocation148_spill]] }
 0x493   : > { %1310 = vrot.lane.b32.xlu0 %v3688_v5, %s4884_s7  ;;  %1339 = vrot.lane.b32.xlu1 %v3704_v23, %s4881_s21  ;;  %5112 = vst [vmem:[#allocation256_spill] sm:$0xff] %v3832_v48  ;;  %v1206_v5 = vsel %vm345_vm10, %v3780_v27, %v3714_v52 }
 0x494   : > { %1507 = vrot.lane.b32.xlu2 %v3701_v57, %s4884_s7  ;;  %5133 = vst [vmem:[#allocation224_spill] sm:$0xff] %v3911_v18 }
 0x495   : > { %5139 = vst [vmem:[#allocation258_spill] sm:$0xff] %v3940_v60 }
 0x496   : > { %v3773_v16 = vpop.permute.xlu2 %1400  ;;  %v1403_v56 = vpop.permute.xlu0 %1402 }
 0x497   : > { %v1240_v7 = vpop.permute.xlu1 %1239 }
 0x49b   : > { %1601 = vrot.lane.b32.xlu0 %v3629_v24, %s4881_s21  ;;  %1637 = vrot.lane.b32.xlu1 %v3621_v47, %s4884_s7  ;;  %v3871_v47 = vmul.f32 %v1298_v39, %v3656_v12  ;;  %v3901_v39 = vmul.f32 %v1303_v2, %v3656_v12  ;;  %v1205_v12 = vsel %vm345_vm10, %v3714_v52, %v3780_v27 }
 0x49c   : > { %1540 = vrot.lane.b32.xlu2 %v3717_v29, %s4881_s21  ;;  %v3931_v2 = vmul.f32 %v1362_v45, %v3704_v23 }
 0x49e   : > { %v3834_v3 = vpop.permute.xlu2 %1440  ;;  %5137 = vst [vmem:[#allocation225_spill] sm:$0xff] %v3931_v2 }
 0x4a3   : > { %1377 = vrot.lane.b32.xlu0 %v3704_v23, %s4884_s7  ;;  %1379 = vrot.lane.b32.xlu1 %v3677_v20, %s4884_s7 }
 0x4a4   : > { %1639 = vrot.lane.b32.xlu2 %v3629_v24, %s4884_s7  ;;  %v1502_v24 = vstv %s5114_s13  ;;  %s5130_s13 = sld [smem:[#allocation165_spill]] }
 0x4a5   : > { %v3949_v52 = vmul.f32 %v1502_v24, %v3701_v57  ;;  %v3952_v27 = vmul.f32 %v1502_v24, %v3736_v61  ;;  %v3972_v24 = vmul.f32 %v1566_v25, %v3717_v29 }
 0x4a7   : > { %5142 = vst [vmem:[#allocation240_spill] sm:$0xff] %v3949_v52 }
 0x4a8   : > { %5143 = vst [vmem:[#allocation241_spill] sm:$0xff] %v3952_v27  ;;  %v5175_v27 = vstv %s5126_s22 }
 0x4a9   : > { %5147 = vst [vmem:[#allocation247_spill] sm:$0xff] %v3972_v24 }
 0x4aa   : > { %v5192_v9 = vstv %s5130_s13 }
 0x4ab   : > { %1469 = vrot.lane.b32.xlu0 %v3701_v57, %s4881_s21  ;;  %1471 = vrot.lane.b32.xlu1 %v3736_v61, %s4881_s21 }
 0x4ac   : > { %1706 = vrot.lane.b32.xlu2 %v3739_v35, %s4884_s7 }
 0x4b3   : > { %1509 = vrot.lane.b32.xlu0 %v3736_v61, %s4884_s7  ;;  %1538 = vrot.lane.b32.xlu1 %v3750_v36, %s4881_s21 }
 0x4bb   : > { %1576 = vrot.lane.b32.xlu0 %v3750_v36, %s4884_s7  ;;  %1578 = vrot.lane.b32.xlu1 %v3717_v29, %s4884_s7 }
 0x4c3   : > { %1668 = vrot.lane.b32.xlu0 %v3739_v35, %s4881_s21  ;;  %1670 = vrot.lane.b32.xlu1 %v3763_v63, %s4881_s21  ;;  %s5091_s21 = sld [smem:[#allocation125_spill]] }
 0x4c9   : > { %v1163_v41 = vstv %s5091_s21  ;;  %s5124_s21 = sld [smem:[#allocation149_spill]] }
 0x4ca   : > { %v3877_v38 = vmul.f32 %v1163_v41, %v3663_v33  ;;  %v3886_v11 = vmul.f32 %v1163_v41, %v3666_v55  ;;  %v3946_v41 = vmul.f32 %v1372_v32, %v3677_v20  ;;  %v3969_v32 = vmul.f32 %v1566_v25, %v3750_v36 }
 0x4cb   : > { %1708 = vrot.lane.b32.xlu0 %v3763_v63, %s4884_s7  ;;  %s5092_s7 = sld [smem:[#allocation152_spill]] }
 0x4cc   : > { %5141 = vst [vmem:[#allocation239_spill] sm:$0xff] %v3946_v41 }
 0x4cd   : > { %5146 = vst [vmem:[#allocation245_spill] sm:$0xff] %v3969_v32  ;;  %v5158_v32 = vstv %s5115_s14 }
 0x4cf   : > { %v1691_v28 = vstv %s5124_s21  ;;  %s5197_s21 = sld [smem:[#allocation184_spill]] }
 0x4d0   : > { %v3987_v25 = vmul.f32 %v1691_v28, %v3739_v35 }
 0x4d1   : > { %v1168_v8 = vstv %s5092_s7  ;;  %s5125_s7 = sld [smem:[#allocation176_spill]] }
 0x4d2   : > { %v3889_v50 = vmul.f32 %v1168_v8, %v3663_v33  ;;  %v3892_v48 = vmul.f32 %v1168_v8, %v3666_v55  ;;  %v3914_v8 = vmul.f32 %v1492_v4, %v3736_v61  ;;  %v3917_v33 = vmul.f32 %v1497_v37, %v3701_v57  ;;  %5150 = vst [vmem:[#allocation249_spill] sm:$0xff] %v3987_v25 }
 0x4d3   : > { %v3920_v55 = vmul.f32 %v1497_v37, %v3736_v61  ;;  %v3934_v4 = vmul.f32 %v1362_v45, %v3677_v20  ;;  %v3937_v37 = vmul.f32 %v1367_v49, %v3704_v23  ;;  %v3955_v45 = vmul.f32 %v1561_v30, %v3750_v36  ;;  %v1439_v61 = vpop.permute.xlu1 %1438 }
 0x4d4   : > { %v3883_v22 = vpop.permute.xlu2 %1308  ;;  %5134 = vst [vmem:[#allocation221_spill] sm:$0xff] %v3914_v8  ;;  %v1207_v49 = vmul.f32 %v1206_v5, %v2198_v10  ;;  %v1208_v23 = vmul.f32 %v1205_v12, %v2206_v13  ;;  %v1404_v20 = vsel %vm345_vm10, %v3773_v16, %v1403_v56  ;;  %v1405_v57 = vsel %vm345_vm10, %v1403_v56, %v3773_v16 }
 0x4d5   : > { %5135 = vst [vmem:[#allocation223_spill] sm:$0xff] %v3917_v33  ;;  %v3978_v12 = vmul.f32 %v1571_v58, %v3717_v29  ;;  %v1243_v16 = vsel %vm378_vm11, %v1240_v7, %v3765_v51  ;;  %v1244_v5 = vsel %vm378_vm11, %v3765_v51, %v1240_v7  ;;  %v1406_v56 = vmul.f32 %v1405_v57, %v2198_v10 }
 0x4d6   : > { %5136 = vst [vmem:[#allocation226_spill] sm:$0xff] %v3920_v55  ;;  %v3958_v55 = vmul.f32 %v1561_v30, %v3717_v29  ;;  %v3975_v30 = vmul.f32 %v1571_v58, %v3750_v36  ;;  %v3990_v36 = vmul.f32 %v1691_v28, %v3763_v63  ;;  %v1407_v29 = vmul.f32 %v1404_v20, %v2206_v13 }
 0x4d7   : > { %v1696_v40 = vstv %s5125_s7  ;;  %5138 = vst [vmem:[#allocation259_spill] sm:$0xff] %v3937_v37  ;;  %v5154_v7 = vstv %s5109_s2  ;;  %v1442_v20 = vsel %vm378_vm11, %v1439_v61, %v3834_v3  ;;  %v1443_v57 = vsel %vm378_vm11, %v3834_v3, %v1439_v61  ;;  %s5200_s7 = sld [smem:[#allocation132_spill]] }
 0x4d8   : > { %5144 = vst [vmem:[#allocation242_spill] sm:$0xff] %v3955_v45  ;;  %v4000_v51 = vmul.f32 %v1696_v40, %v3763_v63  ;;  %v4004_v25 = vmul.f32 %v5154_v7, %v1207_v49  ;;  %v4028_v24 = vmul.f32 %v5158_v32, %v1207_v49  ;;  %v5159_v45 = vmov %v5158_v32  ;;  %s5203_s2 = sld [smem:[#allocation186_spill]] }
 0x4d9   : > { %5145 = vst [vmem:[#allocation243_spill] sm:$0xff] %v3958_v55  ;;  %v4032_v55 = vmul.f32 %v5159_v45, %v1208_v23  ;;  %v4035_v3 = vmul.f32 %v1701_v42, %v3739_v35  ;;  %v4038_v61 = vmul.f32 %v1701_v42, %v3763_v63  ;;  %v1445_v45 = vmul.f32 %v1443_v57, %v2212_v15 }
 0x4da   : > { %5148 = vst [vmem:[#allocation244_spill] sm:$0xff] %v3975_v30  ;;  %v3997_v30 = vmul.f32 %v1696_v40, %v3739_v35  ;;  %v5166_v35 = vstv %s5122_s19  ;;  %v5170_v32 = vstv %s5123_s20 }
 0x4db   : > { %5149 = vst [vmem:[#allocation246_spill] sm:$0xff] %v3978_v12  ;;  %v5155_v12 = vmov %v5154_v7  ;;  %v5168_v63 = vmov %v5166_v35 }
 0x4dc   : > { %5151 = vst [vmem:[#allocation248_spill] sm:$0xff] %v3990_v36  ;;  %v4008_v28 = vmul.f32 %v5155_v12, %v1208_v23  ;;  %v1245_v12 = vmul.f32 %v1243_v16, %v2210_v14  ;;  %v1246_v36 = vmul.f32 %v1244_v5, %v2212_v15  ;;  %v4056_v42 = vmul.f32 %v5168_v63, %v1407_v29 }
 0x4dd   : > { %5152 = vst [vmem:[#allocation219_spill] sm:$0xff] %v3997_v30  ;;  %v5156_v30 = vstv %s5111_s11  ;;  %s5234_s11 = sld [smem:[#allocation141_spill]] }
 0x4de   : > { %v3994_v58 = vpop.permute.xlu2 %1341  ;;  %5153 = vst [vmem:[#allocation220_spill] sm:$0xff] %v4000_v51  ;;  %v4018_v40 = vmul.f32 %v5156_v30, %v1207_v49  ;;  %v5157_v7 = vmov %v5156_v30  ;;  %v5162_v30 = vstv %s5121_s18  ;;  %v1444_v49 = vmul.f32 %v1442_v20, %v2210_v14 }
 0x4df   : > { %v4022_v51 = vmul.f32 %v5157_v7, %v1208_v23  ;;  %5160 = vst [vmem:[#allocation228_spill] sm:$0xff] %v4035_v3  ;;  %v4042_v16 = vmul.f32 %v5162_v30, %v1406_v56  ;;  %v5164_v7 = vmov %v5162_v30  ;;  %v4052_v23 = vmul.f32 %v5166_v35, %v1406_v56 }
 0x4e0   : > { %5161 = vst [vmem:[#allocation230_spill] sm:$0xff] %v4038_v61  ;;  %v4046_v5 = vmul.f32 %v5164_v7, %v1407_v29  ;;  %v4060_v30 = vmul.f32 %v5170_v32, %v1406_v56  ;;  %v5172_v61 = vmov %v5170_v32  ;;  %v4068_v57 = vmul.f32 %v5175_v27, %v1245_v12 }
 0x4e1   : > { %5163 = vst [vmem:[#allocation227_spill] sm:$0xff] %v4042_v16  ;;  %v4064_v7 = vmul.f32 %v5172_v61, %v1407_v29  ;;  %v5177_v35 = vmov %v5175_v27  ;;  %v5178_v61 = vstv %s5127_s23  ;;  %v5182_v27 = vstv %s5128_s10  ;;  %s5231_s10 = sld [smem:[#allocation166_spill]] }
 0x4e2   : > { %5165 = vst [vmem:[#allocation229_spill] sm:$0xff] %v4046_v5  ;;  %v4072_v52 = vmul.f32 %v5177_v35, %v1246_v36  ;;  %v4080_v63 = vmul.f32 %v5178_v61, %v1245_v12  ;;  %v5180_v32 = vmov %v5178_v61  ;;  %v4088_v8 = vmul.f32 %v5182_v27, %v1245_v12 }
 0x4e3   : > { %5167 = vst [vmem:[#allocation232_spill] sm:$0xff] %v4052_v23  ;;  %v4084_v33 = vmul.f32 %v5180_v32, %v1246_v36  ;;  %v5184_v35 = vmov %v5182_v27  ;;  %v4096_v46 = vmul.f32 %v5186_v19, %v1444_v49  ;;  %v5194_v12 = vmov %v5192_v9 }
 0x4e4   : > { %5169 = vst [vmem:[#allocation231_spill] sm:$0xff] %v4056_v42  ;;  %v4092_v18 = vmul.f32 %v5184_v35, %v1246_v36  ;;  %v4110_v27 = vmul.f32 %v5194_v12, %v1445_v45  ;;  %v1154_v36 = vstv %s5174_s17  ;;  %v1157_v35 = vstv %s5176_s8  ;;  %s5204_s17 = sld [smem:[#allocation133_spill]] }
 0x4e5   : > { %5171 = vst [vmem:[#allocation250_spill] sm:$0xff] %v4060_v30  ;;  %v5196_v30 = vstv %s5131_s15  ;;  %s5205_s8 = sld [smem:[#allocation160_spill]] }
 0x4e6   : > { %5173 = vst [vmem:[#allocation253_spill] sm:$0xff] %v4064_v7  ;;  %v4106_v7 = vmul.f32 %v5192_v9, %v1444_v49  ;;  %v1186_v9 = vstv %s5181_s5  ;;  %s5207_s5 = sld [smem:[#allocation145_spill]] }
 0x4e7   : > { %5188 = vst [vmem:[#allocation260_spill] sm:$0xff] %v4096_v46  ;;  %v5199_v46 = vmov %v5196_v30 }
 0x4e8   : > { %5193 = vst [vmem:[#allocation262_spill] sm:$0xff] %v4106_v7  ;;  %v1191_v7 = vstv %s5183_s6  ;;  %s5208_s6 = sld [smem:[#allocation172_spill]] }
 0x4e9   : > { %5195 = vst [vmem:[#allocation263_spill] sm:$0xff] %v4110_v27 }
 0x4ed   : > { %v1147_v3 = vpop.permute.xlu0 %1146  ;;  %v1149_v20 = vpop.permute.xlu1 %1148 }
 0x4ee   : > { %v1150_v56 = vsel %vm345_vm10, %v1147_v3, %v1149_v20  ;;  %v1151_v29 = vsel %vm345_vm10, %v1149_v20, %v1147_v3  ;;  %v5189_v3 = vmov %v5186_v19  ;;  %v4116_v19 = vmul.f32 %v5196_v30, %v1444_v49 }
 0x4ef   : > { %v4100_v20 = vmul.f32 %v5189_v3, %v1445_v45  ;;  %v1152_v61 = vmul.f32 %v1151_v29, %v2198_v10  ;;  %v1153_v32 = vmul.f32 %v1150_v56, %v2206_v13  ;;  %v4120_v3 = vmul.f32 %v5199_v46, %v1445_v45  ;;  %v4122_v29 = vpop.permute.xlu2 %1599 }
 0x4f0   : > { %5198 = vst [vmem:[#allocation264_spill] sm:$0xff] %v4116_v19  ;;  %v1160_v56 = vstv %s5179_s3  ;;  %v1288_v46 = vstv %s5197_s21  ;;  %s5206_s3 = sld [smem:[#allocation187_spill]] }
 0x4f1   : > { %5191 = vst [vmem:[#allocation261_spill] sm:$0xff] %v4100_v20  ;;  %v1196_v20 = vstv %s5185_s0  ;;  %v1155_v42 = vmul.f32 %v1154_v36, %v1152_v61  ;;  %v1156_v23 = vmul.f32 %v1154_v36, %v1153_v32  ;;  %v1158_v49 = vmul.f32 %v1157_v35, %v1152_v61  ;;  %s5209_s0 = sld [smem:[#allocation199_spill]] }
 0x4f2   : > { %5201 = vst [vmem:[#allocation265_spill] sm:$0xff] %v4120_v3  ;;  %v1159_v30 = vmul.f32 %v1157_v35, %v1153_v32  ;;  %v1161_v59 = vmul.f32 %v1160_v56, %v1152_v61  ;;  %v1162_v37 = vmul.f32 %v1160_v56, %v1153_v32  ;;  %s5214_s21 = sld [smem:[#allocation147_spill]] }
 0x4f3   : > { %v1166_v60 = vadd.f32 %v3877_v38, %v1155_v42  ;;  %v1167_v45 = vadd.f32 %v3886_v11, %v1156_v23  ;;  %v1171_v16 = vadd.f32 %v3889_v50, %v1158_v49 }
 0x4f4   : > { %v1172_v61 = vadd.f32 %v3892_v48, %v1159_v30  ;;  %v1607_v30 = vstv %s5207_s5  ;;  %s5244_s5 = sld [smem:[#allocation144_spill]] }
 0x4f5   : > { %v1179_v19 = vpop.permute.xlu0 %1178  ;;  %v1181_v5 = vpop.permute.xlu1 %1180 }
 0x4f6   : > { %v1182_v2 = vsel %vm378_vm11, %v1179_v19, %v1181_v5  ;;  %v1183_v27 = vsel %vm378_vm11, %v1181_v5, %v1179_v19  ;;  %v1357_v49 = vstv %s5206_s3  ;;  %s5233_s3 = sld [smem:[#allocation193_spill]] }
 0x4f7   : > { %v1184_v12 = vmul.f32 %v1182_v2, %v2210_v14  ;;  %v1185_v36 = vmul.f32 %v1183_v27, %v2212_v15  ;;  %v1176_v2 = vadd.f32 %v3895_v34, %v1161_v59  ;;  %v1177_v27 = vadd.f32 %v3898_v17, %v1162_v37  ;;  %v4148_v23 = vpop.permute.xlu2 %1507 }
 0x4f9   : > { %v1187_v32 = vmul.f32 %v1186_v9, %v1184_v12  ;;  %v1188_v56 = vmul.f32 %v1186_v9, %v1185_v36  ;;  %v1192_v3 = vmul.f32 %v1191_v7, %v1184_v12  ;;  %v1193_v5 = vmul.f32 %v1191_v7, %v1185_v36 }
 0x4fa   : > { %v1197_v19 = vmul.f32 %v1196_v20, %v1184_v12  ;;  %v1198_v35 = vmul.f32 %v1196_v20, %v1185_v36  ;;  %v5210_v36 = vstv %s5187_s4  ;;  %s5215_s4 = sld [smem:[#allocation174_spill]] }
 0x4fb   : > { %v1189_v41 = vadd.f32 %v1187_v32, %v1166_v60  ;;  %v1190_v38 = vadd.f32 %v1188_v56, %v1167_v45  ;;  %v1194_v42 = vadd.f32 %v1192_v3, %v1171_v16  ;;  %v1195_v11 = vadd.f32 %v1193_v5, %v1172_v61 }
 0x4fc   : > { %v1199_v50 = vadd.f32 %v1197_v19, %v1176_v2  ;;  %v1200_v48 = vadd.f32 %v1198_v35, %v1177_v27  ;;  %v5211_v35 = vmov %v5210_v36  ;;  %v5212_v32 = vstv %s5190_s9  ;;  %s5229_s9 = sld [smem:[#allocation189_spill]] }
 0x4fd   : > { %v1212_v9 = vadd.f32 %v4004_v25, %v1189_v41  ;;  %v1213_v7 = vadd.f32 %v4008_v28, %v1190_v38  ;;  %v1217_v59 = vadd.f32 %v4018_v40, %v1194_v42  ;;  %v1218_v17 = vadd.f32 %v4022_v51, %v1195_v11  ;;  %v1271_v34 = vpop.permute.xlu0 %1270  ;;  %v1273_v37 = vpop.permute.xlu1 %1272 }
 0x4fe   : > { %v1222_v60 = vadd.f32 %v4028_v24, %v1199_v50  ;;  %v1223_v16 = vadd.f32 %v4032_v55, %v1200_v48  ;;  %v1274_v20 = vsel %vm345_vm10, %v1271_v34, %v1273_v37  ;;  %v1275_v3 = vsel %vm345_vm10, %v1273_v37, %v1271_v34 }
 0x4ff   : > { %v1228_v41 = vadd.f32 %v3787_v21, %v1213_v7  ;;  %v1233_v25 = vadd.f32 %v3790_v0, %v1218_v17  ;;  %v1227_v51 = vadd.f32 %v3796_v62, %v1212_v9  ;;  %v1232_v24 = vadd.f32 %v3799_v31, %v1217_v59 }
 0x500   : > { %v1238_v55 = vadd.f32 %v3793_v26, %v1223_v16  ;;  %v1237_v28 = vadd.f32 %v3802_v54, %v1222_v60  ;;  %v1276_v40 = vmul.f32 %v1275_v3, %v2198_v10  ;;  %v1277_v12 = vmul.f32 %v1274_v20, %v2206_v13 }
 0x501   : > { %v1251_v21 = vadd.f32 %v4072_v52, %v1228_v41  ;;  %v1256_v45 = vadd.f32 %v4084_v33, %v1233_v25  ;;  %v1250_v0 = vadd.f32 %v4068_v57, %v1227_v51  ;;  %v1255_v62 = vadd.f32 %v4080_v63, %v1232_v24 }
 0x502   : > { %v1261_v31 = vadd.f32 %v4092_v18, %v1238_v55  ;;  %v1260_v26 = vadd.f32 %v4088_v8, %v1237_v28  ;;  %v1279_v54 = vmul.f32 %v5210_v36, %v1276_v40  ;;  %v1280_v61 = vmul.f32 %v5211_v35, %v1277_v12  ;;  %v4186_v8 = vpop.permute.xlu2 %1540 }
 0x503   : > { %v1284_v56 = vmul.f32 %v5212_v32, %v1276_v40  ;;  %v5213_v5 = vmov %v5212_v32  ;;  %v1289_v27 = vmul.f32 %v1288_v46, %v1276_v40  ;;  %v1290_v52 = vmul.f32 %v1288_v46, %v1277_v12 }
 0x504   : > { %v1285_v2 = vmul.f32 %v5213_v5, %v1277_v12  ;;  %v1281_v19 = vadd.f32 %v1279_v54, %v1250_v0  ;;  %v1282_v33 = vadd.f32 %v1280_v61, %v1251_v21  ;;  %v1612_v38 = vstv %s5208_s6  ;;  %s5260_s6 = sld [smem:[#allocation198_spill]] }
 0x505   : > { %v1617_v57 = vstv %s5209_s0  ;;  %v1286_v42 = vadd.f32 %v1284_v56, %v1255_v62  ;;  %v1291_v11 = vadd.f32 %v1289_v27, %v1260_v26  ;;  %v1292_v18 = vadd.f32 %v1290_v52, %v1261_v31  ;;  %v1311_v50 = vpop.permute.xlu0 %1310  ;;  %v1340_v59 = vpop.permute.xlu1 %1339  ;;  %s5243_s0 = sld [smem:[#allocation196_spill]] }
 0x506   : > { %v1287_v63 = vadd.f32 %v1285_v2, %v1256_v45  ;;  %v1296_v48 = vadd.f32 %v3865_v6, %v1281_v19  ;;  %v1297_v9 = vadd.f32 %v3868_v53, %v1282_v33  ;;  %v1312_v46 = vsel %vm378_vm11, %v3883_v22, %v1311_v50 }
 0x507   : > { %v1313_v7 = vsel %vm378_vm11, %v1311_v50, %v3883_v22  ;;  %v1301_v17 = vadd.f32 %v3871_v47, %v1286_v42  ;;  %v1306_v53 = vadd.f32 %v3901_v39, %v1291_v11  ;;  %v1307_v34 = vadd.f32 %v3904_v44, %v1292_v18 }
 0x508   : > { %v1302_v6 = vadd.f32 %v3880_v43, %v1287_v63  ;;  %v1314_v37 = vmul.f32 %v1312_v46, %v2210_v14  ;;  %v1315_v60 = vmul.f32 %v1313_v7, %v2212_v15  ;;  %v1343_v22 = vsel %vm345_vm10, %v1340_v59, %v3994_v58 }
 0x509   : > { %v1344_v47 = vsel %vm345_vm10, %v3994_v58, %v1340_v59  ;;  %v1346_v39 = vmul.f32 %v1343_v22, %v2206_v13  ;;  %v1645_v16 = vstv %s5214_s21  ;;  %v1650_v44 = vstv %s5215_s4  ;;  %s5226_s21 = sld [smem:[#allocation201_spill]] }
 0x50a   : > { %v1345_v43 = vmul.f32 %v1344_v47, %v2198_v10  ;;  %v5216_v20 = vstv %s5200_s7  ;;  %v5218_v51 = vstv %s5202_s16  ;;  %v5220_v40 = vstv %s5203_s2  ;;  %s5227_s2 = sld [smem:[#allocation135_spill]]  ;;  %v1640_v46 = vpop.permute.xlu2 %1639 }
 0x50b   : > { %v1317_v3 = vmul.f32 %v5216_v20, %v1314_v37  ;;  %v5217_v41 = vmov %v5216_v20  ;;  %v1322_v24 = vmul.f32 %v5218_v51, %v1314_v37  ;;  %v5219_v55 = vmov %v5218_v51  ;;  %s5228_s7 = sld [smem:[#allocation162_spill]]  ;;  %v5236_v51 = vld [vmem:[#allocation225_spill] sm:$0xff] }
 0x50c   : > { %v1318_v25 = vmul.f32 %v5217_v41, %v1315_v60  ;;  %v1323_v28 = vmul.f32 %v5219_v55, %v1315_v60  ;;  %v1327_v12 = vmul.f32 %v5220_v40, %v1314_v37  ;;  %v5221_v58 = vmov %v5220_v40  ;;  %v5237_v55 = vld [vmem:[#allocation259_spill] sm:$0xff]  ;;  %v5238_v40 = vld [vmem:[#allocation238_spill] sm:$0xff]  ;;  %s5258_s4 = sld [smem:[#allocation171_spill]] }
 0x50d   : > { %v1328_v21 = vmul.f32 %v5221_v58, %v1315_v60  ;;  %v5222_v45 = vstv %s5204_s17  ;;  %v1319_v26 = vadd.f32 %v1317_v3, %v1296_v48  ;;  %v1324_v54 = vadd.f32 %v1322_v24, %v1301_v17  ;;  %v1602_v52 = vpop.permute.xlu0 %1601  ;;  %v1638_v11 = vpop.permute.xlu1 %1637 }
 0x50e   : > { %v1348_v0 = vmul.f32 %v5222_v45, %v1345_v43  ;;  %v5223_v62 = vmov %v5222_v45  ;;  %v1320_v36 = vadd.f32 %v1318_v25, %v1297_v9  ;;  %v1325_v35 = vadd.f32 %v1323_v28, %v1302_v6  ;;  %v5235_v25 = vld [vmem:[#allocation239_spill] sm:$0xff] }
 0x50f   : > { %v1349_v31 = vmul.f32 %v5223_v62, %v1346_v39  ;;  %v1329_v61 = vadd.f32 %v1327_v12, %v1306_v53  ;;  %v1330_v32 = vadd.f32 %v1328_v21, %v1307_v34  ;;  %v5224_v56 = vstv %s5205_s8  ;;  %s5230_s8 = sld [smem:[#allocation139_spill]] }
 0x510   : > { %v1353_v5 = vmul.f32 %v5224_v56, %v1345_v43  ;;  %v5225_v2 = vmov %v5224_v56  ;;  %v1350_v19 = vadd.f32 %v1348_v0, %v1319_v26  ;;  %v1358_v42 = vmul.f32 %v1357_v49, %v1345_v43 }
 0x511   : > { %v1354_v27 = vmul.f32 %v5225_v2, %v1346_v39  ;;  %v1351_v33 = vadd.f32 %v1349_v31, %v1320_v36  ;;  %v1359_v63 = vmul.f32 %v1357_v49, %v1346_v39  ;;  %v1603_v48 = vsel %vm345_vm10, %v4122_v29, %v1602_v52 }
 0x512   : > { %v1355_v18 = vadd.f32 %v1353_v5, %v1324_v54  ;;  %v1604_v9 = vsel %vm345_vm10, %v1602_v52, %v4122_v29  ;;  %v1360_v7 = vadd.f32 %v1358_v42, %v1329_v61  ;;  %v1606_v17 = vmul.f32 %v1603_v48, %v2206_v13  ;;  %v5232_v29 = vld [vmem:[#allocation258_spill] sm:$0xff] }
 0x513   : > { %v1356_v50 = vadd.f32 %v1354_v27, %v1325_v35  ;;  %v1361_v59 = vadd.f32 %v1359_v63, %v1330_v32  ;;  %v1605_v49 = vmul.f32 %v1604_v9, %v2198_v10  ;;  %v1641_v6 = vsel %vm378_vm11, %v1638_v11, %v1640_v46 }
 0x514   : > { %v1642_v53 = vsel %vm378_vm11, %v1640_v46, %v1638_v11  ;;  %v1366_v34 = vadd.f32 %v3934_v4, %v1351_v33  ;;  %v1655_v60 = vstv %s5226_s21  ;;  %v1385_v22 = vstv %s5227_s2  ;;  %s5239_s2 = sld [smem:[#allocation168_spill]] }
 0x515   : > { %v1371_v37 = vadd.f32 %v5232_v29, %v1356_v50  ;;  %v1390_v47 = vstv %s5228_s7  ;;  %v1395_v43 = vstv %s5229_s9  ;;  %v1643_v39 = vmul.f32 %v1641_v6, %v2210_v14  ;;  %v1378_v45 = vpop.permute.xlu0 %1377  ;;  %s5240_s9 = sld [smem:[#allocation195_spill]]  ;;  %v1380_v35 = vpop.permute.xlu1 %1379 }
 0x516   : > { %v1644_v20 = vmul.f32 %v1642_v53, %v2212_v15  ;;  %v1477_v3 = vstv %s5230_s8  ;;  %v1482_v41 = vstv %s5231_s10  ;;  %v1376_v4 = vadd.f32 %v5235_v25, %v1361_v59  ;;  %s5241_s7 = sld [smem:[#allocation142_spill]] }
 0x517   : > { %v1365_v24 = vadd.f32 %v5236_v51, %v1350_v19  ;;  %v1370_v28 = vadd.f32 %v5237_v55, %v1355_v18  ;;  %v1375_v12 = vadd.f32 %v5238_v40, %v1360_v7  ;;  %v4264_v58 = vmul.f32 %v1607_v30, %v1605_v49  ;;  %s5242_s21 = sld [smem:[#allocation169_spill]]  ;;  %v5249_v40 = vld [vmem:[#allocation250_spill] sm:$0xff] }
 0x518   : > { %v4268_v21 = vmul.f32 %v1607_v30, %v1606_v17  ;;  %v1487_v0 = vstv %s5233_s3  ;;  %v1515_v62 = vstv %s5234_s11  ;;  %v4274_v31 = vmul.f32 %v1612_v38, %v1605_v49  ;;  %s5267_s8 = sld [smem:[#allocation175_spill]] }
 0x519   : > { %v4278_v26 = vmul.f32 %v1612_v38, %v1606_v17  ;;  %v4282_v36 = vmul.f32 %v1617_v57, %v1605_v49  ;;  %v4286_v54 = vmul.f32 %v1617_v57, %v1606_v17  ;;  %v4288_v30 = vmul.f32 %v1645_v16, %v1643_v39  ;;  %s5274_s3 = sld [smem:[#allocation150_spill]] }
 0x51a   : > { %v4290_v61 = vmul.f32 %v1645_v16, %v1644_v20  ;;  %v1381_v32 = vsel %vm378_vm11, %v1378_v45, %v1380_v35  ;;  %v1382_v56 = vsel %vm378_vm11, %v1380_v35, %v1378_v45  ;;  %v4298_v38 = vmul.f32 %v1650_v44, %v1643_v39  ;;  %v5252_v35 = vld [vmem:[#allocation234_spill] sm:$0xff] }
 0x51b   : > { %v4302_v5 = vmul.f32 %v1650_v44, %v1644_v20  ;;  %v1383_v57 = vmul.f32 %v1381_v32, %v2210_v14  ;;  %v1384_v2 = vmul.f32 %v1382_v56, %v2212_v15  ;;  %v4306_v16 = vmul.f32 %v1655_v60, %v1643_v39  ;;  %v5253_v56 = vld [vmem:[#allocation235_spill] sm:$0xff] }
 0x51c   : > { %v4308_v27 = vmul.f32 %v1655_v60, %v1644_v20  ;;  %v1520_v52 = vstv %s5239_s2  ;;  %v1525_v19 = vstv %s5240_s9  ;;  %v1546_v44 = vstv %s5241_s7  ;;  %v5245_v60 = vld [vmem:[#allocation227_spill] sm:$0xff]  ;;  %v5246_v20 = vld [vmem:[#allocation229_spill] sm:$0xff]  ;;  %s5273_s2 = sld [smem:[#allocation202_spill]] }
 0x51d   : > { %v1386_v33 = vmul.f32 %v1385_v22, %v1383_v57  ;;  %v1387_v42 = vmul.f32 %v1385_v22, %v1384_v2  ;;  %v1391_v63 = vmul.f32 %v1390_v47, %v1383_v57  ;;  %v1392_v11 = vmul.f32 %v1390_v47, %v1384_v2  ;;  %v1470_v6 = vpop.permute.xlu0 %1469  ;;  %v5247_v22 = vld [vmem:[#allocation232_spill] sm:$0xff]  ;;  %v5248_v47 = vld [vmem:[#allocation231_spill] sm:$0xff]  ;;  %s5280_s7 = sld [smem:[#allocation204_spill]] }
 0x51e   : > { %v1396_v18 = vmul.f32 %v1395_v43, %v1383_v57  ;;  %v1397_v50 = vmul.f32 %v1395_v43, %v1384_v2  ;;  %v1551_v48 = vstv %s5242_s21  ;;  %v1556_v53 = vstv %s5243_s0  ;;  %v1472_v43 = vpop.permute.xlu1 %1471  ;;  %v5254_v2 = vld [vmem:[#allocation233_spill] sm:$0xff]  ;;  %s5278_s0 = sld [smem:[#allocation177_spill]] }
 0x51f   : > { %v1388_v9 = vadd.f32 %v1386_v33, %v1365_v24  ;;  %v1389_v46 = vadd.f32 %v1387_v42, %v1366_v34  ;;  %v1393_v7 = vadd.f32 %v1391_v63, %v1370_v28  ;;  %v1394_v59 = vadd.f32 %v1392_v11, %v1371_v37  ;;  %v5250_v24 = vld [vmem:[#allocation253_spill] sm:$0xff]  ;;  %v5255_v42 = vld [vmem:[#allocation251_spill] sm:$0xff]  ;;  %v5256_v11 = vld [vmem:[#allocation236_spill] sm:$0xff] }
 0x520   : > { %v1398_v49 = vadd.f32 %v1396_v18, %v1375_v12  ;;  %v1399_v17 = vadd.f32 %v1397_v50, %v1376_v4  ;;  %v1584_v29 = vstv %s5244_s5  ;;  %v1473_v37 = vsel %vm345_vm10, %v1470_v6, %v1472_v43  ;;  %v5251_v28 = vld [vmem:[#allocation237_spill] sm:$0xff] }
 0x521   : > { %v1411_v39 = vadd.f32 %v5245_v60, %v1388_v9  ;;  %v1412_v25 = vadd.f32 %v5246_v20, %v1389_v46  ;;  %v1416_v51 = vadd.f32 %v5247_v22, %v1393_v7  ;;  %v1417_v55 = vadd.f32 %v5248_v47, %v1394_v59  ;;  %v5257_v46 = vld [vmem:[#allocation261_spill] sm:$0xff]  ;;  %v5259_v59 = vld [vmem:[#allocation263_spill] sm:$0xff]  ;;  %v5262_v60 = vld [vmem:[#allocation262_spill] sm:$0xff] }
 0x522   : > { %v1421_v45 = vadd.f32 %v5249_v40, %v1398_v49  ;;  %v1422_v34 = vadd.f32 %v5250_v24, %v1399_v17  ;;  %v1474_v4 = vsel %vm345_vm10, %v1472_v43, %v1470_v6  ;;  %v1476_v9 = vmul.f32 %v1473_v37, %v2206_v13  ;;  %v5261_v17 = vld [vmem:[#allocation260_spill] sm:$0xff]  ;;  %v5263_v20 = vld [vmem:[#allocation265_spill] sm:$0xff] }
 0x523   : > { %v1427_v12 = vadd.f32 %v5251_v28, %v1412_v25  ;;  %v1432_v32 = vadd.f32 %v5252_v35, %v1417_v55  ;;  %v1426_v57 = vadd.f32 %v5253_v56, %v1411_v39  ;;  %v1431_v33 = vadd.f32 %v5254_v2, %v1416_v51  ;;  %v5264_v22 = vld [vmem:[#allocation264_spill] sm:$0xff] }
 0x524   : > { %v1437_v63 = vadd.f32 %v5255_v42, %v1422_v34  ;;  %v1436_v18 = vadd.f32 %v5256_v11, %v1421_v45  ;;  %v1475_v50 = vmul.f32 %v1474_v4, %v2198_v10  ;;  %v1479_v55 = vmul.f32 %v1477_v3, %v1476_v9  ;;  %v5268_v42 = vld [vmem:[#allocation221_spill] sm:$0xff]  ;;  %v5269_v11 = vld [vmem:[#allocation223_spill] sm:$0xff] }
 0x525   : > { %v1450_v7 = vadd.f32 %v5257_v46, %v1427_v12  ;;  %v1455_v49 = vadd.f32 %v5259_v59, %v1432_v32  ;;  %v1449_v6 = vadd.f32 %v5261_v17, %v1426_v57  ;;  %v1454_v39 = vadd.f32 %v5262_v60, %v1431_v33  ;;  %v1510_v4 = vpop.permute.xlu0 %1509  ;;  %v5271_v46 = vld [vmem:[#allocation240_spill] sm:$0xff]  ;;  %v5272_v59 = vld [vmem:[#allocation241_spill] sm:$0xff] }
 0x526   : > { %v1460_v25 = vadd.f32 %v5263_v20, %v1437_v63  ;;  %v1459_v51 = vadd.f32 %v5264_v22, %v1436_v18  ;;  %v1478_v47 = vmul.f32 %v1477_v3, %v1475_v50  ;;  %v1483_v43 = vmul.f32 %v1482_v41, %v1475_v50  ;;  %v1539_v2 = vpop.permute.xlu1 %1538  ;;  %v5266_v3 = vld [vmem:[#allocation224_spill] sm:$0xff] }
 0x527   : > { %v1484_v40 = vmul.f32 %v1482_v41, %v1476_v9  ;;  %v1488_v45 = vmul.f32 %v1487_v0, %v1475_v50  ;;  %v1489_v24 = vmul.f32 %v1487_v0, %v1476_v9  ;;  %v1481_v37 = vadd.f32 %v1479_v55, %v1450_v7  ;;  %v5270_v50 = vld [vmem:[#allocation226_spill] sm:$0xff] }
 0x528   : > { %v1480_v34 = vadd.f32 %v1478_v47, %v1449_v6  ;;  %v1589_v28 = vstv %s5258_s4  ;;  %v1594_v12 = vstv %s5260_s6  ;;  %v1485_v35 = vadd.f32 %v1483_v43, %v1454_v39 }
 0x529   : > { %v1486_v32 = vadd.f32 %v1484_v40, %v1455_v49  ;;  %v1490_v56 = vadd.f32 %v1488_v45, %v1459_v51  ;;  %v1491_v57 = vadd.f32 %v1489_v24, %v1460_v25  ;;  %v1496_v41 = vadd.f32 %v5268_v42, %v1481_v37 }
 0x52a   : > { %v1495_v33 = vadd.f32 %v5266_v3, %v1480_v34  ;;  %v1511_v0 = vsel %vm378_vm11, %v4148_v23, %v1510_v4  ;;  %v1512_v63 = vsel %vm378_vm11, %v1510_v4, %v4148_v23  ;;  %v1500_v18 = vadd.f32 %v5269_v11, %v1485_v35 }
 0x52b   : > { %v1501_v9 = vadd.f32 %v5270_v50, %v1486_v32  ;;  %v1505_v7 = vadd.f32 %v5271_v46, %v1490_v56  ;;  %v1506_v49 = vadd.f32 %v5272_v59, %v1491_v57  ;;  %v1513_v17 = vmul.f32 %v1511_v0, %v2210_v14  ;;  %v5277_v46 = vld [vmem:[#allocation247_spill] sm:$0xff]  ;;  %v5279_v59 = vld [vmem:[#allocation245_spill] sm:$0xff] }
 0x52c   : > { %v1514_v6 = vmul.f32 %v1512_v63, %v2212_v15  ;;  %v1542_v23 = vsel %vm345_vm10, %v1539_v2, %v4186_v8  ;;  %v1543_v60 = vsel %vm345_vm10, %v4186_v8, %v1539_v2  ;;  %v1676_v25 = vstv %s5265_s12 }
 0x52d   : > { %v1544_v39 = vmul.f32 %v1543_v60, %v2198_v10  ;;  %v1545_v20 = vmul.f32 %v1542_v23, %v2206_v13  ;;  %v1681_v22 = vstv %s5267_s8  ;;  %v1516_v51 = vmul.f32 %v1515_v62, %v1513_v17  ;;  %v1577_v32 = vpop.permute.xlu0 %1576  ;;  %v5281_v23 = vld [vmem:[#allocation246_spill] sm:$0xff] }
 0x52e   : > { %v1517_v47 = vmul.f32 %v1515_v62, %v1514_v6  ;;  %v1521_v55 = vmul.f32 %v1520_v52, %v1513_v17  ;;  %v1522_v43 = vmul.f32 %v1520_v52, %v1514_v6  ;;  %v1526_v40 = vmul.f32 %v1525_v19, %v1513_v17  ;;  %v1579_v2 = vpop.permute.xlu1 %1578 }
 0x52f   : > { %v1527_v8 = vmul.f32 %v1525_v19, %v1514_v6  ;;  %v1547_v45 = vmul.f32 %v1546_v44, %v1544_v39  ;;  %v1548_v24 = vmul.f32 %v1546_v44, %v1545_v20  ;;  %v1518_v34 = vadd.f32 %v1516_v51, %v1495_v33 }
 0x530   : > { %v1519_v37 = vadd.f32 %v1517_v47, %v1496_v41  ;;  %v1523_v4 = vadd.f32 %v1521_v55, %v1500_v18  ;;  %v1524_v35 = vadd.f32 %v1522_v43, %v1501_v9  ;;  %v1528_v62 = vadd.f32 %v1526_v40, %v1505_v7  ;;  %v5275_v18 = vld [vmem:[#allocation243_spill] sm:$0xff] }
 0x531   : > { %v1529_v56 = vadd.f32 %v1527_v8, %v1506_v49  ;;  %v1552_v57 = vmul.f32 %v1551_v48, %v1544_v39  ;;  %v1553_v52 = vmul.f32 %v1551_v48, %v1545_v20  ;;  %v1549_v3 = vadd.f32 %v1547_v45, %v1518_v34 }
 0x532   : > { %v1550_v42 = vadd.f32 %v1548_v24, %v1519_v37  ;;  %v1557_v19 = vmul.f32 %v1556_v53, %v1544_v39  ;;  %v1558_v0 = vmul.f32 %v1556_v53, %v1545_v20  ;;  %v1580_v41 = vsel %vm378_vm11, %v1577_v32, %v1579_v2  ;;  %v5276_v53 = vld [vmem:[#allocation242_spill] sm:$0xff]  ;;  %v5282_v39 = vld [vmem:[#allocation244_spill] sm:$0xff] }
 0x533   : > { %v1554_v44 = vadd.f32 %v1552_v57, %v1523_v4  ;;  %v1555_v33 = vadd.f32 %v1553_v52, %v1524_v35  ;;  %v1581_v48 = vsel %vm378_vm11, %v1579_v2, %v1577_v32  ;;  %v1564_v9 = vadd.f32 %v5276_v53, %v1549_v3  ;;  %v5287_v53 = vld [vmem:[#allocation222_spill] sm:$0xff] }
 0x534   : > { %v1559_v63 = vadd.f32 %v1557_v19, %v1528_v62  ;;  %v1560_v11 = vadd.f32 %v1558_v0, %v1529_v56  ;;  %v1565_v50 = vadd.f32 %v5275_v18, %v1550_v42  ;;  %v1582_v17 = vmul.f32 %v1580_v41, %v2210_v14  ;;  %v5285_v18 = vld [vmem:[#allocation252_spill] sm:$0xff] }
 0x535   : > { %v1570_v7 = vadd.f32 %v5277_v46, %v1555_v33  ;;  %v1569_v49 = vadd.f32 %v5279_v59, %v1554_v44  ;;  %v1583_v6 = vmul.f32 %v1581_v48, %v2212_v15  ;;  %v1686_v51 = vstv %s5273_s2  ;;  %v1669_v34 = vpop.permute.xlu0 %1668  ;;  %v5283_v48 = vld [vmem:[#allocation254_spill] sm:$0xff]  ;;  %s5290_s2 = sld [smem:[#allocation211_spill]] }
 0x536   : > { %v1575_v60 = vadd.f32 %v5281_v23, %v1560_v11  ;;  %v1574_v20 = vadd.f32 %v5282_v39, %v1559_v63  ;;  %v1714_v47 = vstv %s5274_s3  ;;  %v1585_v55 = vmul.f32 %v1584_v29, %v1582_v17  ;;  %v1671_v57 = vpop.permute.xlu1 %1670  ;;  %v5284_v11 = vld [vmem:[#allocation256_spill] sm:$0xff]  ;;  %s5299_s3 = sld [smem:[#allocation267_spill]] }
 0x537   : > { %v1586_v43 = vmul.f32 %v1584_v29, %v1583_v6  ;;  %v1590_v40 = vmul.f32 %v1589_v28, %v1582_v17  ;;  %v1591_v8 = vmul.f32 %v1589_v28, %v1583_v6  ;;  %v1595_v45 = vmul.f32 %v1594_v12, %v1582_v17 }
 0x538   : > { %v1596_v24 = vmul.f32 %v1594_v12, %v1583_v6  ;;  %v1719_v37 = vstv %s5278_s0  ;;  %v1724_v4 = vstv %s5280_s7  ;;  %v1587_v35 = vadd.f32 %v1585_v55, %v1564_v9  ;;  %v5288_v9 = vld [vmem:[#allocation257_spill] sm:$0xff]  ;;  %v1707_v55 = vpop.permute.xlu2 %1706  ;;  %s5289_s0 = sld [smem:[#allocation210_spill]] }
 0x539   : > { %v1588_v32 = vadd.f32 %v1586_v43, %v1565_v50  ;;  %v1592_v62 = vadd.f32 %v1590_v40, %v1569_v49  ;;  %v1593_v56 = vadd.f32 %v1591_v8, %v1570_v7  ;;  %v1597_v52 = vadd.f32 %v1595_v45, %v1574_v20  ;;  %v5286_v50 = vld [vmem:[#allocation255_spill] sm:$0xff]  ;;  %s5291_s7 = sld [smem:[#allocation212_spill]]  ;;  %v5292_v8 = vld [vmem:[#allocation249_spill] sm:$0xff] }
 0x53a   : > { %v1598_v2 = vadd.f32 %v1596_v24, %v1575_v60  ;;  %v1672_v29 = vsel %vm345_vm10, %v1669_v34, %v1671_v57  ;;  %v1673_v28 = vsel %vm345_vm10, %v1671_v57, %v1669_v34  ;;  %v1610_v12 = vadd.f32 %v4264_v58, %v1587_v35  ;;  %v5293_v24 = vld [vmem:[#allocation248_spill] sm:$0xff]  ;;  %v5294_v35 = vld [vmem:[#allocation219_spill] sm:$0xff] }
 0x53b   : > { %v1611_v3 = vadd.f32 %v4268_v21, %v1588_v32  ;;  %v1615_v42 = vadd.f32 %v4274_v31, %v1592_v62  ;;  %v1616_v19 = vadd.f32 %v4278_v26, %v1593_v56  ;;  %v1620_v0 = vadd.f32 %v4282_v36, %v1597_v52  ;;  %v5295_v32 = vld [vmem:[#allocation220_spill] sm:$0xff] }
 0x53c   : > { %v1621_v44 = vadd.f32 %v4286_v54, %v1598_v2  ;;  %v1674_v33 = vmul.f32 %v1673_v28, %v2198_v10  ;;  %v1675_v41 = vmul.f32 %v1672_v29, %v2206_v13  ;;  %v1625_v21 = vadd.f32 %v5285_v18, %v1610_v12  ;;  %v5296_v2 = vld [vmem:[#allocation228_spill] sm:$0xff]  ;;  %v5297_v28 = vld [vmem:[#allocation230_spill] sm:$0xff] }
 0x53d   : > { %v1626_v63 = vadd.f32 %v5283_v48, %v1611_v3  ;;  %v1631_v58 = vadd.f32 %v5284_v11, %v1616_v19  ;;  %v1630_v31 = vadd.f32 %v5286_v50, %v1615_v42  ;;  %v1635_v36 = vadd.f32 %v5288_v9, %v1620_v0  ;;  %v1709_v20 = vpop.permute.xlu0 %1708 }
 0x53e   : > { %v1636_v26 = vadd.f32 %v5287_v53, %v1621_v44  ;;  %v1677_v54 = vmul.f32 %v1676_v25, %v1674_v33  ;;  %v1678_v46 = vmul.f32 %v1676_v25, %v1675_v41  ;;  %v1648_v49 = vadd.f32 %v4288_v30, %v1625_v21 }
 0x53f   : > { %v1649_v7 = vadd.f32 %v4290_v61, %v1626_v63  ;;  %v1654_v59 = vadd.f32 %v4302_v5, %v1631_v58  ;;  %v1653_v17 = vadd.f32 %v4298_v38, %v1630_v31  ;;  %v1658_v23 = vadd.f32 %v4306_v16, %v1635_v36 }
 0x540   : > { %v1659_v6 = vadd.f32 %v4308_v27, %v1636_v26  ;;  %v1682_v60 = vmul.f32 %v1681_v22, %v1674_v33  ;;  %v1683_v39 = vmul.f32 %v1681_v22, %v1675_v41  ;;  %v1679_v43 = vadd.f32 %v1677_v54, %v1648_v49  ;;  %v5300_v49 = vld [vmem:[#allocation213_spill] sm:$0xff] }
 0x541   : > { %v1680_v25 = vadd.f32 %v1678_v46, %v1649_v7  ;;  %v1687_v61 = vmul.f32 %v1686_v51, %v1674_v33  ;;  %v1688_v40 = vmul.f32 %v1686_v51, %v1675_v41  ;;  %v1710_v38 = vsel %vm378_vm11, %v1707_v55, %v1709_v20 }
 0x542   : > { %v1684_v5 = vadd.f32 %v1682_v60, %v1653_v17  ;;  %v1685_v30 = vadd.f32 %v1683_v39, %v1654_v59  ;;  %v1711_v16 = vsel %vm378_vm11, %v1709_v20, %v1707_v55  ;;  %v1694_v45 = vadd.f32 %v5292_v8, %v1679_v43  ;;  %v5302_v60 = vld [vmem:[#allocation215_spill] sm:$0xff]  ;;  %v5303_v20 = vld [vmem:[#allocation216_spill] sm:$0xff]  ;;  %v5304_v43 = vld [vmem:[#allocation217_spill] sm:$0xff] }
 0x543   : > { %v1689_v27 = vadd.f32 %v1687_v61, %v1658_v23  ;;  %v1690_v22 = vadd.f32 %v1688_v40, %v1659_v6  ;;  %v1695_v34 = vadd.f32 %v5293_v24, %v1680_v25  ;;  %v1712_v56 = vmul.f32 %v1710_v38, %v2210_v14  ;;  %v5301_v6 = vld [vmem:[#allocation214_spill] sm:$0xff] }
 0x544   : > { %v1699_v51 = vadd.f32 %v5294_v35, %v1684_v5  ;;  %v1700_v62 = vadd.f32 %v5295_v32, %v1685_v30  ;;  %v1713_v57 = vmul.f32 %v1711_v16, %v2212_v15  ;;  %v1729_v52 = vstv %s5289_s0  ;;  %s5298_s0 = sshll.u32 %s2596_s1, 4  ;;  %v5305_v61 = vld [vmem:[#allocation218_spill] sm:$0xff] }
 0x545   : > { %v1704_v29 = vadd.f32 %v5296_v2, %v1689_v27  ;;  %v1705_v12 = vadd.f32 %v5297_v28, %v1690_v22  ;;  %v1715_v3 = vmul.f32 %v1714_v47, %v1712_v56  ;;  %v1720_v19 = vmul.f32 %v1719_v37, %v1712_v56  ;;  %s1743_s4 = scalar_lea.vmem %s5299_s3, %s5298_s0 }
 0x546   : > { %v1716_v42 = vmul.f32 %v1714_v47, %v1713_v57  ;;  %v1721_v0 = vmul.f32 %v1719_v37, %v1713_v57  ;;  %v1732_v44 = vstv %s5290_s2  ;;  %v1735_v33 = vstv %s5291_s7 }
 0x547   : > { %v1725_v41 = vmul.f32 %v1724_v4, %v1712_v56  ;;  %v1726_v48 = vmul.f32 %v1724_v4, %v1713_v57  ;;  %v1717_v63 = vadd.f32 %v1715_v3, %v1694_v45  ;;  %v1722_v58 = vadd.f32 %v1720_v19, %v1699_v51 }
 0x548   : > { %v1718_v11 = vadd.f32 %v1716_v42, %v1695_v34  ;;  %v1723_v18 = vadd.f32 %v1721_v0, %v1700_v62 }
 0x549   : > { %v1727_v21 = vadd.f32 %v1725_v41, %v1704_v29  ;;  %v1728_v50 = vadd.f32 %v1726_v48, %v1705_v12  ;;  %v1730_v31 = vadd.f32 %v1729_v52, %v1717_v63  ;;  %v1733_v26 = vadd.f32 %v1732_v44, %v1722_v58 }
 0x54a   : > { %v1731_v53 = vadd.f32 %v1729_v52, %v1718_v11  ;;  %v1734_v9 = vadd.f32 %v1732_v44, %v1723_v18 }
 0x54b   : > { %v1736_v36 = vadd.f32 %v1735_v33, %v1727_v21  ;;  %v1737_v54 = vadd.f32 %v1735_v33, %v1728_v50  ;;  %v1738_v47 = vmax.f32 %v1730_v31, 0.0  ;;  %v1746_v37 = vmax.f32 %v1733_v26, 0.0 }
 0x54c   : > { %v1739_v46 = vmax.f32 %v1731_v53, 0.0  ;;  %v1747_v7 = vmax.f32 %v1734_v9, 0.0 }
 0x54d   : > { %v1755_v4 = vmax.f32 %v1736_v36, 0.0  ;;  %v1756_v59 = vmax.f32 %v1737_v54, 0.0  ;;  %v1740_v17 = vadd.f32 %v1738_v47, %v5300_v49  ;;  %v1748_v39 = vadd.f32 %v1746_v37, %v5302_v60 }
 0x54e   : > { %v1741_v23 = vadd.f32 %v1739_v46, %v5301_v6  ;;  %v1749_v55 = vadd.f32 %v1747_v7, %v5303_v20 }
 0x54f   : > { %1744 = vst [vmem:[%s1743_s4] sm:$0xff] %v1740_v17  ;;  %v1757_v25 = vadd.f32 %v1755_v4, %v5304_v43  ;;  %v1758_v40 = vadd.f32 %v1756_v59, %v5305_v61 }
 0x550   : > { %1745 = vst [vmem:[%s1743_s4 + $0x8] sm:$0xff] %v1741_v23  ;;  %322 = sbr.rel (!%p320_p0) target bundleno = 422 (0x1a6), region = 83 }
 0x551   : > { %1987 = vst [vmem:[%s1743_s4 + $0x20] sm:$0xff] %v1748_v39 }
 0x552   : > { %1988 = vst [vmem:[%s1743_s4 + $0x28] sm:$0xff] %v1749_v55 }
 0x553   : > { %1991 = vst [vmem:[%s1743_s4 + $0x40] sm:$0xff] %v1757_v25 }
 0x554   : > { %1992 = vst [vmem:[%s1743_s4 + $0x48] sm:$0xff] %v1758_v40 }
 0x555   :  { %1768 = vsyncpa [#allocation3], 1 }
 0x556   :  { %1769 = vsyncpa [#allocation5], 1 }
 0x557   :  { %1770 = vsyncpa [#allocation8], 1 }
 0x558   :  { %1771 = vsyncpa [#allocation11], 1 }

</bundles_post_ra>
